<compile_context>
chip_gen: v5e
topology: v5e:2x2
jax: 0.10.0
libtpu: 0.0.40
codegen_flags: <defaults>
</compile_context>

<pallas_src>
import jax
import jax.numpy as jnp
from jax.experimental import pallas as pl
from jax.experimental.pallas import tpu as pltpu


# ----------------------------------------------------------------------------
# Pallas kernel: one (tb x tn2) tile of the pairwise covariance matrix.
# ----------------------------------------------------------------------------
def _deepwdk_kernel(lam_ref, a_ref, b_ref, rk1_ref, rk2_ref, o_ref):
    """K_tile = rk1 * (sum_k lam[k] * (A[k] @ B)^2) * rk2.

    lam_ref: (L,) f32 in SMEM      -- 0.25 * eigenvalues of W
    a_ref:   (L, tb, 2*L*A)  bf16  -- X1-side features with V (and 0.5) folded in
    b_ref:   (2*L*A, tn2)    bf16  -- X2-side features, lane-dense in j
    rk1_ref: (tb, 1) f32, rk2_ref: (1, tn2) f32 -- a^2/sqrt(k1), 1/sqrt(k2)
    """
    b = b_ref[...]                                    # lane-dense MXU RHS
    acc = jnp.zeros(o_ref.shape, jnp.float32)
    for k in range(a_ref.shape[0]):                   # static unroll over the L eigencomponents
        z = jnp.dot(a_ref[k], b, preferred_element_type=jnp.float32)   # (tb, tn2)
        acc = acc + lam_ref[k] * (z * z)              # SMEM scalar * full tile
    # Single lane/sublane-dense store of the whole tile.
    o_ref[...] = (rk1_ref[...] * acc * rk2_ref[...]).astype(o_ref.dtype)


# ----------------------------------------------------------------------------
# Hoisted, grid-invariant per-sequence work (plain JAX).
# ----------------------------------------------------------------------------
def _round_up(x, m):
    return ((x + m - 1) // m) * m


def _build_w(w_flat, L):
    ix, iy = jnp.tril_indices(L, k=-1)
    Wm = jnp.zeros((L, L), jnp.float32).at[ix, iy].set(w_flat)
    Wm = Wm.at[iy, ix].set(w_flat)
    return jax.nn.sigmoid(Wm)                    # diagonal -> sigmoid(0) = 0.5


def _seq_S(X, net_w, n_aa):
    # TODO(synk): stands in for the arbitrary nn.Module `network`.
    n, L = X.shape
    h = jax.nn.one_hot(X, n_aa, dtype=jnp.float32).reshape(n, L * n_aa)
    M = (h @ net_w).reshape(n, n_aa, -1)         # network(X).view(n, n_aa, -1)
    return jnp.einsum('nad,nbd->nab', M, M)      # bmm(M, M^T): (n, n_aa, n_aa)


def _seq_features(X, S, W, n_aa):
    E = jax.nn.one_hot(X, n_aa, dtype=jnp.float32)       # (n, L, A)
    G = jnp.einsum('nab,nla->nlb', S, E)                 # G[i,l,:] = S[i, X[i,l], :]
    diag = jnp.einsum('nla,nla->nl', G, E)               # S[i, X[i,l], X[i,l]]
    k = jnp.einsum('nl,lm,nm->n', diag, W, diag)         # self-normalizer wdk(diag, W)
    return G, E, k


# ----------------------------------------------------------------------------
# Forward wrapper.
# ----------------------------------------------------------------------------
def deep_wdk_forward(X1, X2, w_flat, a, net_w, n_aa, *, tb=128, tn2=512,
                     feature_dtype=jnp.bfloat16):
    """DeepWDK.forward(X1, X2) -> (n1, n2) covariance, via a Pallas TPU kernel.

    X1: (n1, L) int tokens in [0, n_aa);  X2: (n2, L).
    tb:  X1 row tile (multiple of 16 for bf16 features, 8 for f32).
    tn2: X2 column tile (multiple of 128).
    """
    n1, L = X1.shape
    n2, L2 = X2.shape
    assert L == L2
    A = n_aa
    K2 = 2 * A * L                     # fused contraction depth (G||E concat, V folded)
    assert tb % (16 if feature_dtype == jnp.bfloat16 else 8) == 0
    assert tn2 % 128 == 0

    # ---- per-sequence / per-parameter precompute (grid-invariant, hoisted) ----
    W = _build_w(w_flat, L)                            # (L, L)
    S1 = _seq_S(X1, net_w, A)                          # (n1, A, A)
    S2 = _seq_S(X2, net_w, A)                          # (n2, A, A)
    G1, E1, k1 = _seq_features(X1, S1, W, A)
    G2, E2, k2 = _seq_features(X2, S2, W, A)

    a2 = jnp.asarray(a, jnp.float32) ** 2
    rk1 = a2 / jnp.sqrt(k1)                            # fold a^2 into the row norm
    rk2 = 1.0 / jnp.sqrt(k2)

    # Eigendecompose W (L x L, symmetric): W = V diag(lam) V^T.  Folding V into
    # the X1-side features turns the per-pair quadratic form p^T W p (with
    # p_ij[l] = 0.5 * C1[i,l,:].C2[j,l,:]) into
    #     K_raw[i,j] = sum_k lam_k * (A_k[i,:] . B[:,j])^2
    # -- full-depth 2-D MXU matmuls, no (L, tb, tn2) intermediates in the kernel.
    lam, V = jnp.linalg.eigh(W)
    lam = (0.25 * lam).astype(jnp.float32)             # absorbs the 0.5 of subs=(S1+S2)/2

    C1 = jnp.concatenate([G1, E1], axis=-1)            # (n1, L, 2A)
    C2 = jnp.concatenate([E2, G2], axis=-1)            # (n2, L, 2A)
    # C1[i,l,:] . C2[j,l,:] = S1[i, X1[i,l], X2[j,l]] + S2[j, X1[i,l], X2[j,l]]
    Afeat = jnp.einsum('lk,ilc->kilc', V, C1).reshape(L, n1, K2)   # (L, n1, 2LA)
    Bfeat = C2.reshape(n2, K2).T                                   # (2LA, n2): lane-dense in j

    # ---- pad to tile multiples (no divisibility restriction on n1/n2) ----
    n1p = _round_up(n1, tb)
    n2p = _round_up(n2, tn2)
    Afeat = jnp.pad(Afeat, ((0, 0), (0, n1p - n1), (0, 0))).astype(feature_dtype)
    Bfeat = jnp.pad(Bfeat, ((0, 0), (0, n2p - n2))).astype(feature_dtype)
    rk1p = jnp.pad(rk1, (0, n1p - n1), constant_values=1.0).reshape(n1p, 1)
    rk2p = jnp.pad(rk2, (0, n2p - n2), constant_values=1.0).reshape(1, n2p)

    gi, gj = n1p // tb, n2p // tn2

    feat_bytes = jnp.dtype(feature_dtype).itemsize
    flops = int(n1p) * int(n2p) * (2 * K2 * L + 3 * L)
    bytes_accessed = int(n1p * n2p * 4                 # output tiles, stored once
                         + n1p * L * K2 * feat_bytes   # X1-side block, resident per grid row
                         + gi * n2p * K2 * feat_bytes  # X2-side stream, restreamed gi times
                         + gi * n2p * 4 + n1p * 4)

    grid_spec = pltpu.PrefetchScalarGridSpec(
        num_scalar_prefetch=0,
        # j (the light, lane-dense X2-side stream: ~K2*tn2 bytes/step) is the
        # inner grid axis; the heavier X1-side block stays resident per row.
        grid=(gi, gj),
        in_specs=[
            # eigenvalues: tiny scalar table in SMEM
            pl.BlockSpec(memory_space=pltpu.MemorySpace.SMEM),
            # X1-side features: block index i on the sequence axis
            pl.BlockSpec((L, tb, K2), lambda i, j: (0, i, 0)),
            # X2-side features: lane-dense RHS, block index j on the sequence axis
            pl.BlockSpec((K2, tn2), lambda i, j: (0, j)),
            pl.BlockSpec((tb, 1), lambda i, j: (i, 0)),      # a^2 / sqrt(k1)
            pl.BlockSpec((1, tn2), lambda i, j: (0, j)),     # 1 / sqrt(k2)
        ],
        out_specs=pl.BlockSpec((tb, tn2), lambda i, j: (i, j)),
    )

    out = pl.pallas_call(
        _deepwdk_kernel,
        out_shape=jax.ShapeDtypeStruct((n1p, n2p), jnp.float32),
        grid_spec=grid_spec,
        compiler_params=pltpu.CompilerParams(
            dimension_semantics=("parallel", "parallel"),
            # Working set is only a few MiB/step at (128, 512); 48 MiB is a safe
            # ceiling on every generation (v7x scoped VMEM must stay <= ~48 MiB;
            # v5e/v6e can be raised further if tiles are enlarged).
            vmem_limit_bytes=48 * 1024 * 1024),
        cost_estimate=pl.CostEstimate(
            flops=flops, transcendentals=0, bytes_accessed=bytes_accessed),
    )(lam, Afeat, Bfeat, rk1p, rk2p)

    return out[:n1, :n2]


# ----------------------------------------------------------------------------
# Pure-JAX reference mirroring the PyTorch forward (gather-based path).
# ----------------------------------------------------------------------------
def _deepwdk_reference(X1, X2, w_flat, a, net_w, n_aa):
    n1, L = X1.shape
    n2, _ = X2.shape
    W = _build_w(w_flat, L)
    S1 = _seq_S(X1, net_w, n_aa)
    S2 = _seq_S(X2, net_w, n_aa)

    def wdk(subs):                                    # (..., L) -> (...)
        temp = jnp.einsum('...l,lm->...m', subs, W)
        return jnp.sum(temp * subs, axis=-1)

    r1 = jnp.arange(n1)
    r2 = jnp.arange(n2)
    diag1 = S1[r1[:, None], X1, X1]                   # (n1, L)
    diag2 = S2[r2[:, None], X2, X2]                   # (n2, L)
    k1 = wdk(diag1)[:, None]
    k2 = wdk(diag2)[None, :]

    subs = 0.5 * (S1[r1[:, None, None], X1[:, None, :], X2[None, :, :]]
                  + S2[r2[None, :, None], X1[:, None, :], X2[None, :, :]])
    K = wdk(subs)                                     # (n1, n2)
    K = K / jnp.sqrt(k1) / jnp.sqrt(k2)
    return (a ** 2) * K


if __name__ == "__main__":
    key = jax.random.PRNGKey(0)
    k_x1, k_x2, k_w, k_net = jax.random.split(key, 4)

    # Small, module-consistent shapes: n1/n2 sequences of length L over an
    # n_aa-letter alphabet; `network` embedding dim sub_dim.  Sizes chosen so
    # the default (tb, tn2) = (128, 512) tiling yields a (2, 2) grid, i.e. the
    # multi-block index maps on both grid axes are actually exercised.
    n1, n2, L = 160, 640, 8
    n_aa, sub_dim = 4, 8
    a = 0.7

    X1 = jax.random.randint(k_x1, (n1, L), 0, n_aa)
    X2 = jax.random.randint(k_x2, (n2, L), 0, n_aa)
    w_flat = 0.3 * jax.random.normal(k_w, (L * (L - 1) // 2,), dtype=jnp.float32)
    net_w = jax.random.normal(k_net, (L * n_aa, n_aa * sub_dim),
                              dtype=jnp.float32) / jnp.sqrt(float(L * n_aa))

    out = deep_wdk_forward(X1, X2, w_flat, a, net_w, n_aa)
    out = jax.block_until_ready(out)
    assert out.shape == (n1, n2)

    ref = _deepwdk_reference(X1, X2, w_flat, a, net_w, n_aa)
    err = jnp.max(jnp.abs(out - ref))
    # Tolerance covers the bf16 feature streams (f32 MXU accumulation); any
    # structural/indexing error would be O(1).
    assert jnp.allclose(out, ref, atol=2.5e-2, rtol=2.5e-2), f"max abs err = {err}"
    print("KERNEL_OK")
</pallas_src>

<mosaic_0001>
module attributes {stable_mosaic.version = 11 : i64} {
  func.func @_deepwdk_kernel(%arg0: i32, %arg1: i32, %arg2: memref<8xf32, #tpu.memory_space<smem>>, %arg3: memref<8x128x64xbf16, #tpu.memory_space<vmem>>, %arg4: memref<64x512xbf16, #tpu.memory_space<vmem>>, %arg5: memref<128x1xf32, #tpu.memory_space<vmem>>, %arg6: memref<1x512xf32, #tpu.memory_space<vmem>>, %arg7: memref<128x512xf32, #tpu.memory_space<vmem>>) attributes {dimension_semantics = [#tpu.dimension_semantics<parallel>, #tpu.dimension_semantics<parallel>], iteration_bounds = array<i64: 2, 2>, scalar_prefetch = 0 : i64, scratch_operands = 0 : i64, tpu.core_type = #tpu.core_type<tc>, window_params = [{transform_indices = @transform_0, window_bounds = array<i64: 8>}, {transform_indices = @transform_1, window_bounds = array<i64: 8, 128, 64>}, {transform_indices = @transform_2, window_bounds = array<i64: 64, 512>}, {transform_indices = @transform_3, window_bounds = array<i64: 128, 1>}, {transform_indices = @transform_4, window_bounds = array<i64: 1, 512>}, {transform_indices = @transform_5, window_bounds = array<i64: 128, 512>}]} {
    %c0 = arith.constant 0 : index
    %c0_0 = arith.constant 0 : index
    %0 = vector.load %arg4[%c0, %c0_0] : memref<64x512xbf16, #tpu.memory_space<vmem>>, vector<64x512xbf16>
    %cst = arith.constant 0.000000e+00 : f32
    %1 = vector.broadcast %cst : f32 to vector<128x512xf32>
    %c0_1 = arith.constant 0 : index
    %c0_2 = arith.constant 0 : index
    %c0_3 = arith.constant 0 : index
    %2 = vector.load %arg3[%c0_1, %c0_2, %c0_3] : memref<8x128x64xbf16, #tpu.memory_space<vmem>>, vector<1x128x64xbf16>
    %3 = vector.shape_cast %2 : vector<1x128x64xbf16> to vector<128x64xbf16>
    %cst_4 = arith.constant dense<0.000000e+00> : vector<128x512xf32>
    %4 = tpu.matmul %3, %0, %cst_4 {dimension_numbers = #tpu.dot_dimension_numbers<[1], [0], [0], [1], [0, 0, 1, 1], [], []>} : vector<128x64xbf16>, vector<64x512xbf16>, vector<128x512xf32> -> vector<128x512xf32>
    %c0_5 = arith.constant 0 : index
    %5 = memref.load %arg2[%c0_5] : memref<8xf32, #tpu.memory_space<smem>>
    %6 = arith.mulf %4, %4 : vector<128x512xf32>
    %7 = vector.broadcast %5 : f32 to vector<128x512xf32>
    %8 = arith.mulf %7, %6 : vector<128x512xf32>
    %9 = arith.addf %1, %8 : vector<128x512xf32>
    %c1 = arith.constant 1 : index
    %c0_6 = arith.constant 0 : index
    %c0_7 = arith.constant 0 : index
    %10 = vector.load %arg3[%c1, %c0_6, %c0_7] : memref<8x128x64xbf16, #tpu.memory_space<vmem>>, vector<1x128x64xbf16>
    %11 = vector.shape_cast %10 : vector<1x128x64xbf16> to vector<128x64xbf16>
    %cst_8 = arith.constant dense<0.000000e+00> : vector<128x512xf32>
    %12 = tpu.matmul %11, %0, %cst_8 {dimension_numbers = #tpu.dot_dimension_numbers<[1], [0], [0], [1], [0, 0, 1, 1], [], []>} : vector<128x64xbf16>, vector<64x512xbf16>, vector<128x512xf32> -> vector<128x512xf32>
    %c1_9 = arith.constant 1 : index
    %13 = memref.load %arg2[%c1_9] : memref<8xf32, #tpu.memory_space<smem>>
    %14 = arith.mulf %12, %12 : vector<128x512xf32>
    %15 = vector.broadcast %13 : f32 to vector<128x512xf32>
    %16 = arith.mulf %15, %14 : vector<128x512xf32>
    %17 = arith.addf %9, %16 : vector<128x512xf32>
    %c2 = arith.constant 2 : index
    %c0_10 = arith.constant 0 : index
    %c0_11 = arith.constant 0 : index
    %18 = vector.load %arg3[%c2, %c0_10, %c0_11] : memref<8x128x64xbf16, #tpu.memory_space<vmem>>, vector<1x128x64xbf16>
    %19 = vector.shape_cast %18 : vector<1x128x64xbf16> to vector<128x64xbf16>
    %cst_12 = arith.constant dense<0.000000e+00> : vector<128x512xf32>
    %20 = tpu.matmul %19, %0, %cst_12 {dimension_numbers = #tpu.dot_dimension_numbers<[1], [0], [0], [1], [0, 0, 1, 1], [], []>} : vector<128x64xbf16>, vector<64x512xbf16>, vector<128x512xf32> -> vector<128x512xf32>
    %c2_13 = arith.constant 2 : index
    %21 = memref.load %arg2[%c2_13] : memref<8xf32, #tpu.memory_space<smem>>
    %22 = arith.mulf %20, %20 : vector<128x512xf32>
    %23 = vector.broadcast %21 : f32 to vector<128x512xf32>
    %24 = arith.mulf %23, %22 : vector<128x512xf32>
    %25 = arith.addf %17, %24 : vector<128x512xf32>
    %c3 = arith.constant 3 : index
    %c0_14 = arith.constant 0 : index
    %c0_15 = arith.constant 0 : index
    %26 = vector.load %arg3[%c3, %c0_14, %c0_15] : memref<8x128x64xbf16, #tpu.memory_space<vmem>>, vector<1x128x64xbf16>
    %27 = vector.shape_cast %26 : vector<1x128x64xbf16> to vector<128x64xbf16>
    %cst_16 = arith.constant dense<0.000000e+00> : vector<128x512xf32>
    %28 = tpu.matmul %27, %0, %cst_16 {dimension_numbers = #tpu.dot_dimension_numbers<[1], [0], [0], [1], [0, 0, 1, 1], [], []>} : vector<128x64xbf16>, vector<64x512xbf16>, vector<128x512xf32> -> vector<128x512xf32>
    %c3_17 = arith.constant 3 : index
    %29 = memref.load %arg2[%c3_17] : memref<8xf32, #tpu.memory_space<smem>>
    %30 = arith.mulf %28, %28 : vector<128x512xf32>
    %31 = vector.broadcast %29 : f32 to vector<128x512xf32>
    %32 = arith.mulf %31, %30 : vector<128x512xf32>
    %33 = arith.addf %25, %32 : vector<128x512xf32>
    %c4 = arith.constant 4 : index
    %c0_18 = arith.constant 0 : index
    %c0_19 = arith.constant 0 : index
    %34 = vector.load %arg3[%c4, %c0_18, %c0_19] : memref<8x128x64xbf16, #tpu.memory_space<vmem>>, vector<1x128x64xbf16>
    %35 = vector.shape_cast %34 : vector<1x128x64xbf16> to vector<128x64xbf16>
    %cst_20 = arith.constant dense<0.000000e+00> : vector<128x512xf32>
    %36 = tpu.matmul %35, %0, %cst_20 {dimension_numbers = #tpu.dot_dimension_numbers<[1], [0], [0], [1], [0, 0, 1, 1], [], []>} : vector<128x64xbf16>, vector<64x512xbf16>, vector<128x512xf32> -> vector<128x512xf32>
    %c4_21 = arith.constant 4 : index
    %37 = memref.load %arg2[%c4_21] : memref<8xf32, #tpu.memory_space<smem>>
    %38 = arith.mulf %36, %36 : vector<128x512xf32>
    %39 = vector.broadcast %37 : f32 to vector<128x512xf32>
    %40 = arith.mulf %39, %38 : vector<128x512xf32>
    %41 = arith.addf %33, %40 : vector<128x512xf32>
    %c5 = arith.constant 5 : index
    %c0_22 = arith.constant 0 : index
    %c0_23 = arith.constant 0 : index
    %42 = vector.load %arg3[%c5, %c0_22, %c0_23] : memref<8x128x64xbf16, #tpu.memory_space<vmem>>, vector<1x128x64xbf16>
    %43 = vector.shape_cast %42 : vector<1x128x64xbf16> to vector<128x64xbf16>
    %cst_24 = arith.constant dense<0.000000e+00> : vector<128x512xf32>
    %44 = tpu.matmul %43, %0, %cst_24 {dimension_numbers = #tpu.dot_dimension_numbers<[1], [0], [0], [1], [0, 0, 1, 1], [], []>} : vector<128x64xbf16>, vector<64x512xbf16>, vector<128x512xf32> -> vector<128x512xf32>
    %c5_25 = arith.constant 5 : index
    %45 = memref.load %arg2[%c5_25] : memref<8xf32, #tpu.memory_space<smem>>
    %46 = arith.mulf %44, %44 : vector<128x512xf32>
    %47 = vector.broadcast %45 : f32 to vector<128x512xf32>
    %48 = arith.mulf %47, %46 : vector<128x512xf32>
    %49 = arith.addf %41, %48 : vector<128x512xf32>
    %c6 = arith.constant 6 : index
    %c0_26 = arith.constant 0 : index
    %c0_27 = arith.constant 0 : index
    %50 = vector.load %arg3[%c6, %c0_26, %c0_27] : memref<8x128x64xbf16, #tpu.memory_space<vmem>>, vector<1x128x64xbf16>
    %51 = vector.shape_cast %50 : vector<1x128x64xbf16> to vector<128x64xbf16>
    %cst_28 = arith.constant dense<0.000000e+00> : vector<128x512xf32>
    %52 = tpu.matmul %51, %0, %cst_28 {dimension_numbers = #tpu.dot_dimension_numbers<[1], [0], [0], [1], [0, 0, 1, 1], [], []>} : vector<128x64xbf16>, vector<64x512xbf16>, vector<128x512xf32> -> vector<128x512xf32>
    %c6_29 = arith.constant 6 : index
    %53 = memref.load %arg2[%c6_29] : memref<8xf32, #tpu.memory_space<smem>>
    %54 = arith.mulf %52, %52 : vector<128x512xf32>
    %55 = vector.broadcast %53 : f32 to vector<128x512xf32>
    %56 = arith.mulf %55, %54 : vector<128x512xf32>
    %57 = arith.addf %49, %56 : vector<128x512xf32>
    %c7 = arith.constant 7 : index
    %c0_30 = arith.constant 0 : index
    %c0_31 = arith.constant 0 : index
    %58 = vector.load %arg3[%c7, %c0_30, %c0_31] : memref<8x128x64xbf16, #tpu.memory_space<vmem>>, vector<1x128x64xbf16>
    %59 = vector.shape_cast %58 : vector<1x128x64xbf16> to vector<128x64xbf16>
    %cst_32 = arith.constant dense<0.000000e+00> : vector<128x512xf32>
    %60 = tpu.matmul %59, %0, %cst_32 {dimension_numbers = #tpu.dot_dimension_numbers<[1], [0], [0], [1], [0, 0, 1, 1], [], []>} : vector<128x64xbf16>, vector<64x512xbf16>, vector<128x512xf32> -> vector<128x512xf32>
    %c7_33 = arith.constant 7 : index
    %61 = memref.load %arg2[%c7_33] : memref<8xf32, #tpu.memory_space<smem>>
    %62 = arith.mulf %60, %60 : vector<128x512xf32>
    %63 = vector.broadcast %61 : f32 to vector<128x512xf32>
    %64 = arith.mulf %63, %62 : vector<128x512xf32>
    %65 = arith.addf %57, %64 : vector<128x512xf32>
    %c0_34 = arith.constant 0 : index
    %c0_35 = arith.constant 0 : index
    %66 = vector.load %arg5[%c0_34, %c0_35] : memref<128x1xf32, #tpu.memory_space<vmem>>, vector<128x1xf32>
    %67 = vector.broadcast %66 : vector<128x1xf32> to vector<128x512xf32>
    %68 = arith.mulf %67, %65 : vector<128x512xf32>
    %c0_36 = arith.constant 0 : index
    %c0_37 = arith.constant 0 : index
    %69 = vector.load %arg6[%c0_36, %c0_37] : memref<1x512xf32, #tpu.memory_space<vmem>>, vector<1x512xf32>
    %70 = vector.broadcast %69 : vector<1x512xf32> to vector<128x512xf32>
    %71 = arith.mulf %68, %70 : vector<128x512xf32>
    %c0_38 = arith.constant 0 : index
    %c0_39 = arith.constant 0 : index
    %72 = vector.load %arg7[%c0_38, %c0_39] : memref<128x512xf32, #tpu.memory_space<vmem>>, vector<128x512xf32>
    tpu.vector_store %arg7[%c0_38, %c0_39], %71 {strides = array<i32>} : memref<128x512xf32, #tpu.memory_space<vmem>>, vector<128x512xf32>,
    return
  }
  func.func @transform_0(%arg0: i32, %arg1: i32) -> i32 {
    %c0_i32 = arith.constant 0 : i32
    %c0_i32_0 = arith.constant 0 : i32
    return %c0_i32 : i32
  }
  func.func @transform_1(%arg0: i32, %arg1: i32) -> (i32, i32, i32) {
    %c0_i32 = arith.constant 0 : i32
    %c0_i32_0 = arith.constant 0 : i32
    %c0_i32_1 = arith.constant 0 : i32
    return %c0_i32, %arg0, %c0_i32_0 : i32, i32, i32
  }
  func.func @transform_2(%arg0: i32, %arg1: i32) -> (i32, i32) {
    %c0_i32 = arith.constant 0 : i32
    %c0_i32_0 = arith.constant 0 : i32
    return %c0_i32, %arg1 : i32, i32
  }
  func.func @transform_3(%arg0: i32, %arg1: i32) -> (i32, i32) {
    %c0_i32 = arith.constant 0 : i32
    %c0_i32_0 = arith.constant 0 : i32
    return %arg0, %c0_i32 : i32, i32
  }
  func.func @transform_4(%arg0: i32, %arg1: i32) -> (i32, i32) {
    %c0_i32 = arith.constant 0 : i32
    %c0_i32_0 = arith.constant 0 : i32
    return %c0_i32, %arg1 : i32, i32
  }
  func.func @transform_5(%arg0: i32, %arg1: i32) -> (i32, i32) {
    %c0_i32 = arith.constant 0 : i32
    return %arg0, %arg1 : i32, i32
  }
}

</mosaic_0001>

<bundles_post_ra>
// kernel: tpu_custom_call.1
= control target key start
LH: loop header
LB: loop body
LE: loop exit
PB: predicated region body
PF: predicated region fallthrough
CT: control target
= control target key end

     0   :  { %s9325_s0 = inlined_call_operand.vmem [shape: f32[8], index: 0, kind: input, shape index: {}]   ;;  %s9326_s1 = inlined_call_operand.vmem [shape: bf16[8,256,64], index: 1, kind: input, shape index: {}]   ;;  %s9327_s2 = inlined_call_operand.vmem [shape: bf16[64,1024], index: 2, kind: input, shape index: {}]   ;;  %s9328_s3 = inlined_call_operand.vmem [shape: f32[256,1], index: 3, kind: input, shape index: {}]   ;;  %s9329_s4 = inlined_call_operand.vmem [shape: f32[1,1024], index: 4, kind: input, shape index: {}]   ;;  %s9330_s5 = inlined_call_operand.hbm [shape: f32[256,1024], index: 5, kind: output, shape index: {}]  }
   0x1   :  { %9345 = sst [smem:[#allocation54_spill]] %s9325_s0 }
   0x2   :  { %9346 = sst [smem:[#allocation55_spill]] %s9330_s5 }
   0x3   :  { %10 = vsyncpa [#allocation4], 0 }
   0x4   :  { %11 = vsyncpa [#allocation3], 0 }
   0x5   :  { %13 = vsyncpa [#allocation3 + $0x1], 0  ;;  %s6340_s18 = smov 0   ;;  %s6342_s19 = smov 0  }
   0x6   :  { %s6344_s20 = smov 0   ;;  %s6346_s21 = smov 0  }
   0x7   :  { %s6348_s22 = smov 0   ;;  %s6350_s23 = smov 0  }
   0x8   :  { %s6352_s24 = smov 0   ;;  %s6354_s25 = smov 0  }
   0x9   :  { %s6356_s26 = smov 0   ;;  %s6358_s27 = smov 0  }
   0xa   :  { %s6360_s28 = smov 0   ;;  %s6362_s29 = smov 0  }
   0xb LB: > { %s5234_s6 = sadd.s32 4294967294, %s6303_s29   ;;  %s28_s7 = sadd.s32 1, %s6295_s27  ;;  %s6303_s29 = sphi %s6362_s29, %s19_s29   ;;  %s6299_s28 = sphi %s6360_s28, %s9739_s28   ;;  %s6295_s27 = sphi %s6358_s27, %s9738_s27   ;;  %s6291_s26 = sphi %s6356_s26, %s9737_s26   ;;  %s6287_s25 = sphi %s6354_s25, %s9736_s25   ;;  %s6283_s24 = sphi %s6352_s24, %s9735_s24   ;;  %s6279_s23 = sphi %s6350_s23, %s9734_s23   ;;  %s6275_s22 = sphi %s6348_s22, %s9733_s22   ;;  %s6271_s21 = sphi %s6346_s21, %s9732_s21   ;;  %s6267_s20 = sphi %s6344_s20, %s9731_s20   ;;  %s6263_s19 = sphi %s6342_s19, %s9730_s19   ;;  %s6259_s18 = sphi %s6340_s18, %s9729_s18  }
   0xc   : > { %s31_s8 = sadd.s32 1, %s6299_s28  ;;  %p29_p0 = scmp.ge.s32.totalorder %s28_s7, 2 }
   0xd   : > { %s59_s9 = sadd.s32 1, %s6283_s24  ;;  %p66_p1 = scmp.ne.s32.totalorder %s6283_s24, %s6279_s23 }
   0xe   : > { %p67_p2 = scmp.eq.s32.totalorder %s6303_s29, 0  ;;  %s9741_s7 = smov (%p29_p0, %s28_s7), 0 }
   0xf   : > { %9347 = sst [smem:[#allocation10_spill]] %s9741_s7  ;;  %s9743_s8 = smov (!%p29_p0, %s31_s8), %s6299_s28 }
  0x10   : > { %p6411_p3 = por %p67_p2, %p66_p1  ;;  %s82_s11 = ssub.s32 %s6295_s27, %s9741_s7 }
  0x11   : > { %p33_p4 = scmp.ge.s32.totalorder %s9743_s8, 2  ;;  %p83_p5 = scmp.eq.s32.totalorder %s82_s11, 0 }
  0x12   : > { %s85_s12 = sadd.s32 1, %s6275_s22  ;;  %p92_p6 = scmp.ne.s32.totalorder %s6275_s22, %s6271_s21 }
  0x13   : > { %s9745_s8 = smov (%p33_p4, %s9743_s8), 0  ;;  %s165_s17 = sadd.s32 1, %s6267_s20 }
  0x14   : > { %9349 = sst [smem:[#allocation11_spill]] %s9745_s8  ;;  %s56_s14 = ssub.s32 %s6299_s28, %s9745_s8 }
  0x15   : > { %s6423_s13 = scalar_select %p83_p5, %s6275_s22, %s85_s12  }
  0x16   : > { %p6427_p7 = por %p92_p6, %p67_p2  ;;  %p57_p8 = scmp.eq.s32.totalorder %s56_s14, 0 }
  0x17   : > { %9350 = sst [smem:[#allocation12_spill]] %s6423_s13  ;;  %s162_s16 = sor.u32 %s82_s11, %s56_s14 }
  0x18   : > { %p163_p9 = scmp.eq.s32.totalorder %s162_s16, 0  ;;  %p175_p10 = scmp.ne.s32.totalorder %s6267_s20, %s6263_s19 }
  0x19   : > { %s6433_s30 = scalar_select %p57_p8, %s6283_s24, %s59_s9  }
  0x1a   : > { %s6436_s7 = scalar_select %p163_p9, %s6267_s20, %s165_s17  }
  0x1b   : > { %9352 = sst [smem:[#allocation13_spill]] %s6433_s30  ;;  %s9353_s5 = sadd.s32 4294967295, %s6303_s29  }
  0x1c   : > { %p176_p11 = scmp.eq.s32.totalorder %s9353_s5, 3  ;;  %p181_p12 = scmp.ne.s32.totalorder %s6263_s19, %s6259_s18 }
  0x1d   : > { %p182_p13 = scmp.eq.s32.totalorder %s5234_s6, 3  ;;  %p5235_p1 = scmp.ge.s32.totalorder %s6303_s29, 1 }
  0x1e   : > { %p6444_p0 = por %p176_p11, %p175_p10  ;;  %p189_p4 = scmp.lt.s32.totalorder %s6303_s29, 5 }
  0x1f   : > { %p6449_p2 = por %p182_p13, %p181_p12  ;;  %s9356_s11 = smov %s9353_s5 }
  0x20   : > { %p6456_p5 = scmp.eq.s32.totalorder %s9356_s11, 0  ;;  %p6460_p6 = pnand %p5235_p1, %p189_p4 }
  0x21   : > { %s9359_s0 = sld [smem:[#allocation54_spill]]  ;;  %s6305_s17 = smov [#allocation2]  }
  0x22   : > { %p6043_p8 = pneg %p6460_p6  ;;  %p5237_p10 = scmp.ge.s32.totalorder %s6303_s29, 4 }
  0x24   : > { %p6044_p9 = pnand %p6456_p5, %p6043_p8  ;;  %208 = sbr.rel (%p5237_p10) target bundleno = 129 (0x81), region = 20 }
  0x27   : > { %s201_s16 = sshll.u32 %s9359_s0, 4  ;;  %s202_s16 = int_to_ptr.vmem [resolvable:$true] %s201_s16 }
  0x28   : > { %6046 = dma.vmem_to_smem (!%p6044_p9), %s202_s16, 16, %s6305_s17, [#allocation4]  }
  0x29   : > { %211 = sbr.rel (!%p6411_p3) target bundleno = 109 (0x6d), region = 24  ;;  %s213_s11 = sand.u32 (%p6411_p3), 1, %s6283_s24  }
  0x2a   : > { %s5954_s30 = sshll.u32 (%p6411_p3), %s6299_s28, 6  ;;  %s5238_s6 = sshll.u32 (%p6411_p3), %s213_s11, 9 }
  0x2b   : > { %s6479_s13 = scalar_lea.vmem (%p6411_p3), %s9326_s1, %s5954_s30  ;;  %s6484_s10 = scalar_lea.vmem (%p6411_p3), [#allocation5], %s5238_s6 }
  0x2c   : > { %v235_v0 = vld [vmem:[%s6479_s13] sm:$0xff] (%p6411_p3)   ;;  %v239_v1 = vld [vmem:[%s6479_s13 + $0x8] sm:$0xff] (%p6411_p3)   ;;  %v243_v2 = vld [vmem:[%s6479_s13 + $0x10] sm:$0xff] (%p6411_p3)  }
  0x2d   : > { %236 = vst [vmem:[%s6484_s10] sm:$0xff] (%p6411_p3), %v235_v0   ;;  %v247_v3 = vld [vmem:[%s6479_s13 + $0x18] sm:$0xff] (%p6411_p3)   ;;  %v251_v4 = vld [vmem:[%s6479_s13 + $0x20] sm:$0xff] (%p6411_p3)   ;;  %v255_v5 = vld [vmem:[%s6479_s13 + $0x28] sm:$0xff] (%p6411_p3)  }
  0x2e   : > { %240 = vst [vmem:[%s6484_s10 + $0x8] sm:$0xff] %v239_v1   ;;  %v259_v6 = vld [vmem:[%s6479_s13 + $0x30] sm:$0xff]   ;;  %v263_v7 = vld [vmem:[%s6479_s13 + $0x38] sm:$0xff]   ;;  %v267_v8 = vld [vmem:[%s6479_s13 + $0x80] sm:$0xff]  }
  0x2f   : > { %244 = vst [vmem:[%s6484_s10 + $0x10] sm:$0xff] %v243_v2   ;;  %v271_v9 = vld [vmem:[%s6479_s13 + $0x88] sm:$0xff]   ;;  %v275_v10 = vld [vmem:[%s6479_s13 + $0x90] sm:$0xff]   ;;  %v279_v11 = vld [vmem:[%s6479_s13 + $0x98] sm:$0xff]  }
  0x30   : > { %248 = vst [vmem:[%s6484_s10 + $0x18] sm:$0xff] %v247_v3   ;;  %v283_v12 = vld [vmem:[%s6479_s13 + $0xa0] sm:$0xff]   ;;  %v287_v13 = vld [vmem:[%s6479_s13 + $0xa8] sm:$0xff]   ;;  %v291_v14 = vld [vmem:[%s6479_s13 + $0xb0] sm:$0xff]  }
  0x31   : > { %252 = vst [vmem:[%s6484_s10 + $0x20] sm:$0xff] %v251_v4   ;;  %v295_v15 = vld [vmem:[%s6479_s13 + $0xb8] sm:$0xff]   ;;  %v299_v16 = vld [vmem:[%s6479_s13 + $0x100] sm:$0xff]   ;;  %v303_v17 = vld [vmem:[%s6479_s13 + $0x108] sm:$0xff]  }
  0x32   : > { %256 = vst [vmem:[%s6484_s10 + $0x28] sm:$0xff] %v255_v5   ;;  %v307_v18 = vld [vmem:[%s6479_s13 + $0x110] sm:$0xff]   ;;  %v311_v19 = vld [vmem:[%s6479_s13 + $0x118] sm:$0xff]   ;;  %v315_v20 = vld [vmem:[%s6479_s13 + $0x120] sm:$0xff]  }
  0x33   : > { %260 = vst [vmem:[%s6484_s10 + $0x30] sm:$0xff] %v259_v6   ;;  %v319_v21 = vld [vmem:[%s6479_s13 + $0x128] sm:$0xff]   ;;  %v323_v22 = vld [vmem:[%s6479_s13 + $0x130] sm:$0xff]   ;;  %v327_v23 = vld [vmem:[%s6479_s13 + $0x138] sm:$0xff]  }
  0x34   : > { %264 = vst [vmem:[%s6484_s10 + $0x38] sm:$0xff] %v263_v7   ;;  %v331_v24 = vld [vmem:[%s6479_s13 + $0x180] sm:$0xff]   ;;  %v335_v25 = vld [vmem:[%s6479_s13 + $0x188] sm:$0xff]   ;;  %v339_v26 = vld [vmem:[%s6479_s13 + $0x190] sm:$0xff]  }
  0x35   : > { %268 = vst [vmem:[%s6484_s10 + $0x40] sm:$0xff] %v267_v8   ;;  %v343_v27 = vld [vmem:[%s6479_s13 + $0x198] sm:$0xff]   ;;  %v347_v28 = vld [vmem:[%s6479_s13 + $0x1a0] sm:$0xff]   ;;  %v351_v29 = vld [vmem:[%s6479_s13 + $0x1a8] sm:$0xff]  }
  0x36   : > { %272 = vst [vmem:[%s6484_s10 + $0x48] sm:$0xff] %v271_v9   ;;  %v355_v30 = vld [vmem:[%s6479_s13 + $0x1b0] sm:$0xff]   ;;  %v359_v31 = vld [vmem:[%s6479_s13 + $0x1b8] sm:$0xff]   ;;  %v363_v32 = vld [vmem:[%s6479_s13 + $0x200] sm:$0xff]  }
  0x37   : > { %276 = vst [vmem:[%s6484_s10 + $0x50] sm:$0xff] %v275_v10   ;;  %v367_v33 = vld [vmem:[%s6479_s13 + $0x208] sm:$0xff]   ;;  %v371_v34 = vld [vmem:[%s6479_s13 + $0x210] sm:$0xff]   ;;  %v375_v35 = vld [vmem:[%s6479_s13 + $0x218] sm:$0xff]  }
  0x38   : > { %280 = vst [vmem:[%s6484_s10 + $0x58] sm:$0xff] %v279_v11   ;;  %v379_v36 = vld [vmem:[%s6479_s13 + $0x220] sm:$0xff]   ;;  %v383_v37 = vld [vmem:[%s6479_s13 + $0x228] sm:$0xff]   ;;  %v387_v38 = vld [vmem:[%s6479_s13 + $0x230] sm:$0xff]  }
  0x39   : > { %284 = vst [vmem:[%s6484_s10 + $0x60] sm:$0xff] %v283_v12   ;;  %v391_v39 = vld [vmem:[%s6479_s13 + $0x238] sm:$0xff]   ;;  %v395_v40 = vld [vmem:[%s6479_s13 + $0x280] sm:$0xff]   ;;  %v399_v41 = vld [vmem:[%s6479_s13 + $0x288] sm:$0xff]  }
  0x3a   : > { %288 = vst [vmem:[%s6484_s10 + $0x68] sm:$0xff] %v287_v13   ;;  %v403_v42 = vld [vmem:[%s6479_s13 + $0x290] sm:$0xff]   ;;  %v407_v43 = vld [vmem:[%s6479_s13 + $0x298] sm:$0xff]   ;;  %v411_v44 = vld [vmem:[%s6479_s13 + $0x2a0] sm:$0xff]  }
  0x3b   : > { %292 = vst [vmem:[%s6484_s10 + $0x70] sm:$0xff] %v291_v14   ;;  %v415_v45 = vld [vmem:[%s6479_s13 + $0x2a8] sm:$0xff]   ;;  %v419_v46 = vld [vmem:[%s6479_s13 + $0x2b0] sm:$0xff]   ;;  %v423_v47 = vld [vmem:[%s6479_s13 + $0x2b8] sm:$0xff]  }
  0x3c   : > { %296 = vst [vmem:[%s6484_s10 + $0x78] sm:$0xff] %v295_v15   ;;  %v427_v48 = vld [vmem:[%s6479_s13 + $0x300] sm:$0xff]   ;;  %v431_v49 = vld [vmem:[%s6479_s13 + $0x308] sm:$0xff]   ;;  %v435_v50 = vld [vmem:[%s6479_s13 + $0x310] sm:$0xff]  }
  0x3d   : > { %300 = vst [vmem:[%s6484_s10 + $0x80] sm:$0xff] %v299_v16   ;;  %v439_v51 = vld [vmem:[%s6479_s13 + $0x318] sm:$0xff]   ;;  %v443_v52 = vld [vmem:[%s6479_s13 + $0x320] sm:$0xff]   ;;  %v447_v53 = vld [vmem:[%s6479_s13 + $0x328] sm:$0xff]  }
  0x3e   : > { %304 = vst [vmem:[%s6484_s10 + $0x88] sm:$0xff] %v303_v17   ;;  %v451_v54 = vld [vmem:[%s6479_s13 + $0x330] sm:$0xff]   ;;  %v455_v55 = vld [vmem:[%s6479_s13 + $0x338] sm:$0xff]   ;;  %v459_v56 = vld [vmem:[%s6479_s13 + $0x380] sm:$0xff]  }
  0x3f   : > { %308 = vst [vmem:[%s6484_s10 + $0x90] sm:$0xff] %v307_v18   ;;  %v463_v57 = vld [vmem:[%s6479_s13 + $0x388] sm:$0xff]   ;;  %v467_v58 = vld [vmem:[%s6479_s13 + $0x390] sm:$0xff]   ;;  %v471_v59 = vld [vmem:[%s6479_s13 + $0x398] sm:$0xff]  }
  0x40   : > { %312 = vst [vmem:[%s6484_s10 + $0x98] sm:$0xff] %v311_v19   ;;  %v475_v60 = vld [vmem:[%s6479_s13 + $0x3a0] sm:$0xff]   ;;  %v479_v61 = vld [vmem:[%s6479_s13 + $0x3a8] sm:$0xff]   ;;  %v483_v62 = vld [vmem:[%s6479_s13 + $0x3b0] sm:$0xff]  }
  0x41   : > { %316 = vst [vmem:[%s6484_s10 + $0xa0] sm:$0xff] %v315_v20   ;;  %v487_v63 = vld [vmem:[%s6479_s13 + $0x3b8] sm:$0xff]  }
  0x42   : > { %320 = vst [vmem:[%s6484_s10 + $0xa8] sm:$0xff] %v319_v21  }
  0x43   : > { %324 = vst [vmem:[%s6484_s10 + $0xb0] sm:$0xff] %v323_v22  }
  0x44   : > { %328 = vst [vmem:[%s6484_s10 + $0xb8] sm:$0xff] %v327_v23  }
  0x45   : > { %332 = vst [vmem:[%s6484_s10 + $0xc0] sm:$0xff] %v331_v24  }
  0x46   : > { %336 = vst [vmem:[%s6484_s10 + $0xc8] sm:$0xff] %v335_v25  }
  0x47   : > { %340 = vst [vmem:[%s6484_s10 + $0xd0] sm:$0xff] %v339_v26  }
  0x48   : > { %344 = vst [vmem:[%s6484_s10 + $0xd8] sm:$0xff] %v343_v27  }
  0x49   : > { %348 = vst [vmem:[%s6484_s10 + $0xe0] sm:$0xff] %v347_v28  }
  0x4a   : > { %352 = vst [vmem:[%s6484_s10 + $0xe8] sm:$0xff] %v351_v29  }
  0x4b   : > { %356 = vst [vmem:[%s6484_s10 + $0xf0] sm:$0xff] %v355_v30  }
  0x4c   : > { %360 = vst [vmem:[%s6484_s10 + $0xf8] sm:$0xff] %v359_v31  }
  0x4d   : > { %364 = vst [vmem:[%s6484_s10 + $0x100] sm:$0xff] %v363_v32  }
  0x4e   : > { %368 = vst [vmem:[%s6484_s10 + $0x108] sm:$0xff] %v367_v33  }
  0x4f   : > { %372 = vst [vmem:[%s6484_s10 + $0x110] sm:$0xff] %v371_v34  }
  0x50   : > { %376 = vst [vmem:[%s6484_s10 + $0x118] sm:$0xff] %v375_v35  }
  0x51   : > { %380 = vst [vmem:[%s6484_s10 + $0x120] sm:$0xff] %v379_v36  }
  0x52   : > { %384 = vst [vmem:[%s6484_s10 + $0x128] sm:$0xff] %v383_v37  }
  0x53   : > { %388 = vst [vmem:[%s6484_s10 + $0x130] sm:$0xff] %v387_v38  }
  0x54   : > { %392 = vst [vmem:[%s6484_s10 + $0x138] sm:$0xff] %v391_v39  }
  0x55   : > { %396 = vst [vmem:[%s6484_s10 + $0x140] sm:$0xff] %v395_v40  }
  0x56   : > { %400 = vst [vmem:[%s6484_s10 + $0x148] sm:$0xff] %v399_v41  }
  0x57   : > { %404 = vst [vmem:[%s6484_s10 + $0x150] sm:$0xff] %v403_v42  }
  0x58   : > { %408 = vst [vmem:[%s6484_s10 + $0x158] sm:$0xff] %v407_v43  }
  0x59   : > { %412 = vst [vmem:[%s6484_s10 + $0x160] sm:$0xff] %v411_v44  }
  0x5a   : > { %416 = vst [vmem:[%s6484_s10 + $0x168] sm:$0xff] %v415_v45  }
  0x5b   : > { %420 = vst [vmem:[%s6484_s10 + $0x170] sm:$0xff] %v419_v46  }
  0x5c   : > { %424 = vst [vmem:[%s6484_s10 + $0x178] sm:$0xff] %v423_v47  }
  0x5d   : > { %428 = vst [vmem:[%s6484_s10 + $0x180] sm:$0xff] %v427_v48  }
  0x5e   : > { %432 = vst [vmem:[%s6484_s10 + $0x188] sm:$0xff] %v431_v49  }
  0x5f   : > { %436 = vst [vmem:[%s6484_s10 + $0x190] sm:$0xff] %v435_v50  }
  0x60   : > { %440 = vst [vmem:[%s6484_s10 + $0x198] sm:$0xff] %v439_v51  }
  0x61   : > { %444 = vst [vmem:[%s6484_s10 + $0x1a0] sm:$0xff] %v443_v52  }
  0x62   : > { %448 = vst [vmem:[%s6484_s10 + $0x1a8] sm:$0xff] %v447_v53  }
  0x63   : > { %452 = vst [vmem:[%s6484_s10 + $0x1b0] sm:$0xff] %v451_v54  }
  0x64   : > { %456 = vst [vmem:[%s6484_s10 + $0x1b8] sm:$0xff] %v455_v55  }
  0x65   : > { %460 = vst [vmem:[%s6484_s10 + $0x1c0] sm:$0xff] %v459_v56  }
  0x66   : > { %464 = vst [vmem:[%s6484_s10 + $0x1c8] sm:$0xff] %v463_v57  }
  0x67   : > { %468 = vst [vmem:[%s6484_s10 + $0x1d0] sm:$0xff] %v467_v58  }
  0x68   : > { %472 = vst [vmem:[%s6484_s10 + $0x1d8] sm:$0xff] %v471_v59  }
  0x69   : > { %476 = vst [vmem:[%s6484_s10 + $0x1e0] sm:$0xff] %v475_v60  }
  0x6a   : > { %480 = vst [vmem:[%s6484_s10 + $0x1e8] sm:$0xff] %v479_v61  }
  0x6b   : > { %484 = vst [vmem:[%s6484_s10 + $0x1f0] sm:$0xff] %v483_v62  }
  0x6c   : > { %488 = vst [vmem:[%s6484_s10 + $0x1f8] sm:$0xff] %v487_v63  }
  0x6d PF: > { %770 = sbr.rel (!%p6427_p7) target bundleno = 129 (0x81), region = 65  ;;  %s772_s0 = sand.u32 (%p6427_p7), 1, %s6275_s22  }
  0x6e   : > { %s5955_s30 = sshll.u32 (%p6427_p7), %s6295_s27, 4  ;;  %s5241_s16 = sshll.u32 (%p6427_p7), %s772_s0, 7 }
  0x6f   : > { %s6618_s6 = scalar_lea.vmem (%p6427_p7), %s9327_s2, %s5955_s30  ;;  %s774_s13 = scalar_lea.vmem (%p6427_p7), [#allocation6], %s5241_s16 }
  0x70   : > { %v790_v0 = vld [vmem:[%s6618_s6] sm:$0xff] (%p6427_p7)  ;;  %v792_v1 = vld [vmem:[%s6618_s6 + $0x8] sm:$0xff] (%p6427_p7) }
  0x71   : > { %v794_v2 = vld [vmem:[%s6618_s6 + $0x20] sm:$0xff] (%p6427_p7)  ;;  %791 = vst [vmem:[%s774_s13] sm:$0xff] (%p6427_p7), %v790_v0  ;;  %v796_v3 = vld [vmem:[%s6618_s6 + $0x28] sm:$0xff] (%p6427_p7) }
  0x72   : > { %793 = vst [vmem:[%s774_s13 + $0x8] sm:$0xff] %v792_v1  ;;  %v798_v4 = vld [vmem:[%s6618_s6 + $0x40] sm:$0xff]  ;;  %v800_v5 = vld [vmem:[%s6618_s6 + $0x48] sm:$0xff] }
  0x73   : > { %795 = vst [vmem:[%s774_s13 + $0x10] sm:$0xff] %v794_v2  ;;  %v802_v6 = vld [vmem:[%s6618_s6 + $0x60] sm:$0xff]  ;;  %v804_v7 = vld [vmem:[%s6618_s6 + $0x68] sm:$0xff] }
  0x74   : > { %797 = vst [vmem:[%s774_s13 + $0x18] sm:$0xff] %v796_v3  ;;  %v806_v8 = vld [vmem:[%s6618_s6 + $0x80] sm:$0xff]  ;;  %v808_v9 = vld [vmem:[%s6618_s6 + $0x88] sm:$0xff] }
  0x75   : > { %799 = vst [vmem:[%s774_s13 + $0x20] sm:$0xff] %v798_v4  ;;  %v810_v10 = vld [vmem:[%s6618_s6 + $0xa0] sm:$0xff]  ;;  %v812_v11 = vld [vmem:[%s6618_s6 + $0xa8] sm:$0xff] }
  0x76   : > { %801 = vst [vmem:[%s774_s13 + $0x28] sm:$0xff] %v800_v5  ;;  %v814_v12 = vld [vmem:[%s6618_s6 + $0xc0] sm:$0xff]  ;;  %v816_v13 = vld [vmem:[%s6618_s6 + $0xc8] sm:$0xff] }
  0x77   : > { %803 = vst [vmem:[%s774_s13 + $0x30] sm:$0xff] %v802_v6  ;;  %v818_v14 = vld [vmem:[%s6618_s6 + $0xe0] sm:$0xff]  ;;  %v820_v15 = vld [vmem:[%s6618_s6 + $0xe8] sm:$0xff] }
  0x78   : > { %805 = vst [vmem:[%s774_s13 + $0x38] sm:$0xff] %v804_v7 }
  0x79   : > { %807 = vst [vmem:[%s774_s13 + $0x40] sm:$0xff] %v806_v8 }
  0x7a   : > { %809 = vst [vmem:[%s774_s13 + $0x48] sm:$0xff] %v808_v9 }
  0x7b   : > { %811 = vst [vmem:[%s774_s13 + $0x50] sm:$0xff] %v810_v10 }
  0x7c   : > { %813 = vst [vmem:[%s774_s13 + $0x58] sm:$0xff] %v812_v11 }
  0x7d   : > { %815 = vst [vmem:[%s774_s13 + $0x60] sm:$0xff] %v814_v12 }
  0x7e   : > { %817 = vst [vmem:[%s774_s13 + $0x68] sm:$0xff] %v816_v13 }
  0x7f   : > { %819 = vst [vmem:[%s774_s13 + $0x70] sm:$0xff] %v818_v14 }
  0x80   : > { %821 = vst [vmem:[%s774_s13 + $0x78] sm:$0xff] %v820_v15 }
  0x81 PF: > { %847 = sbr.rel (%p6460_p6) target bundleno = 1322 (0x52a), region = 96 }
  0x86   : > { %6250 = dma.done.wait (%p6456_p5), [#allocation4], 16  }
  0x87   : > { %6252 = vsyncadd (%p6456_p5), [#allocation4], 4294967280  ;;  %s855_s15 = sand.u32 1, %s6279_s23   ;;  %s862_s14 = sand.u32 1, %s6271_s21  }
  0x88   : > { %s5246_s10 = sshll.u32 %s855_s15, 9  ;;  %s5247_s0 = sshll.u32 %s862_s14, 7 }
  0x89   : > { %s6644_s30 = scalar_lea.vmem [#allocation5], %s5246_s10  ;;  %s6646_s16 = scalar_lea.vmem [#allocation6], %s5247_s0 }
  0x8a   : > { %868 = sfence }
  0x8b   : > { %v5334_v16 = vld [vmem:[%s6646_s16 + $0x60] sm:$0xf]  ;;  %v5970_v17 = vld [vmem:[%s6646_s16 + $0x6c] sm:$0xf0]  ;;  %v5968_v18 = vld [vmem:[%s6646_s16 + $0x64] sm:$0xf] }
  0x8c   : > { %v6651_v19 = vor.u32 %v5970_v17, %v5334_v16  ;;  %v5336_v20 = vld [vmem:[%s6646_s16 + $0x70] sm:$0xf0]  ;;  %v5342_v21 = vld [vmem:[%s6646_s16 + $0x68] sm:$0xf]  ;;  %v5971_v22 = vld [vmem:[%s6646_s16 + $0x74] sm:$0xf0] }
  0x8d   : > { %v6656_v23 = vor.u32 %v5968_v18, %v5336_v20  ;;  %v6658_v24 = vor.u32 %v5971_v22, %v5342_v21  ;;  %v5969_v25 = vld [vmem:[%s6646_s16 + $0x6c] sm:$0xf]  ;;  %v5344_v26 = vld [vmem:[%s6646_s16 + $0x78] sm:$0xf0]  ;;  %v5318_v27 = vld [vmem:[%s6646_s16 + $0x40] sm:$0xf] }
  0x8e   : > { %9360 = vst [vmem:[#allocation14_spill] sm:$0xff] %v6651_v19  ;;  %1100 = vmatpush.bf16.msra.mxu0 %v6651_v19  ;;  %v6664_v28 = vor.u32 %v5969_v25, %v5344_v26  ;;  %v5966_v29 = vld [vmem:[%s6646_s16 + $0x4c] sm:$0xf0]  ;;  %v5964_v30 = vld [vmem:[%s6646_s16 + $0x44] sm:$0xf]  ;;  %vm1071_vm0 = vcmask 523264  }
  0x8f   : > { %v5320_v31 = vld [vmem:[%s6646_s16 + $0x50] sm:$0xf0]  ;;  %1149 = vmatpush.bf16.msra.mxu1 %v6656_v23  ;;  %1198 = vmatpush.bf16.msra.mxu2 %v6658_v24  ;;  %v6671_v32 = vor.u32 %v5966_v29, %v5318_v27  ;;  %v5326_v34 = vld [vmem:[%s6646_s16 + $0x48] sm:$0xf]  ;;  %v5967_v35 = vld [vmem:[%s6646_s16 + $0x54] sm:$0xf0] }
  0x90   : > { %9361 = vst [vmem:[#allocation15_spill] sm:$0xff] %v6664_v28  ;;  %v6673_v33 = vor.u32 %v5964_v30, %v5320_v31  ;;  %v5965_v36 = vld [vmem:[%s6646_s16 + $0x4c] sm:$0xf]  ;;  %1247 = vmatpush.bf16.msra.mxu3 %v6664_v28  ;;  %v6679_v37 = vor.u32 %v5967_v35, %v5326_v34  ;;  %v5328_v38 = vld [vmem:[%s6646_s16 + $0x58] sm:$0xf0]  ;;  %v5972_v0 = vld [vmem:[%s6644_s30] sm:$0xff] }
  0x91   : > { %9362 = vst [vmem:[#allocation16_spill] sm:$0xff] %v6671_v32  ;;  %v5302_v39 = vld [vmem:[%s6646_s16 + $0x20] sm:$0xf]  ;;  %v5962_v40 = vld [vmem:[%s6646_s16 + $0x2c] sm:$0xf0]  ;;  %v6684_v41 = vor.u32 %v5965_v36, %v5328_v38  ;;  %v5973_v1 = vld [vmem:[%s6644_s30 + $0x8] sm:$0xff] }
  0x92   : > { %v5960_v42 = vld [vmem:[%s6646_s16 + $0x24] sm:$0xf]  ;;  %v5304_v43 = vld [vmem:[%s6646_s16 + $0x30] sm:$0xf0]  ;;  %v5310_v44 = vld [vmem:[%s6646_s16 + $0x28] sm:$0xf]  ;;  %1101 = vmatpush.bf16.msra.mxu0 %v6671_v32  ;;  %v6690_v45 = vor.u32 %v5962_v40, %v5302_v39 }
  0x93   : > { %v5963_v46 = vld [vmem:[%s6646_s16 + $0x34] sm:$0xf0]  ;;  %v5961_v47 = vld [vmem:[%s6646_s16 + $0x2c] sm:$0xf]  ;;  %v5312_v48 = vld [vmem:[%s6646_s16 + $0x38] sm:$0xf0]  ;;  %1150 = vmatpush.bf16.msra.mxu1 %v6673_v33  ;;  %1199 = vmatpush.bf16.msra.mxu2 %v6679_v37  ;;  %v6697_v49 = vor.u32 %v5960_v42, %v5304_v43 }
  0x94   : > { %v6699_v50 = vor.u32 %v5963_v46, %v5310_v44  ;;  %v5286_v51 = vld [vmem:[%s6646_s16] sm:$0xf]  ;;  %v5958_v52 = vld [vmem:[%s6646_s16 + $0xc] sm:$0xf0]  ;;  %v5956_v53 = vld [vmem:[%s6646_s16 + $0x4] sm:$0xf]  ;;  %1248 = vmatpush.bf16.msra.mxu3 %v6684_v41  ;;  %v6705_v54 = vor.u32 %v5961_v47, %v5312_v48 }
  0x95   : > { %v5288_v55 = vld [vmem:[%s6646_s16 + $0x10] sm:$0xf0]  ;;  %v5294_v56 = vld [vmem:[%s6646_s16 + $0x8] sm:$0xf]  ;;  %v5959_v57 = vld [vmem:[%s6646_s16 + $0x14] sm:$0xf0]  ;;  %v6713_v60 = vor.u32 %v5958_v52, %v5286_v51 }
  0x96   : > { %v5957_v58 = vld [vmem:[%s6646_s16 + $0xc] sm:$0xf]  ;;  %v5296_v59 = vld [vmem:[%s6646_s16 + $0x18] sm:$0xf0]  ;;  %1102 = vmatpush.bf16.msra.mxu0 %v6690_v45  ;;  %v6717_v61 = vor.u32 %v5956_v53, %v5288_v55  ;;  %v6719_v62 = vor.u32 %v5959_v57, %v5294_v56  ;;  %v5974_v2 = vld [vmem:[%s6644_s30 + $0x10] sm:$0xff]  ;;  %s1292_s21 = sld [smem:[#allocation2]] }
  0x97   : > { %9363 = vst [vmem:[#allocation17_spill] sm:$0xff] %v6713_v60  ;;  %1151 = vmatpush.bf16.msra.mxu1 %v6697_v49  ;;  %1200 = vmatpush.bf16.msra.mxu2 %v6699_v50  ;;  %v6722_v63 = vor.u32 %v5957_v58, %v5296_v59  ;;  %v5975_v3 = vld [vmem:[%s6644_s30 + $0x18] sm:$0xff]  ;;  %v5976_v4 = vld [vmem:[%s6644_s30 + $0x20] sm:$0xff]  ;;  %v5977_v5 = vld [vmem:[%s6644_s30 + $0x28] sm:$0xff]  ;;  %s5460_s23 = sld [smem:[#allocation2 + $0x1]]  ;;  %s5249_s6 = sshll.u32 %s6291_s26, 4 }
  0x98   : > { %9364 = vst [vmem:[#allocation18_spill] sm:$0xff] %v6717_v61  ;;  %1249 = vmatpush.bf16.msra.mxu3 %v6705_v54  ;;  %v5978_v6 = vld [vmem:[%s6644_s30 + $0x30] sm:$0xff]  ;;  %v5979_v7 = vld [vmem:[%s6644_s30 + $0x38] sm:$0xff]  ;;  %v5980_v8 = vld [vmem:[%s6644_s30 + $0x40] sm:$0xff]  ;;  %s5541_s9 = sld [smem:[#allocation2 + $0x2]]  ;;  %p906_p3 = scmp.lt.s32.totalorder %s5249_s6, 31 }
  0x99   : > { %9365 = vst [vmem:[#allocation19_spill] sm:$0xff] %v6722_v63  ;;  %v5981_v16 = vld [vmem:[%s6644_s30 + $0x48] sm:$0xff]  ;;  %v5982_v29 = vld [vmem:[%s6644_s30 + $0x50] sm:$0xff]  ;;  %v5983_v42 = vld [vmem:[%s6644_s30 + $0x58] sm:$0xff]  ;;  %s5622_s5 = sld [smem:[#allocation2 + $0x3]] }
  0x9a   : > { %1103 = vmatpush.bf16.msra.mxu0 %v6713_v60  ;;  %v5984_v55 = vld [vmem:[%s6644_s30 + $0x60] sm:$0xff]  ;;  %s5703_s17 = sld [smem:[#allocation2 + $0x4]]  ;;  %s9747_s6 = smov (!%p906_p3, %s5249_s6), 31 }
  0x9b   : > { %1152 = vmatpush.bf16.msra.mxu1 %v6717_v61  ;;  %1201 = vmatpush.bf16.msra.mxu2 %v6719_v62  ;;  %s5784_s11 = sld [smem:[#allocation2 + $0x5]]  ;;  %s5250_s13 = sshll.u32 %s9747_s6, 3 }
  0x9c   : > { %1250 = vmatpush.bf16.msra.mxu3 %v6722_v63  ;;  %s8629_s10 = scalar_lea.vmem %s9328_s3, %s5250_s13  ;;  %s5865_s0 = sld [smem:[#allocation2 + $0x6]] }
  0x9d   : > { %5348 = vmatmul.msk.bf16.vlgmr.msra.gmra.mxu0 %vm1071_vm0, %v5972_v0  ;;  %s6036_s6 = sshll.u32 %s6291_s26, 7 }
  0x9e   : > { %5356 = vmatmul.msk.bf16.vlgmr.msra.gmra.mxu1 %vm1071_vm0, %v5972_v0  ;;  %5364 = vmatmul.msk.bf16.vlgmr.msra.gmra.mxu2 %vm1071_vm0, %v5972_v0 }
  0x9f   : > { %1669 = vmatpush.bf16.msrb.mxu2 %v6658_v24  ;;  %5372 = vmatmul.msk.bf16.vlgmr.msra.gmra.mxu3 %vm1071_vm0, %v5972_v0 }
  0xa0   : > { %1718 = vmatpush.bf16.msrb.mxu3 %v6664_v28  ;;  %1571 = vmatpush.bf16.msrb.mxu0 %v6651_v19 }
  0xa1   : > { %1620 = vmatpush.bf16.msrb.mxu1 %v6656_v23 }
  0xa3   : > { %1670 = vmatpush.bf16.msrb.mxu2 %v6679_v37 }
  0xa4   : > { %1719 = vmatpush.bf16.msrb.mxu3 %v6684_v41  ;;  %1572 = vmatpush.bf16.msrb.mxu0 %v6671_v32 }
  0xa5   : > { %1621 = vmatpush.bf16.msrb.mxu1 %v6673_v33 }
  0xa7   : > { %1671 = vmatpush.bf16.msrb.mxu2 %v6699_v50 }
  0xa8   : > { %1720 = vmatpush.bf16.msrb.mxu3 %v6705_v54  ;;  %1573 = vmatpush.bf16.msrb.mxu0 %v6690_v45 }
  0xa9   : > { %1622 = vmatpush.bf16.msrb.mxu1 %v6697_v49 }
  0xab   : > { %1672 = vmatpush.bf16.msrb.mxu2 %v6719_v62 }
  0xac   : > { %1721 = vmatpush.bf16.msrb.mxu3 %v6722_v63  ;;  %1574 = vmatpush.bf16.msrb.mxu0 %v6713_v60 }
  0xad   : > { %1623 = vmatpush.bf16.msrb.mxu1 %v6717_v61  ;;  %5349 = vmatmul.msk.bf16.gmra.mxu0 %vm1071_vm0, %v5973_v1 }
  0xae   : > { %5357 = vmatmul.msk.bf16.gmra.mxu1 %vm1071_vm0, %v5973_v1  ;;  %5365 = vmatmul.msk.bf16.gmra.mxu2 %vm1071_vm0, %v5973_v1 }
  0xaf   : > { %2140 = vmatpush.bf16.msra.mxu2 %v6658_v24  ;;  %5373 = vmatmul.msk.bf16.gmra.mxu3 %vm1071_vm0, %v5973_v1 }
  0xb0   : > { %2189 = vmatpush.bf16.msra.mxu3 %v6664_v28  ;;  %2042 = vmatpush.bf16.msra.mxu0 %v6651_v19 }
  0xb1   : > { %2091 = vmatpush.bf16.msra.mxu1 %v6656_v23 }
  0xb3   : > { %2141 = vmatpush.bf16.msra.mxu2 %v6679_v37 }
  0xb4   : > { %2190 = vmatpush.bf16.msra.mxu3 %v6684_v41  ;;  %2043 = vmatpush.bf16.msra.mxu0 %v6671_v32 }
  0xb5   : > { %2092 = vmatpush.bf16.msra.mxu1 %v6673_v33 }
  0xb7   : > { %2142 = vmatpush.bf16.msra.mxu2 %v6699_v50 }
  0xb8   : > { %2191 = vmatpush.bf16.msra.mxu3 %v6705_v54  ;;  %2044 = vmatpush.bf16.msra.mxu0 %v6690_v45 }
  0xb9   : > { %2093 = vmatpush.bf16.msra.mxu1 %v6697_v49 }
  0xbb   : > { %2143 = vmatpush.bf16.msra.mxu2 %v6719_v62 }
  0xbc   : > { %2192 = vmatpush.bf16.msra.mxu3 %v6722_v63  ;;  %2045 = vmatpush.bf16.msra.mxu0 %v6713_v60 }
  0xbd   : > { %2094 = vmatpush.bf16.msra.mxu1 %v6717_v61  ;;  %5350 = vmatmul.msk.bf16.gmra.mxu0 %vm1071_vm0, %v5974_v2 }
  0xbe   : > { %5358 = vmatmul.msk.bf16.gmra.mxu1 %vm1071_vm0, %v5974_v2  ;;  %5366 = vmatmul.msk.bf16.gmra.mxu2 %vm1071_vm0, %v5974_v2 }
  0xbf   : > { %5374 = vmatmul.msk.bf16.gmra.mxu3 %vm1071_vm0, %v5974_v2 }
  0xcd   : > { %5351 = vmatmul.msk.bf16.gmra.mxu0 %vm1071_vm0, %v5975_v3 }
  0xce   : > { %5359 = vmatmul.msk.bf16.gmra.mxu1 %vm1071_vm0, %v5975_v3  ;;  %5367 = vmatmul.msk.bf16.gmra.mxu2 %vm1071_vm0, %v5975_v3 }
  0xcf   : > { %5375 = vmatmul.msk.bf16.gmra.mxu3 %vm1071_vm0, %v5975_v3 }
  0xdd   : > { %5352 = vmatmul.msk.bf16.gmra.mxu0 %vm1071_vm0, %v5976_v4 }
  0xde   : > { %5360 = vmatmul.msk.bf16.gmra.mxu1 %vm1071_vm0, %v5976_v4  ;;  %5368 = vmatmul.msk.bf16.gmra.mxu2 %vm1071_vm0, %v5976_v4 }
  0xdf   : > { %5376 = vmatmul.msk.bf16.gmra.mxu3 %vm1071_vm0, %v5976_v4  ;;  %v5985_v4 = vld [vmem:[%s6644_s30 + $0x68] sm:$0xff] }
  0xed   : > { %5353 = vmatmul.msk.bf16.gmra.mxu0 %vm1071_vm0, %v5977_v5 }
  0xee   : > { %5361 = vmatmul.msk.bf16.gmra.mxu1 %vm1071_vm0, %v5977_v5  ;;  %5369 = vmatmul.msk.bf16.gmra.mxu2 %vm1071_vm0, %v5977_v5 }
  0xef   : > { %5377 = vmatmul.msk.bf16.gmra.mxu3 %vm1071_vm0, %v5977_v5 }
  0xfd   : > { %5354 = vmatmul.msk.bf16.gmra.mxu0 %vm1071_vm0, %v5978_v6 }
  0xfe   : > { %5362 = vmatmul.msk.bf16.gmra.mxu1 %vm1071_vm0, %v5978_v6  ;;  %5370 = vmatmul.msk.bf16.gmra.mxu2 %vm1071_vm0, %v5978_v6 }
  0xff   : > { %5378 = vmatmul.msk.bf16.gmra.mxu3 %vm1071_vm0, %v5978_v6 }
 0x10d   : > { %5355 = vmatmul.msk.bf16.gmra.mxu0 %vm1071_vm0, %v5979_v7 }
 0x10e   : > { %5363 = vmatmul.msk.bf16.gmra.mxu1 %vm1071_vm0, %v5979_v7  ;;  %5371 = vmatmul.msk.bf16.gmra.mxu2 %vm1071_vm0, %v5979_v7 }
 0x10f   : > { %5379 = vmatmul.msk.bf16.gmra.mxu3 %vm1071_vm0, %v5979_v7 }
 0x11a   : > { %v6801_v9 = vpop.f32.mrf.mxu0 }
 0x11b   : > { %v6803_v10 = vpop.f32.mrf.mxu1 }
 0x11d   : > { %5428 = vmatmul.msk.bf16.vlgmr.msrb.gmra.mxu0 %vm1071_vm0, %v5980_v8 }
 0x11e   : > { %5436 = vmatmul.msk.bf16.vlgmr.msrb.gmra.mxu1 %vm1071_vm0, %v5980_v8  ;;  %5444 = vmatmul.msk.bf16.vlgmr.msrb.gmra.mxu2 %vm1071_vm0, %v5980_v8 }
 0x11f   : > { %5452 = vmatmul.msk.bf16.vlgmr.msrb.gmra.mxu3 %vm1071_vm0, %v5980_v8  ;;  %2611 = vmatpush.bf16.msrb.mxu2 %v6658_v24 }
 0x120   : > { %2660 = vmatpush.bf16.msrb.mxu3 %v6664_v28  ;;  %2513 = vmatpush.bf16.msrb.mxu0 %v6651_v19 }
 0x121   : > { %v6812_v11 = vpop.f32.mrf.mxu2  ;;  %2562 = vmatpush.bf16.msrb.mxu1 %v6656_v23 }
 0x122   : > { %v6815_v12 = vpop.f32.mrf.mxu3  ;;  %v6817_v13 = vpop.f32.mrf.mxu0 }
 0x123   : > { %v6819_v14 = vpop.f32.mrf.mxu1  ;;  %2612 = vmatpush.bf16.msrb.mxu2 %v6679_v37 }
 0x124   : > { %2661 = vmatpush.bf16.msrb.mxu3 %v6684_v41  ;;  %2514 = vmatpush.bf16.msrb.mxu0 %v6671_v32 }
 0x125   : > { %2563 = vmatpush.bf16.msrb.mxu1 %v6673_v33 }
 0x127   : > { %2613 = vmatpush.bf16.msrb.mxu2 %v6699_v50 }
 0x128   : > { %2662 = vmatpush.bf16.msrb.mxu3 %v6705_v54  ;;  %2515 = vmatpush.bf16.msrb.mxu0 %v6690_v45 }
 0x129   : > { %v6828_v15 = vpop.f32.mrf.mxu2  ;;  %2564 = vmatpush.bf16.msrb.mxu1 %v6697_v49 }
 0x12a   : > { %v6832_v17 = vpop.f32.mrf.mxu3  ;;  %v6834_v18 = vpop.f32.mrf.mxu0 }
 0x12b   : > { %v6836_v20 = vpop.f32.mrf.mxu1  ;;  %2614 = vmatpush.bf16.msrb.mxu2 %v6719_v62 }
 0x12c   : > { %2663 = vmatpush.bf16.msrb.mxu3 %v6722_v63  ;;  %2516 = vmatpush.bf16.msrb.mxu0 %v6713_v60 }
 0x12d   : > { %5429 = vmatmul.msk.bf16.gmra.mxu0 %vm1071_vm0, %v5981_v16  ;;  %2565 = vmatpush.bf16.msrb.mxu1 %v6717_v61 }
 0x12e   : > { %5437 = vmatmul.msk.bf16.gmra.mxu1 %vm1071_vm0, %v5981_v16  ;;  %5445 = vmatmul.msk.bf16.gmra.mxu2 %vm1071_vm0, %v5981_v16 }
 0x12f   : > { %5453 = vmatmul.msk.bf16.gmra.mxu3 %vm1071_vm0, %v5981_v16 }
 0x131   : > { %v6846_v21 = vpop.f32.mrf.mxu2 }
 0x132   : > { %v6848_v22 = vpop.f32.mrf.mxu3  ;;  %v6850_v25 = vpop.f32.mrf.mxu0 }
 0x133   : > { %v6852_v26 = vpop.f32.mrf.mxu1 }
 0x139   : > { %v6854_v27 = vpop.f32.mrf.mxu2 }
 0x13a   : > { %v6857_v30 = vpop.f32.mrf.mxu3  ;;  %v6859_v31 = vpop.f32.mrf.mxu0 }
 0x13b   : > { %v6861_v34 = vpop.f32.mrf.mxu1 }
 0x13d   : > { %5430 = vmatmul.msk.bf16.gmra.mxu0 %vm1071_vm0, %v5982_v29 }
 0x13e   : > { %5438 = vmatmul.msk.bf16.gmra.mxu1 %vm1071_vm0, %v5982_v29  ;;  %5446 = vmatmul.msk.bf16.gmra.mxu2 %vm1071_vm0, %v5982_v29 }
 0x13f   : > { %5454 = vmatmul.msk.bf16.gmra.mxu3 %vm1071_vm0, %v5982_v29 }
 0x141   : > { %v6867_v35 = vpop.f32.mrf.mxu2 }
 0x142   : > { %v6869_v36 = vpop.f32.mrf.mxu3  ;;  %v6871_v38 = vpop.f32.mrf.mxu0 }
 0x143   : > { %v6873_v39 = vpop.f32.mrf.mxu1 }
 0x149   : > { %v6875_v40 = vpop.f32.mrf.mxu2 }
 0x14a   : > { %v6878_v43 = vpop.f32.mrf.mxu3  ;;  %v6880_v44 = vpop.f32.mrf.mxu0 }
 0x14b   : > { %v6882_v46 = vpop.f32.mrf.mxu1 }
 0x14d   : > { %5431 = vmatmul.msk.bf16.gmra.mxu0 %vm1071_vm0, %v5983_v42 }
 0x14e   : > { %5439 = vmatmul.msk.bf16.gmra.mxu1 %vm1071_vm0, %v5983_v42  ;;  %5447 = vmatmul.msk.bf16.gmra.mxu2 %vm1071_vm0, %v5983_v42 }
 0x14f   : > { %5455 = vmatmul.msk.bf16.gmra.mxu3 %vm1071_vm0, %v5983_v42 }
 0x151   : > { %v6888_v47 = vpop.f32.mrf.mxu2 }
 0x152   : > { %v6890_v48 = vpop.f32.mrf.mxu3  ;;  %v6892_v51 = vpop.f32.mrf.mxu0 }
 0x153   : > { %v6894_v52 = vpop.f32.mrf.mxu1 }
 0x159   : > { %v6896_v53 = vpop.f32.mrf.mxu2 }
 0x15a   : > { %v6899_v56 = vpop.f32.mrf.mxu3  ;;  %v6901_v57 = vpop.f32.mrf.mxu0 }
 0x15b   : > { %v6903_v58 = vpop.f32.mrf.mxu1 }
 0x15d   : > { %5432 = vmatmul.msk.bf16.gmra.mxu0 %vm1071_vm0, %v5984_v55 }
 0x15e   : > { %5440 = vmatmul.msk.bf16.gmra.mxu1 %vm1071_vm0, %v5984_v55  ;;  %5448 = vmatmul.msk.bf16.gmra.mxu2 %vm1071_vm0, %v5984_v55 }
 0x15f   : > { %5456 = vmatmul.msk.bf16.gmra.mxu3 %vm1071_vm0, %v5984_v55 }
 0x161   : > { %v6909_v59 = vpop.f32.mrf.mxu2 }
 0x162   : > { %v6911_v0 = vpop.f32.mrf.mxu3  ;;  %v6913_v1 = vpop.f32.mrf.mxu0 }
 0x163   : > { %9366 = vst [vmem:[#allocation20_spill] sm:$0xff] %v6911_v0  ;;  %v6915_v2 = vpop.f32.mrf.mxu1 }
 0x164   : > { %9367 = vst [vmem:[#allocation21_spill] sm:$0xff] %v6913_v1 }
 0x165   : > { %9368 = vst [vmem:[#allocation22_spill] sm:$0xff] %v6915_v2 }
 0x169   : > { %v6917_v3 = vpop.f32.mrf.mxu2 }
 0x16a   : > { %9369 = vst [vmem:[#allocation23_spill] sm:$0xff] %v6917_v3  ;;  %v6920_v5 = vpop.f32.mrf.mxu3  ;;  %v6922_v6 = vpop.f32.mrf.mxu0 }
 0x16b   : > { %9370 = vst [vmem:[#allocation24_spill] sm:$0xff] %v6920_v5  ;;  %v6924_v7 = vpop.f32.mrf.mxu1 }
 0x16c   : > { %9371 = vst [vmem:[#allocation25_spill] sm:$0xff] %v6922_v6 }
 0x16d   : > { %9372 = vst [vmem:[#allocation26_spill] sm:$0xff] %v6924_v7  ;;  %5433 = vmatmul.msk.bf16.gmra.mxu0 %vm1071_vm0, %v5985_v4  ;;  %v5986_v7 = vld [vmem:[%s6644_s30 + $0x70] sm:$0xff] }
 0x16e   : > { %5441 = vmatmul.msk.bf16.gmra.mxu1 %vm1071_vm0, %v5985_v4  ;;  %5449 = vmatmul.msk.bf16.gmra.mxu2 %vm1071_vm0, %v5985_v4 }
 0x16f   : > { %5457 = vmatmul.msk.bf16.gmra.mxu3 %vm1071_vm0, %v5985_v4 }
 0x171   : > { %v6930_v8 = vpop.f32.mrf.mxu2 }
 0x172   : > { %9373 = vst [vmem:[#allocation27_spill] sm:$0xff] %v6930_v8  ;;  %v6932_v16 = vpop.f32.mrf.mxu3  ;;  %v6934_v29 = vpop.f32.mrf.mxu0 }
 0x173   : > { %9374 = vst [vmem:[#allocation28_spill] sm:$0xff] %v6932_v16  ;;  %v6936_v42 = vpop.f32.mrf.mxu1 }
 0x174   : > { %9375 = vst [vmem:[#allocation29_spill] sm:$0xff] %v6934_v29 }
 0x175   : > { %9376 = vst [vmem:[#allocation30_spill] sm:$0xff] %v6936_v42 }
 0x179   : > { %v6938_v55 = vpop.f32.mrf.mxu2 }
 0x17a   : > { %9377 = vst [vmem:[#allocation31_spill] sm:$0xff] %v6938_v55  ;;  %v6941_v6 = vpop.f32.mrf.mxu3  ;;  %v6943_v5 = vpop.f32.mrf.mxu0 }
 0x17b   : > { %9378 = vst [vmem:[#allocation32_spill] sm:$0xff] %v6941_v6  ;;  %v6945_v3 = vpop.f32.mrf.mxu1 }
 0x17c   : > { %9379 = vst [vmem:[#allocation33_spill] sm:$0xff] %v6943_v5  ;;  %v5987_v5 = vld [vmem:[%s6644_s30 + $0x78] sm:$0xff] }
 0x17d   : > { %9380 = vst [vmem:[#allocation34_spill] sm:$0xff] %v6945_v3  ;;  %5434 = vmatmul.msk.bf16.gmra.mxu0 %vm1071_vm0, %v5986_v7 }
 0x17e   : > { %5442 = vmatmul.msk.bf16.gmra.mxu1 %vm1071_vm0, %v5986_v7  ;;  %5450 = vmatmul.msk.bf16.gmra.mxu2 %vm1071_vm0, %v5986_v7 }
 0x17f   : > { %5458 = vmatmul.msk.bf16.gmra.mxu3 %vm1071_vm0, %v5986_v7 }
 0x181   : > { %v6951_v4 = vpop.f32.mrf.mxu2 }
 0x182   : > { %9381 = vst [vmem:[#allocation35_spill] sm:$0xff] %v6951_v4  ;;  %v6953_v42 = vpop.f32.mrf.mxu3  ;;  %v6955_v55 = vpop.f32.mrf.mxu0 }
 0x183   : > { %9382 = vst [vmem:[#allocation36_spill] sm:$0xff] %v6953_v42  ;;  %v6957_v29 = vpop.f32.mrf.mxu1  ;;  %v6985_v42 = vstv %s1292_s21 }
 0x184   : > { %9383 = vst [vmem:[#allocation37_spill] sm:$0xff] %v6955_v55  ;;  %v5988_v55 = vld [vmem:[%s6644_s30 + $0x80] sm:$0xff] }
 0x185   : > { %9384 = vst [vmem:[#allocation38_spill] sm:$0xff] %v6957_v29 }
 0x189   : > { %v6959_v6 = vpop.f32.mrf.mxu2 }
 0x18a   : > { %9385 = vst [vmem:[#allocation39_spill] sm:$0xff] %v6959_v6  ;;  %v6962_v3 = vpop.f32.mrf.mxu3  ;;  %v6964_v16 = vpop.f32.mrf.mxu0 }
 0x18b   : > { %9386 = vst [vmem:[#allocation40_spill] sm:$0xff] %v6962_v3  ;;  %v6966_v8 = vpop.f32.mrf.mxu1 }
 0x18c   : > { %9387 = vst [vmem:[#allocation41_spill] sm:$0xff] %v6964_v16 }
 0x18d   : > { %9388 = vst [vmem:[#allocation42_spill] sm:$0xff] %v6966_v8  ;;  %5435 = vmatmul.msk.bf16.gmra.mxu0 %vm1071_vm0, %v5987_v5  ;;  %v1293_v8 = vmul.f32 %v6801_v9, %v6801_v9 }
 0x18e   : > { %5443 = vmatmul.msk.bf16.gmra.mxu1 %vm1071_vm0, %v5987_v5  ;;  %5451 = vmatmul.msk.bf16.gmra.mxu2 %vm1071_vm0, %v5987_v5 }
 0x18f   : > { %5459 = vmatmul.msk.bf16.gmra.mxu3 %vm1071_vm0, %v5987_v5  ;;  %v1294_v5 = vmul.f32 %v6803_v10, %v6803_v10 }
 0x191   : > { %v6972_v7 = vpop.f32.mrf.mxu2 }
 0x192   : > { %9389 = vst [vmem:[#allocation43_spill] sm:$0xff] %v6972_v7  ;;  %v6974_v6 = vpop.f32.mrf.mxu3  ;;  %v6976_v29 = vpop.f32.mrf.mxu0 }
 0x193   : > { %9390 = vst [vmem:[#allocation44_spill] sm:$0xff] %v6974_v6  ;;  %v6978_v3 = vpop.f32.mrf.mxu1  ;;  %v6991_v6 = vstv %s5460_s23 }
 0x194   : > { %9391 = vst [vmem:[#allocation45_spill] sm:$0xff] %v6976_v29 }
 0x195   : > { %9392 = vst [vmem:[#allocation46_spill] sm:$0xff] %v6978_v3  ;;  %v1358_v3 = vmul.f32 %v6985_v42, %v1293_v8 }
 0x199   : > { %v6982_v16 = vpop.f32.mrf.mxu2 }
 0x19a   : > { %9393 = vst [vmem:[#allocation47_spill] sm:$0xff] %v6982_v16  ;;  %v6989_v4 = vpop.f32.mrf.mxu3  ;;  %v1576_v7 = vpop.f32.mrf.mxu0  ;;  %v1359_v16 = vmul.f32 %v6985_v42, %v1294_v5 }
 0x19b   : > { %v1764_v29 = vmul.f32 %v1576_v7, %v1576_v7  ;;  %v1625_v2 = vpop.f32.mrf.mxu1 }
 0x19c   : > { %v1765_v1 = vmul.f32 %v1625_v2, %v1625_v2  ;;  %v1295_v2 = vmul.f32 %v6812_v11, %v6812_v11 }
 0x19d   : > { %v1829_v9 = vmul.f32 %v6991_v6, %v1764_v29  ;;  %5509 = vmatmul.msk.bf16.vlgmr.msra.gmra.mxu0 %vm1071_vm0, %v5988_v55 }
 0x19e   : > { %v1830_v0 = vmul.f32 %v6991_v6, %v1765_v1  ;;  %5517 = vmatmul.msk.bf16.vlgmr.msra.gmra.mxu1 %vm1071_vm0, %v5988_v55  ;;  %5525 = vmatmul.msk.bf16.vlgmr.msra.gmra.mxu2 %vm1071_vm0, %v5988_v55  ;;  %v1296_v1 = vmul.f32 %v6815_v12, %v6815_v12 }
 0x19f   : > { %v7000_v10 = vadd.f32 %v1829_v9, %v1358_v3  ;;  %5533 = vmatmul.msk.bf16.vlgmr.msra.gmra.mxu3 %vm1071_vm0, %v5988_v55  ;;  %3082 = vmatpush.bf16.msra.mxu2 %v6658_v24  ;;  %v1297_v3 = vmul.f32 %v6817_v13, %v6817_v13  ;;  %v1298_v55 = vmul.f32 %v6819_v14, %v6819_v14 }
 0x1a0   : > { %v7006_v8 = vadd.f32 %v1830_v0, %v1359_v16  ;;  %3131 = vmatpush.bf16.msra.mxu3 %v6664_v28  ;;  %2984 = vmatpush.bf16.msra.mxu0 %v6651_v19  ;;  %v1360_v19 = vmul.f32 %v6985_v42, %v1295_v2  ;;  %v1361_v13 = vmul.f32 %v6985_v42, %v1296_v1 }
 0x1a1   : > { %v1674_v29 = vpop.f32.mrf.mxu2  ;;  %3033 = vmatpush.bf16.msra.mxu1 %v6656_v23  ;;  %v1362_v14 = vmul.f32 %v6985_v42, %v1297_v3  ;;  %v1363_v2 = vmul.f32 %v6985_v42, %v1298_v55  ;;  %v1300_v3 = vmul.f32 %v6832_v17, %v6832_v17  ;;  %v1302_v55 = vmul.f32 %v6836_v20, %v6836_v20 }
 0x1a2   : > { %v1766_v7 = vmul.f32 %v1674_v29, %v1674_v29  ;;  %v1723_v11 = vpop.f32.mrf.mxu3  ;;  %v1578_v0 = vpop.f32.mrf.mxu0 }
 0x1a3   : > { %v1767_v16 = vmul.f32 %v1723_v11, %v1723_v11  ;;  %v1768_v5 = vmul.f32 %v1578_v0, %v1578_v0  ;;  %v1627_v9 = vpop.f32.mrf.mxu1  ;;  %3083 = vmatpush.bf16.msra.mxu2 %v6679_v37 }
 0x1a4   : > { %v1831_v12 = vmul.f32 %v6991_v6, %v1766_v7  ;;  %v1769_v28 = vmul.f32 %v1627_v9, %v1627_v9  ;;  %3132 = vmatpush.bf16.msra.mxu3 %v6684_v41  ;;  %2985 = vmatpush.bf16.msra.mxu0 %v6671_v32  ;;  %v1299_v9 = vmul.f32 %v6828_v15, %v6828_v15  ;;  %v5989_v15 = vld [vmem:[%s6644_s30 + $0x88] sm:$0xff] }
 0x1a5   : > { %v1832_v29 = vmul.f32 %v6991_v6, %v1767_v16  ;;  %v1833_v11 = vmul.f32 %v6991_v6, %v1768_v5  ;;  %3034 = vmatpush.bf16.msra.mxu1 %v6673_v33 }
 0x1a6   : > { %v7028_v0 = vadd.f32 %v1831_v12, %v1360_v19  ;;  %v1834_v7 = vmul.f32 %v6991_v6, %v1769_v28  ;;  %v1301_v19 = vmul.f32 %v6834_v18, %v6834_v18  ;;  %v1364_v17 = vmul.f32 %v6985_v42, %v1299_v9 }
 0x1a7   : > { %v7033_v32 = vadd.f32 %v1832_v29, %v1361_v13  ;;  %v7035_v1 = vadd.f32 %v1833_v11, %v1362_v14  ;;  %3084 = vmatpush.bf16.msra.mxu2 %v6699_v50 }
 0x1a8   : > { %v7040_v16 = vadd.f32 %v1834_v7, %v1363_v2  ;;  %3133 = vmatpush.bf16.msra.mxu3 %v6705_v54  ;;  %2986 = vmatpush.bf16.msra.mxu0 %v6690_v45  ;;  %v1365_v2 = vmul.f32 %v6985_v42, %v1300_v3  ;;  %v1366_v20 = vmul.f32 %v6985_v42, %v1301_v19 }
 0x1a9   : > { %v1676_v28 = vpop.f32.mrf.mxu2  ;;  %3035 = vmatpush.bf16.msra.mxu1 %v6697_v49 }
 0x1aa   : > { %v1770_v5 = vmul.f32 %v1676_v28, %v1676_v28  ;;  %v1725_v12 = vpop.f32.mrf.mxu3  ;;  %v1581_v13 = vpop.f32.mrf.mxu0 }
 0x1ab   : > { %v1771_v14 = vmul.f32 %v1725_v12, %v1725_v12  ;;  %v1772_v29 = vmul.f32 %v1581_v13, %v1581_v13  ;;  %v1630_v11 = vpop.f32.mrf.mxu1  ;;  %3085 = vmatpush.bf16.msra.mxu2 %v6719_v62  ;;  %v1367_v12 = vmul.f32 %v6985_v42, %v1302_v55  ;;  %v1304_v55 = vmul.f32 %v6848_v22, %v6848_v22 }
 0x1ac   : > { %v1835_v18 = vmul.f32 %v6991_v6, %v1770_v5  ;;  %v1773_v7 = vmul.f32 %v1630_v11, %v1630_v11  ;;  %3134 = vmatpush.bf16.msra.mxu3 %v6722_v63  ;;  %2987 = vmatpush.bf16.msra.mxu0 %v6713_v60 }
 0x1ad   : > { %v1836_v28 = vmul.f32 %v6991_v6, %v1771_v14  ;;  %v1837_v9 = vmul.f32 %v6991_v6, %v1772_v29  ;;  %5510 = vmatmul.msk.bf16.gmra.mxu0 %vm1071_vm0, %v5989_v15  ;;  %3036 = vmatpush.bf16.msra.mxu1 %v6717_v61  ;;  %v1303_v14 = vmul.f32 %v6846_v21, %v6846_v21 }
 0x1ae   : > { %v7062_v3 = vadd.f32 %v1835_v18, %v1364_v17  ;;  %v1838_v5 = vmul.f32 %v6991_v6, %v1773_v7  ;;  %5518 = vmatmul.msk.bf16.gmra.mxu1 %vm1071_vm0, %v5989_v15  ;;  %5526 = vmatmul.msk.bf16.gmra.mxu2 %vm1071_vm0, %v5989_v15  ;;  %v1305_v17 = vmul.f32 %v6850_v25, %v6850_v25 }
 0x1af   : > { %v7067_v13 = vadd.f32 %v1836_v28, %v1365_v2  ;;  %v7069_v19 = vadd.f32 %v1837_v9, %v1366_v20  ;;  %5534 = vmatmul.msk.bf16.gmra.mxu3 %vm1071_vm0, %v5989_v15  ;;  %v1306_v2 = vmul.f32 %v6852_v26, %v6852_v26  ;;  %v1368_v21 = vmul.f32 %v6985_v42, %v1303_v14 }
 0x1b0   : > { %v7074_v29 = vadd.f32 %v1838_v5, %v1367_v12  ;;  %v1369_v22 = vmul.f32 %v6985_v42, %v1304_v55  ;;  %v1370_v25 = vmul.f32 %v6985_v42, %v1305_v17  ;;  %v1308_v17 = vmul.f32 %v6857_v30, %v6857_v30 }
 0x1b1   : > { %9394 = vst [vmem:[#allocation48_spill] sm:$0xff] %v7069_v19  ;;  %v1679_v11 = vpop.f32.mrf.mxu2 }
 0x1b2   : > { %9395 = vst [vmem:[#allocation49_spill] sm:$0xff] %v7074_v29  ;;  %v1774_v18 = vmul.f32 %v1679_v11, %v1679_v11  ;;  %v1728_v7 = vpop.f32.mrf.mxu3  ;;  %v1583_v20 = vpop.f32.mrf.mxu0  ;;  %v1371_v11 = vmul.f32 %v6985_v42, %v1306_v2  ;;  %v1373_v30 = vmul.f32 %v6985_v42, %v1308_v17 }
 0x1b3   : > { %v1775_v28 = vmul.f32 %v1728_v7, %v1728_v7  ;;  %v1776_v15 = vmul.f32 %v1583_v20, %v1583_v20  ;;  %v1632_v9 = vpop.f32.mrf.mxu1 }
 0x1b4   : > { %v1839_v12 = vmul.f32 %v6991_v6, %v1774_v18  ;;  %v1777_v5 = vmul.f32 %v1632_v9, %v1632_v9  ;;  %v1307_v18 = vmul.f32 %v6854_v27, %v6854_v27  ;;  %v1310_v9 = vmul.f32 %v6861_v34, %v6861_v34 }
 0x1b5   : > { %v1840_v29 = vmul.f32 %v6991_v6, %v1775_v28  ;;  %v1841_v26 = vmul.f32 %v6991_v6, %v1776_v15  ;;  %v1309_v28 = vmul.f32 %v6859_v31, %v6859_v31  ;;  %v5990_v15 = vld [vmem:[%s6644_s30 + $0x90] sm:$0xff] }
 0x1b6   : > { %v7089_v19 = vadd.f32 %v1839_v12, %v1368_v21  ;;  %v1842_v7 = vmul.f32 %v6991_v6, %v1777_v5  ;;  %v1372_v27 = vmul.f32 %v6985_v42, %v1307_v18  ;;  %v1375_v34 = vmul.f32 %v6985_v42, %v1310_v9 }
 0x1b7   : > { %v7092_v20 = vadd.f32 %v1840_v29, %v1369_v22  ;;  %v7094_v14 = vadd.f32 %v1841_v26, %v1370_v25  ;;  %v1374_v31 = vmul.f32 %v6985_v42, %v1309_v28  ;;  %v1311_v28 = vmul.f32 %v6867_v35, %v6867_v35 }
 0x1b8   : > { %v7098_v55 = vadd.f32 %v1842_v7, %v1371_v11  ;;  %v1312_v9 = vmul.f32 %v6869_v36, %v6869_v36 }
 0x1b9   : > { %v1681_v2 = vpop.f32.mrf.mxu2  ;;  %v1376_v35 = vmul.f32 %v6985_v42, %v1311_v28 }
 0x1ba   : > { %9396 = vst [vmem:[#allocation50_spill] sm:$0xff] %v7098_v55  ;;  %v1778_v29 = vmul.f32 %v1681_v2, %v1681_v2  ;;  %v1730_v21 = vpop.f32.mrf.mxu3  ;;  %v1586_v12 = vpop.f32.mrf.mxu0  ;;  %v1377_v36 = vmul.f32 %v6985_v42, %v1312_v9 }
 0x1bb   : > { %v1779_v5 = vmul.f32 %v1730_v21, %v1730_v21  ;;  %v1780_v22 = vmul.f32 %v1586_v12, %v1586_v12  ;;  %v1635_v25 = vpop.f32.mrf.mxu1  ;;  %v1313_v12 = vmul.f32 %v6871_v38, %v6871_v38 }
 0x1bc   : > { %v1843_v26 = vmul.f32 %v6991_v6, %v1778_v29  ;;  %v1781_v11 = vmul.f32 %v1635_v25, %v1635_v25 }
 0x1bd   : > { %v1844_v7 = vmul.f32 %v6991_v6, %v1779_v5  ;;  %v1845_v55 = vmul.f32 %v6991_v6, %v1780_v22  ;;  %5511 = vmatmul.msk.bf16.gmra.mxu0 %vm1071_vm0, %v5990_v15  ;;  %v1314_v22 = vmul.f32 %v6873_v39, %v6873_v39  ;;  %v1378_v38 = vmul.f32 %v6985_v42, %v1313_v12 }
 0x1be   : > { %v7115_v2 = vadd.f32 %v1843_v26, %v1372_v27  ;;  %v1846_v21 = vmul.f32 %v6991_v6, %v1781_v11  ;;  %5519 = vmatmul.msk.bf16.gmra.mxu1 %vm1071_vm0, %v5990_v15  ;;  %5527 = vmatmul.msk.bf16.gmra.mxu2 %vm1071_vm0, %v5990_v15  ;;  %v1316_v12 = vmul.f32 %v6878_v43, %v6878_v43 }
 0x1bf   : > { %v7120_v18 = vadd.f32 %v1844_v7, %v1373_v30  ;;  %v7122_v17 = vadd.f32 %v1845_v55, %v1374_v31  ;;  %5535 = vmatmul.msk.bf16.gmra.mxu3 %vm1071_vm0, %v5990_v15 }
 0x1c0   : > { %v7127_v29 = vadd.f32 %v1846_v21, %v1375_v34  ;;  %v1379_v34 = vmul.f32 %v6985_v42, %v1314_v22  ;;  %v1381_v43 = vmul.f32 %v6985_v42, %v1316_v12 }
 0x1c1   : > { %v1684_v5 = vpop.f32.mrf.mxu2 }
 0x1c2   : > { %v1782_v25 = vmul.f32 %v1684_v5, %v1684_v5  ;;  %v1733_v55 = vpop.f32.mrf.mxu3  ;;  %v1588_v27 = vpop.f32.mrf.mxu0 }
 0x1c3   : > { %v1783_v26 = vmul.f32 %v1733_v55, %v1733_v55  ;;  %v1784_v15 = vmul.f32 %v1588_v27, %v1588_v27  ;;  %v1637_v11 = vpop.f32.mrf.mxu1  ;;  %v1317_v27 = vmul.f32 %v6880_v44, %v6880_v44 }
 0x1c4   : > { %v1847_v30 = vmul.f32 %v6991_v6, %v1782_v25  ;;  %v1785_v31 = vmul.f32 %v1637_v11, %v1637_v11  ;;  %v1315_v25 = vmul.f32 %v6875_v40, %v6875_v40 }
 0x1c5   : > { %v1848_v7 = vmul.f32 %v6991_v6, %v1783_v26  ;;  %v1849_v39 = vmul.f32 %v6991_v6, %v1784_v15  ;;  %v5991_v26 = vld [vmem:[%s6644_s30 + $0x98] sm:$0xff]  ;;  %v1318_v15 = vmul.f32 %v6882_v46, %v6882_v46  ;;  %v1382_v44 = vmul.f32 %v6985_v42, %v1317_v27 }
 0x1c6   : > { %v7142_v21 = vadd.f32 %v1847_v30, %v1376_v35  ;;  %v1850_v5 = vmul.f32 %v6991_v6, %v1785_v31  ;;  %v1380_v40 = vmul.f32 %v6985_v42, %v1315_v25  ;;  %v1319_v27 = vmul.f32 %v6888_v47, %v6888_v47 }
 0x1c7   : > { %v7145_v55 = vadd.f32 %v1848_v7, %v1377_v36  ;;  %v7147_v28 = vadd.f32 %v1849_v39, %v1378_v38  ;;  %v1383_v46 = vmul.f32 %v6985_v42, %v1318_v15  ;;  %v1320_v15 = vmul.f32 %v6890_v48, %v6890_v48 }
 0x1c8   : > { %v7151_v9 = vadd.f32 %v1850_v5, %v1379_v34  ;;  %v1384_v47 = vmul.f32 %v6985_v42, %v1319_v27 }
 0x1c9   : > { %v1686_v22 = vpop.f32.mrf.mxu2  ;;  %v1385_v48 = vmul.f32 %v6985_v42, %v1320_v15 }
 0x1ca   : > { %v1786_v11 = vmul.f32 %v1686_v22, %v1686_v22  ;;  %v1735_v35 = vpop.f32.mrf.mxu3  ;;  %v1591_v30 = vpop.f32.mrf.mxu0 }
 0x1cb   : > { %v1787_v31 = vmul.f32 %v1735_v35, %v1735_v35  ;;  %v1788_v36 = vmul.f32 %v1591_v30, %v1591_v30  ;;  %v1640_v38 = vpop.f32.mrf.mxu1  ;;  %v1321_v30 = vmul.f32 %v6892_v51, %v6892_v51 }
 0x1cc   : > { %v1851_v7 = vmul.f32 %v6991_v6, %v1786_v11  ;;  %v1789_v39 = vmul.f32 %v1640_v38, %v1640_v38 }
 0x1cd   : > { %v1852_v34 = vmul.f32 %v6991_v6, %v1787_v31  ;;  %v1853_v5 = vmul.f32 %v6991_v6, %v1788_v36  ;;  %5512 = vmatmul.msk.bf16.gmra.mxu0 %vm1071_vm0, %v5991_v26  ;;  %v1322_v36 = vmul.f32 %v6894_v52, %v6894_v52  ;;  %v1386_v51 = vmul.f32 %v6985_v42, %v1321_v30 }
 0x1ce   : > { %v7168_v22 = vadd.f32 %v1851_v7, %v1380_v40  ;;  %v1854_v35 = vmul.f32 %v6991_v6, %v1789_v39  ;;  %5520 = vmatmul.msk.bf16.gmra.mxu1 %vm1071_vm0, %v5991_v26  ;;  %5528 = vmatmul.msk.bf16.gmra.mxu2 %vm1071_vm0, %v5991_v26  ;;  %v1324_v30 = vmul.f32 %v6899_v56, %v6899_v56 }
 0x1cf   : > { %v7173_v25 = vadd.f32 %v1852_v34, %v1381_v43  ;;  %v7175_v12 = vadd.f32 %v1853_v5, %v1382_v44  ;;  %5536 = vmatmul.msk.bf16.gmra.mxu3 %vm1071_vm0, %v5991_v26 }
 0x1d0   : > { %v7180_v11 = vadd.f32 %v1854_v35, %v1383_v46  ;;  %v1387_v46 = vmul.f32 %v6985_v42, %v1322_v36  ;;  %v1389_v56 = vmul.f32 %v6985_v42, %v1324_v30 }
 0x1d1   : > { %v1689_v31 = vpop.f32.mrf.mxu2 }
 0x1d2   : > { %v1790_v38 = vmul.f32 %v1689_v31, %v1689_v31  ;;  %v1738_v40 = vpop.f32.mrf.mxu3  ;;  %v1593_v7 = vpop.f32.mrf.mxu0 }
 0x1d3   : > { %v1791_v39 = vmul.f32 %v1738_v40, %v1738_v40  ;;  %v1792_v26 = vmul.f32 %v1593_v7, %v1593_v7  ;;  %v1642_v43 = vpop.f32.mrf.mxu1  ;;  %v1325_v7 = vmul.f32 %v6901_v57, %v6901_v57 }
 0x1d4   : > { %v1855_v44 = vmul.f32 %v6991_v6, %v1790_v38  ;;  %v1793_v34 = vmul.f32 %v1642_v43, %v1642_v43  ;;  %v1323_v38 = vmul.f32 %v6896_v53, %v6896_v53 }
 0x1d5   : > { %v1856_v5 = vmul.f32 %v6991_v6, %v1791_v39  ;;  %v1857_v52 = vmul.f32 %v6991_v6, %v1792_v26  ;;  %v5992_v39 = vld [vmem:[%s6644_s30 + $0xa0] sm:$0xff]  ;;  %v1326_v26 = vmul.f32 %v6903_v58, %v6903_v58  ;;  %v1390_v57 = vmul.f32 %v6985_v42, %v1325_v7 }
 0x1d6   : > { %v7195_v35 = vadd.f32 %v1855_v44, %v1384_v47  ;;  %v1858_v31 = vmul.f32 %v6991_v6, %v1793_v34  ;;  %v1388_v53 = vmul.f32 %v6985_v42, %v1323_v38  ;;  %v1327_v7 = vmul.f32 %v6909_v59, %v6909_v59 }
 0x1d7   : > { %v7198_v40 = vadd.f32 %v1856_v5, %v1385_v48  ;;  %v7200_v27 = vadd.f32 %v1857_v52, %v1386_v51  ;;  %v1391_v58 = vmul.f32 %v6985_v42, %v1326_v26  ;;  %v9400_v26 = vld [vmem:[#allocation20_spill] sm:$0xff] }
 0x1d8   : > { %v7204_v15 = vadd.f32 %v1858_v31, %v1387_v46  ;;  %v1392_v59 = vmul.f32 %v6985_v42, %v1327_v7 }
 0x1d9   : > { %v1691_v36 = vpop.f32.mrf.mxu2 }
 0x1da   : > { %v1794_v43 = vmul.f32 %v1691_v36, %v1691_v36  ;;  %v1740_v47 = vpop.f32.mrf.mxu3  ;;  %v1596_v44 = vpop.f32.mrf.mxu0 }
 0x1db   : > { %v1795_v34 = vmul.f32 %v1740_v47, %v1740_v47  ;;  %v1796_v48 = vmul.f32 %v1596_v44, %v1596_v44  ;;  %v1645_v51 = vpop.f32.mrf.mxu1  ;;  %v1328_v44 = vmul.f32 %v9400_v26, %v9400_v26 }
 0x1dc   : > { %v1859_v5 = vmul.f32 %v6991_v6, %v1794_v43  ;;  %v1797_v52 = vmul.f32 %v1645_v51, %v1645_v51 }
 0x1dd   : > { %v1860_v46 = vmul.f32 %v6991_v6, %v1795_v34  ;;  %v1861_v31 = vmul.f32 %v6991_v6, %v1796_v48  ;;  %5513 = vmatmul.msk.bf16.gmra.mxu0 %vm1071_vm0, %v5992_v39  ;;  %v9401_v34 = vld [vmem:[#allocation21_spill] sm:$0xff]  ;;  %v1393_v26 = vmul.f32 %v6985_v42, %v1328_v44 }
 0x1de   : > { %v7221_v36 = vadd.f32 %v1859_v5, %v1388_v53  ;;  %v1862_v47 = vmul.f32 %v6991_v6, %v1797_v52  ;;  %5521 = vmatmul.msk.bf16.gmra.mxu1 %vm1071_vm0, %v5992_v39  ;;  %5529 = vmatmul.msk.bf16.gmra.mxu2 %vm1071_vm0, %v5992_v39  ;;  %v1329_v48 = vmul.f32 %v9401_v34, %v9401_v34  ;;  %v9402_v53 = vld [vmem:[#allocation22_spill] sm:$0xff] }
 0x1df   : > { %v7226_v38 = vadd.f32 %v1860_v46, %v1389_v56  ;;  %v7228_v30 = vadd.f32 %v1861_v31, %v1390_v57  ;;  %5537 = vmatmul.msk.bf16.gmra.mxu3 %vm1071_vm0, %v5992_v39  ;;  %v1330_v5 = vmul.f32 %v9402_v53, %v9402_v53 }
 0x1e0   : > { %v7233_v43 = vadd.f32 %v1862_v47, %v1391_v58  ;;  %v1394_v34 = vmul.f32 %v6985_v42, %v1329_v48  ;;  %v9408_v48 = vld [vmem:[#allocation24_spill] sm:$0xff] }
 0x1e1   : > { %9397 = vst [vmem:[#allocation51_spill] sm:$0xff] %v7226_v38  ;;  %v1694_v51 = vpop.f32.mrf.mxu2  ;;  %v9409_v38 = vld [vmem:[#allocation25_spill] sm:$0xff] }
 0x1e2   : > { %9398 = vst [vmem:[#allocation52_spill] sm:$0xff] %v7228_v30  ;;  %v1798_v52 = vmul.f32 %v1694_v51, %v1694_v51  ;;  %v1743_v56 = vpop.f32.mrf.mxu3  ;;  %v1598_v57 = vpop.f32.mrf.mxu0  ;;  %v1395_v51 = vmul.f32 %v6985_v42, %v1330_v5 }
 0x1e3   : > { %9399 = vst [vmem:[#allocation53_spill] sm:$0xff] %v7233_v43  ;;  %v1799_v46 = vmul.f32 %v1743_v56, %v1743_v56  ;;  %v1800_v39 = vmul.f32 %v1598_v57, %v1598_v57  ;;  %v1647_v31 = vpop.f32.mrf.mxu1 }
 0x1e4   : > { %v1863_v58 = vmul.f32 %v6991_v6, %v1798_v52  ;;  %v1801_v47 = vmul.f32 %v1647_v31, %v1647_v31  ;;  %v9406_v52 = vld [vmem:[#allocation23_spill] sm:$0xff] }
 0x1e5   : > { %v1864_v43 = vmul.f32 %v6991_v6, %v1799_v46  ;;  %v1865_v53 = vmul.f32 %v6991_v6, %v1800_v39  ;;  %v1331_v31 = vmul.f32 %v9406_v52, %v9406_v52  ;;  %v1332_v46 = vmul.f32 %v9408_v48, %v9408_v48 }
 0x1e6   : > { %v7248_v30 = vadd.f32 %v1863_v58, %v1392_v59  ;;  %v1866_v56 = vmul.f32 %v6991_v6, %v1801_v47  ;;  %v1333_v39 = vmul.f32 %v9409_v38, %v9409_v38  ;;  %v5993_v59 = vld [vmem:[%s6644_s30 + $0xa8] sm:$0xff]  ;;  %v9410_v58 = vld [vmem:[#allocation26_spill] sm:$0xff] }
 0x1e7   : > { %v7251_v57 = vadd.f32 %v1864_v43, %v1393_v26  ;;  %v7253_v7 = vadd.f32 %v1865_v53, %v1394_v34  ;;  %v1334_v47 = vmul.f32 %v9410_v58, %v9410_v58  ;;  %v1397_v48 = vmul.f32 %v6985_v42, %v1332_v46  ;;  %v9414_v46 = vld [vmem:[#allocation27_spill] sm:$0xff] }
 0x1e8   : > { %9403 = vst [vmem:[#allocation20_spill] sm:$0xff] %v7248_v30  ;;  %v7257_v44 = vadd.f32 %v1866_v56, %v1395_v51  ;;  %v1396_v51 = vmul.f32 %v6985_v42, %v1331_v31  ;;  %v1398_v38 = vmul.f32 %v6985_v42, %v1333_v39 }
 0x1e9   : > { %9404 = vst [vmem:[#allocation21_spill] sm:$0xff] %v7251_v57  ;;  %v1696_v5 = vpop.f32.mrf.mxu2 }
 0x1ea   : > { %9405 = vst [vmem:[#allocation22_spill] sm:$0xff] %v7253_v7  ;;  %v1802_v43 = vmul.f32 %v1696_v5, %v1696_v5  ;;  %v1745_v26 = vpop.f32.mrf.mxu3  ;;  %v1601_v34 = vpop.f32.mrf.mxu0  ;;  %v1399_v5 = vmul.f32 %v6985_v42, %v1334_v47  ;;  %v9416_v47 = vld [vmem:[#allocation28_spill] sm:$0xff] }
 0x1eb   : > { %9407 = vst [vmem:[#allocation23_spill] sm:$0xff] %v7257_v44  ;;  %v1803_v53 = vmul.f32 %v1745_v26, %v1745_v26  ;;  %v1804_v7 = vmul.f32 %v1601_v34, %v1601_v34  ;;  %v1650_v57 = vpop.f32.mrf.mxu1  ;;  %v9417_v34 = vld [vmem:[#allocation29_spill] sm:$0xff] }
 0x1ec   : > { %v1867_v56 = vmul.f32 %v6991_v6, %v1802_v43  ;;  %v1805_v52 = vmul.f32 %v1650_v57, %v1650_v57  ;;  %v1336_v43 = vmul.f32 %v9416_v47, %v9416_v47 }
 0x1ed   : > { %v1868_v44 = vmul.f32 %v6991_v6, %v1803_v53  ;;  %v1869_v30 = vmul.f32 %v6991_v6, %v1804_v7  ;;  %5514 = vmatmul.msk.bf16.gmra.mxu0 %vm1071_vm0, %v5993_v59  ;;  %v1335_v7 = vmul.f32 %v9414_v46, %v9414_v46  ;;  %v1337_v53 = vmul.f32 %v9417_v34, %v9417_v34 }
 0x1ee   : > { %v7274_v58 = vadd.f32 %v1867_v56, %v1396_v51  ;;  %v1870_v26 = vmul.f32 %v6991_v6, %v1805_v52  ;;  %5522 = vmatmul.msk.bf16.gmra.mxu1 %vm1071_vm0, %v5993_v59  ;;  %5530 = vmatmul.msk.bf16.gmra.mxu2 %vm1071_vm0, %v5993_v59  ;;  %v9418_v56 = vld [vmem:[#allocation30_spill] sm:$0xff]  ;;  %v1401_v47 = vmul.f32 %v6985_v42, %v1336_v43 }
 0x1ef   : > { %v7279_v57 = vadd.f32 %v1868_v44, %v1397_v48  ;;  %v7281_v31 = vadd.f32 %v1869_v30, %v1398_v38  ;;  %5538 = vmatmul.msk.bf16.gmra.mxu3 %vm1071_vm0, %v5993_v59  ;;  %v1338_v44 = vmul.f32 %v9418_v56, %v9418_v56  ;;  %v1400_v46 = vmul.f32 %v6985_v42, %v1335_v7 }
 0x1f0   : > { %9411 = vst [vmem:[#allocation24_spill] sm:$0xff] %v7274_v58  ;;  %v7286_v39 = vadd.f32 %v1870_v26, %v1399_v5  ;;  %v1402_v34 = vmul.f32 %v6985_v42, %v1337_v53  ;;  %v9424_v53 = vld [vmem:[#allocation32_spill] sm:$0xff]  ;;  %v9425_v58 = vld [vmem:[#allocation33_spill] sm:$0xff] }
 0x1f1   : > { %9412 = vst [vmem:[#allocation25_spill] sm:$0xff] %v7279_v57  ;;  %v1699_v51 = vpop.f32.mrf.mxu2 }
 0x1f2   : > { %9413 = vst [vmem:[#allocation26_spill] sm:$0xff] %v7281_v31  ;;  %v1806_v52 = vmul.f32 %v1699_v51, %v1699_v51  ;;  %v1748_v30 = vpop.f32.mrf.mxu3  ;;  %v1603_v48 = vpop.f32.mrf.mxu0  ;;  %v1403_v51 = vmul.f32 %v6985_v42, %v1338_v44 }
 0x1f3   : > { %9415 = vst [vmem:[#allocation27_spill] sm:$0xff] %v7286_v39  ;;  %v1807_v38 = vmul.f32 %v1748_v30, %v1748_v30  ;;  %v1808_v59 = vmul.f32 %v1603_v48, %v1603_v48  ;;  %v1652_v31 = vpop.f32.mrf.mxu1 }
 0x1f4   : > { %v1871_v5 = vmul.f32 %v6991_v6, %v1806_v52  ;;  %v1809_v26 = vmul.f32 %v1652_v31, %v1652_v31  ;;  %v9422_v52 = vld [vmem:[#allocation31_spill] sm:$0xff] }
 0x1f5   : > { %v1872_v39 = vmul.f32 %v6991_v6, %v1807_v38  ;;  %v1873_v56 = vmul.f32 %v6991_v6, %v1808_v59  ;;  %v1339_v31 = vmul.f32 %v9422_v52, %v9422_v52  ;;  %v1340_v38 = vmul.f32 %v9424_v53, %v9424_v53 }
 0x1f6   : > { %v7301_v57 = vadd.f32 %v1871_v5, %v1400_v46  ;;  %v1874_v30 = vmul.f32 %v6991_v6, %v1809_v26  ;;  %v1341_v59 = vmul.f32 %v9425_v58, %v9425_v58  ;;  %v5994_v46 = vld [vmem:[%s6644_s30 + $0xb0] sm:$0xff]  ;;  %v9426_v5 = vld [vmem:[#allocation34_spill] sm:$0xff] }
 0x1f7   : > { %v7304_v48 = vadd.f32 %v1872_v39, %v1401_v47  ;;  %v7306_v7 = vadd.f32 %v1873_v56, %v1402_v34  ;;  %v1342_v26 = vmul.f32 %v9426_v5, %v9426_v5  ;;  %v1405_v53 = vmul.f32 %v6985_v42, %v1340_v38  ;;  %v9430_v38 = vld [vmem:[#allocation35_spill] sm:$0xff] }
 0x1f8   : > { %9419 = vst [vmem:[#allocation28_spill] sm:$0xff] %v7301_v57  ;;  %v7310_v43 = vadd.f32 %v1874_v30, %v1403_v51  ;;  %v1404_v51 = vmul.f32 %v6985_v42, %v1339_v31  ;;  %v1406_v58 = vmul.f32 %v6985_v42, %v1341_v59 }
 0x1f9   : > { %9420 = vst [vmem:[#allocation29_spill] sm:$0xff] %v7304_v48  ;;  %v1701_v44 = vpop.f32.mrf.mxu2 }
 0x1fa   : > { %9421 = vst [vmem:[#allocation30_spill] sm:$0xff] %v7306_v7  ;;  %v1810_v39 = vmul.f32 %v1701_v44, %v1701_v44  ;;  %v1750_v47 = vpop.f32.mrf.mxu3  ;;  %v1606_v34 = vpop.f32.mrf.mxu0  ;;  %v1407_v44 = vmul.f32 %v6985_v42, %v1342_v26  ;;  %v9432_v26 = vld [vmem:[#allocation36_spill] sm:$0xff] }
 0x1fb   : > { %9423 = vst [vmem:[#allocation31_spill] sm:$0xff] %v7310_v43  ;;  %v1811_v56 = vmul.f32 %v1750_v47, %v1750_v47  ;;  %v1812_v7 = vmul.f32 %v1606_v34, %v1606_v34  ;;  %v1655_v48 = vpop.f32.mrf.mxu1  ;;  %v9433_v34 = vld [vmem:[#allocation37_spill] sm:$0xff] }
 0x1fc   : > { %v1875_v30 = vmul.f32 %v6991_v6, %v1810_v39  ;;  %v1813_v52 = vmul.f32 %v1655_v48, %v1655_v48  ;;  %v1344_v39 = vmul.f32 %v9432_v26, %v9432_v26 }
 0x1fd   : > { %v1876_v43 = vmul.f32 %v6991_v6, %v1811_v56  ;;  %v1877_v57 = vmul.f32 %v6991_v6, %v1812_v7  ;;  %5515 = vmatmul.msk.bf16.gmra.mxu0 %vm1071_vm0, %v5994_v46  ;;  %v1343_v7 = vmul.f32 %v9430_v38, %v9430_v38  ;;  %v1345_v56 = vmul.f32 %v9433_v34, %v9433_v34 }
 0x1fe   : > { %v7327_v5 = vadd.f32 %v1875_v30, %v1404_v51  ;;  %v1878_v47 = vmul.f32 %v6991_v6, %v1813_v52  ;;  %5523 = vmatmul.msk.bf16.gmra.mxu1 %vm1071_vm0, %v5994_v46  ;;  %5531 = vmatmul.msk.bf16.gmra.mxu2 %vm1071_vm0, %v5994_v46  ;;  %v9434_v30 = vld [vmem:[#allocation38_spill] sm:$0xff]  ;;  %v1409_v26 = vmul.f32 %v6985_v42, %v1344_v39 }
 0x1ff   : > { %v7332_v48 = vadd.f32 %v1876_v43, %v1405_v53  ;;  %v7334_v31 = vadd.f32 %v1877_v57, %v1406_v58  ;;  %5539 = vmatmul.msk.bf16.gmra.mxu3 %vm1071_vm0, %v5994_v46  ;;  %v1346_v43 = vmul.f32 %v9434_v30, %v9434_v30  ;;  %v1408_v38 = vmul.f32 %v6985_v42, %v1343_v7 }
 0x200   : > { %9427 = vst [vmem:[#allocation32_spill] sm:$0xff] %v7327_v5  ;;  %v7339_v59 = vadd.f32 %v1878_v47, %v1407_v44  ;;  %v1410_v34 = vmul.f32 %v6985_v42, %v1345_v56  ;;  %v9440_v56 = vld [vmem:[#allocation40_spill] sm:$0xff]  ;;  %v9441_v5 = vld [vmem:[#allocation41_spill] sm:$0xff] }
 0x201   : > { %9428 = vst [vmem:[#allocation33_spill] sm:$0xff] %v7332_v48  ;;  %v1704_v51 = vpop.f32.mrf.mxu2 }
 0x202   : > { %9429 = vst [vmem:[#allocation34_spill] sm:$0xff] %v7334_v31  ;;  %v1814_v52 = vmul.f32 %v1704_v51, %v1704_v51  ;;  %v1753_v57 = vpop.f32.mrf.mxu3  ;;  %v1608_v53 = vpop.f32.mrf.mxu0  ;;  %v1411_v51 = vmul.f32 %v6985_v42, %v1346_v43 }
 0x203   : > { %9431 = vst [vmem:[#allocation35_spill] sm:$0xff] %v7339_v59  ;;  %v1815_v58 = vmul.f32 %v1753_v57, %v1753_v57  ;;  %v1816_v46 = vmul.f32 %v1608_v53, %v1608_v53  ;;  %v1657_v31 = vpop.f32.mrf.mxu1 }
 0x204   : > { %v1879_v44 = vmul.f32 %v6991_v6, %v1814_v52  ;;  %v1817_v47 = vmul.f32 %v1657_v31, %v1657_v31  ;;  %v9438_v52 = vld [vmem:[#allocation39_spill] sm:$0xff] }
 0x205   : > { %v1880_v59 = vmul.f32 %v6991_v6, %v1815_v58  ;;  %v1881_v30 = vmul.f32 %v6991_v6, %v1816_v46  ;;  %v1347_v31 = vmul.f32 %v9438_v52, %v9438_v52  ;;  %v1348_v58 = vmul.f32 %v9440_v56, %v9440_v56 }
 0x206   : > { %v7354_v48 = vadd.f32 %v1879_v44, %v1408_v38  ;;  %v1882_v57 = vmul.f32 %v6991_v6, %v1817_v47  ;;  %v1349_v46 = vmul.f32 %v9441_v5, %v9441_v5  ;;  %v5995_v38 = vld [vmem:[%s6644_s30 + $0xb8] sm:$0xff]  ;;  %v9442_v44 = vld [vmem:[#allocation42_spill] sm:$0xff] }
 0x207   : > { %v7357_v53 = vadd.f32 %v1880_v59, %v1409_v26  ;;  %v7359_v7 = vadd.f32 %v1881_v30, %v1410_v34  ;;  %v1350_v47 = vmul.f32 %v9442_v44, %v9442_v44  ;;  %v1413_v56 = vmul.f32 %v6985_v42, %v1348_v58  ;;  %v9446_v58 = vld [vmem:[#allocation43_spill] sm:$0xff] }
 0x208   : > { %9435 = vst [vmem:[#allocation36_spill] sm:$0xff] %v7354_v48  ;;  %v7363_v39 = vadd.f32 %v1882_v57, %v1411_v51  ;;  %v1412_v51 = vmul.f32 %v6985_v42, %v1347_v31  ;;  %v1414_v5 = vmul.f32 %v6985_v42, %v1349_v46 }
 0x209   : > { %9436 = vst [vmem:[#allocation37_spill] sm:$0xff] %v7357_v53  ;;  %v1706_v43 = vpop.f32.mrf.mxu2 }
 0x20a   : > { %9437 = vst [vmem:[#allocation38_spill] sm:$0xff] %v7359_v7  ;;  %v1818_v59 = vmul.f32 %v1706_v43, %v1706_v43  ;;  %v1755_v26 = vpop.f32.mrf.mxu3  ;;  %v1611_v34 = vpop.f32.mrf.mxu0  ;;  %v1415_v43 = vmul.f32 %v6985_v42, %v1350_v47  ;;  %v9448_v47 = vld [vmem:[#allocation44_spill] sm:$0xff] }
 0x20b   : > { %9439 = vst [vmem:[#allocation39_spill] sm:$0xff] %v7363_v39  ;;  %v1819_v30 = vmul.f32 %v1755_v26, %v1755_v26  ;;  %v1820_v7 = vmul.f32 %v1611_v34, %v1611_v34  ;;  %v1660_v53 = vpop.f32.mrf.mxu1  ;;  %v9449_v34 = vld [vmem:[#allocation45_spill] sm:$0xff] }
 0x20c   : > { %v1883_v57 = vmul.f32 %v6991_v6, %v1818_v59  ;;  %v1821_v52 = vmul.f32 %v1660_v53, %v1660_v53  ;;  %v1352_v59 = vmul.f32 %v9448_v47, %v9448_v47 }
 0x20d   : > { %v1884_v39 = vmul.f32 %v6991_v6, %v1819_v30  ;;  %v1885_v48 = vmul.f32 %v6991_v6, %v1820_v7  ;;  %5516 = vmatmul.msk.bf16.gmra.mxu0 %vm1071_vm0, %v5995_v38  ;;  %v1351_v7 = vmul.f32 %v9446_v58, %v9446_v58  ;;  %v1353_v30 = vmul.f32 %v9449_v34, %v9449_v34 }
 0x20e   : > { %v7380_v44 = vadd.f32 %v1883_v57, %v1412_v51  ;;  %v1886_v26 = vmul.f32 %v6991_v6, %v1821_v52  ;;  %5524 = vmatmul.msk.bf16.gmra.mxu1 %vm1071_vm0, %v5995_v38  ;;  %5532 = vmatmul.msk.bf16.gmra.mxu2 %vm1071_vm0, %v5995_v38  ;;  %v9450_v57 = vld [vmem:[#allocation46_spill] sm:$0xff]  ;;  %v1417_v47 = vmul.f32 %v6985_v42, %v1352_v59 }
 0x20f   : > { %v7385_v53 = vadd.f32 %v1884_v39, %v1413_v56  ;;  %v7387_v31 = vadd.f32 %v1885_v48, %v1414_v5  ;;  %5540 = vmatmul.msk.bf16.gmra.mxu3 %vm1071_vm0, %v5995_v38  ;;  %v1354_v39 = vmul.f32 %v9450_v57, %v9450_v57  ;;  %v1418_v34 = vmul.f32 %v6985_v42, %v1353_v30 }
 0x210   : > { %9443 = vst [vmem:[#allocation40_spill] sm:$0xff] %v7380_v44  ;;  %v7392_v46 = vadd.f32 %v1886_v26, %v1415_v43  ;;  %v1416_v43 = vmul.f32 %v6985_v42, %v1351_v7  ;;  %v1356_v30 = vmul.f32 %v6989_v4, %v6989_v4 }
 0x211   : > { %9444 = vst [vmem:[#allocation41_spill] sm:$0xff] %v7385_v53  ;;  %v1709_v51 = vpop.f32.mrf.mxu2  ;;  %v1419_v57 = vmul.f32 %v6985_v42, %v1354_v39 }
 0x212   : > { %9445 = vst [vmem:[#allocation42_spill] sm:$0xff] %v7387_v31  ;;  %v1822_v52 = vmul.f32 %v1709_v51, %v1709_v51  ;;  %v1758_v48 = vpop.f32.mrf.mxu3  ;;  %v1613_v56 = vpop.f32.mrf.mxu0 }
 0x213   : > { %9447 = vst [vmem:[#allocation43_spill] sm:$0xff] %v7392_v46  ;;  %v1823_v38 = vmul.f32 %v1758_v48, %v1758_v48  ;;  %v1824_v5 = vmul.f32 %v1613_v56, %v1613_v56  ;;  %v1662_v31 = vpop.f32.mrf.mxu1 }
 0x214   : > { %v1887_v26 = vmul.f32 %v6991_v6, %v1822_v52  ;;  %v1825_v58 = vmul.f32 %v1662_v31, %v1662_v31  ;;  %v9451_v52 = vld [vmem:[#allocation47_spill] sm:$0xff] }
 0x215   : > { %v1888_v46 = vmul.f32 %v6991_v6, %v1823_v38  ;;  %v1889_v51 = vmul.f32 %v6991_v6, %v1824_v5  ;;  %v1355_v31 = vmul.f32 %v9451_v52, %v9451_v52  ;;  %v5996_v5 = vld [vmem:[%s6644_s30 + $0xc0] sm:$0xff] }
 0x216   : > { %v7407_v53 = vadd.f32 %v1887_v26, %v1416_v43  ;;  %v1890_v48 = vmul.f32 %v6991_v6, %v1825_v58  ;;  %v7421_v26 = vstv %s5541_s9 }
 0x217   : > { %v7410_v56 = vadd.f32 %v1888_v46, %v1417_v47  ;;  %v7412_v7 = vadd.f32 %v1889_v51, %v1418_v34  ;;  %v1420_v34 = vmul.f32 %v6985_v42, %v1355_v31 }
 0x218   : > { %v7416_v59 = vadd.f32 %v1890_v48, %v1419_v57  ;;  %v1421_v57 = vmul.f32 %v6985_v42, %v1356_v30  ;;  %v9453_v42 = vld [vmem:[#allocation15_spill] sm:$0xff]  ;;  %v9454_v30 = vld [vmem:[#allocation14_spill] sm:$0xff] }
 0x219   : > { %v1711_v38 = vpop.f32.mrf.mxu2 }
 0x21a   : > { %9452 = vst [vmem:[#allocation44_spill] sm:$0xff] %v7416_v59  ;;  %v1826_v44 = vmul.f32 %v1711_v38, %v1711_v38  ;;  %v1760_v39 = vpop.f32.mrf.mxu3  ;;  %v2047_v43 = vpop.f32.mrf.mxu0 }
 0x21b   : > { %v1827_v58 = vmul.f32 %v1760_v39, %v1760_v39  ;;  %v2235_v46 = vmul.f32 %v2047_v43, %v2047_v43  ;;  %v2096_v47 = vpop.f32.mrf.mxu1 }
 0x21c   : > { %v1891_v51 = vmul.f32 %v6991_v6, %v1826_v44  ;;  %v2236_v52 = vmul.f32 %v2096_v47, %v2096_v47 }
 0x21d   : > { %v1892_v48 = vmul.f32 %v6991_v6, %v1827_v58  ;;  %v2300_v4 = vmul.f32 %v7421_v26, %v2235_v46  ;;  %5590 = vmatmul.msk.bf16.vlgmr.msrb.gmra.mxu0 %vm1071_vm0, %v5996_v5 }
 0x21e   : > { %v7429_v38 = vadd.f32 %v1891_v51, %v1420_v34  ;;  %v2301_v59 = vmul.f32 %v7421_v26, %v2236_v52  ;;  %5598 = vmatmul.msk.bf16.vlgmr.msrb.gmra.mxu1 %vm1071_vm0, %v5996_v5  ;;  %5606 = vmatmul.msk.bf16.vlgmr.msrb.gmra.mxu2 %vm1071_vm0, %v5996_v5 }
 0x21f   : > { %v7434_v31 = vadd.f32 %v1892_v48, %v1421_v57  ;;  %v7437_v44 = vadd.f32 %v2300_v4, %v7000_v10  ;;  %5614 = vmatmul.msk.bf16.vlgmr.msrb.gmra.mxu3 %vm1071_vm0, %v5996_v5  ;;  %3553 = vmatpush.bf16.msrb.mxu2 %v6658_v24 }
 0x220   : > { %v7442_v6 = vadd.f32 %v2301_v59, %v7006_v8  ;;  %3602 = vmatpush.bf16.msrb.mxu3 %v9453_v42  ;;  %3455 = vmatpush.bf16.msrb.mxu0 %v9454_v30  ;;  %v9455_v59 = vld [vmem:[#allocation16_spill] sm:$0xff] }
 0x221   : > { %v2145_v39 = vpop.f32.mrf.mxu2  ;;  %3504 = vmatpush.bf16.msrb.mxu1 %v6656_v23 }
 0x222   : > { %v2237_v43 = vmul.f32 %v2145_v39, %v2145_v39  ;;  %v2194_v58 = vpop.f32.mrf.mxu3  ;;  %v2049_v46 = vpop.f32.mrf.mxu0 }
 0x223   : > { %v2238_v47 = vmul.f32 %v2194_v58, %v2194_v58  ;;  %v2239_v10 = vmul.f32 %v2049_v46, %v2049_v46  ;;  %v2098_v34 = vpop.f32.mrf.mxu1  ;;  %3554 = vmatpush.bf16.msrb.mxu2 %v6679_v37 }
 0x224   : > { %v2302_v5 = vmul.f32 %v7421_v26, %v2237_v43  ;;  %v2240_v8 = vmul.f32 %v2098_v34, %v2098_v34  ;;  %3603 = vmatpush.bf16.msrb.mxu3 %v6684_v41  ;;  %3456 = vmatpush.bf16.msrb.mxu0 %v9455_v59 }
 0x225   : > { %v2303_v51 = vmul.f32 %v7421_v26, %v2238_v47  ;;  %v2304_v52 = vmul.f32 %v7421_v26, %v2239_v10  ;;  %3505 = vmatpush.bf16.msrb.mxu1 %v6673_v33 }
 0x226   : > { %v7455_v57 = vadd.f32 %v2302_v5, %v7028_v0  ;;  %v2305_v48 = vmul.f32 %v7421_v26, %v2240_v8  ;;  %v5997_v0 = vld [vmem:[%s6644_s30 + $0xc8] sm:$0xff] }
 0x227   : > { %v7459_v4 = vadd.f32 %v2303_v51, %v7033_v32  ;;  %v7462_v39 = vadd.f32 %v2304_v52, %v7035_v1  ;;  %3555 = vmatpush.bf16.msrb.mxu2 %v6699_v50 }
 0x228   : > { %v7466_v43 = vadd.f32 %v2305_v48, %v7040_v16  ;;  %3604 = vmatpush.bf16.msrb.mxu3 %v6705_v54  ;;  %3457 = vmatpush.bf16.msrb.mxu0 %v6690_v45 }
 0x229   : > { %v2147_v58 = vpop.f32.mrf.mxu2  ;;  %3506 = vmatpush.bf16.msrb.mxu1 %v6697_v49 }
 0x22a   : > { %v2241_v46 = vmul.f32 %v2147_v58, %v2147_v58  ;;  %v2196_v47 = vpop.f32.mrf.mxu3  ;;  %v2052_v32 = vpop.f32.mrf.mxu0 }
 0x22b   : > { %v2242_v10 = vmul.f32 %v2196_v47, %v2196_v47  ;;  %v2243_v34 = vmul.f32 %v2052_v32, %v2052_v32  ;;  %v2101_v1 = vpop.f32.mrf.mxu1  ;;  %3556 = vmatpush.bf16.msrb.mxu2 %v6719_v62  ;;  %v9459_v32 = vld [vmem:[#allocation49_spill] sm:$0xff] }
 0x22c   : > { %v2306_v5 = vmul.f32 %v7421_v26, %v2241_v46  ;;  %v2244_v16 = vmul.f32 %v2101_v1, %v2101_v1  ;;  %3605 = vmatpush.bf16.msrb.mxu3 %v6722_v63  ;;  %3458 = vmatpush.bf16.msrb.mxu0 %v6713_v60  ;;  %v9457_v46 = vld [vmem:[#allocation48_spill] sm:$0xff] }
 0x22d   : > { %v2307_v8 = vmul.f32 %v7421_v26, %v2242_v10  ;;  %v2308_v51 = vmul.f32 %v7421_v26, %v2243_v34  ;;  %5591 = vmatmul.msk.bf16.gmra.mxu0 %vm1071_vm0, %v5997_v0  ;;  %3507 = vmatpush.bf16.msrb.mxu1 %v6717_v61 }
 0x22e   : > { %v7481_v52 = vadd.f32 %v2306_v5, %v7062_v3  ;;  %v2309_v48 = vmul.f32 %v7421_v26, %v2244_v16  ;;  %5599 = vmatmul.msk.bf16.gmra.mxu1 %vm1071_vm0, %v5997_v0  ;;  %5607 = vmatmul.msk.bf16.gmra.mxu2 %vm1071_vm0, %v5997_v0 }
 0x22f   : > { %v7487_v58 = vadd.f32 %v2307_v8, %v7067_v13  ;;  %v7490_v47 = vadd.f32 %v2308_v51, %v9457_v46  ;;  %5615 = vmatmul.msk.bf16.gmra.mxu3 %vm1071_vm0, %v5997_v0 }
 0x230   : > { %9456 = vst [vmem:[#allocation45_spill] sm:$0xff] %v7481_v52  ;;  %v7494_v10 = vadd.f32 %v2309_v48, %v9459_v32 }
 0x231   : > { %9458 = vst [vmem:[#allocation46_spill] sm:$0xff] %v7490_v47  ;;  %v2150_v34 = vpop.f32.mrf.mxu2 }
 0x232   : > { %9460 = vst [vmem:[#allocation47_spill] sm:$0xff] %v7494_v10  ;;  %v2245_v3 = vmul.f32 %v2150_v34, %v2150_v34  ;;  %v2199_v1 = vpop.f32.mrf.mxu3  ;;  %v2054_v5 = vpop.f32.mrf.mxu0  ;;  %v9461_v34 = vld [vmem:[#allocation50_spill] sm:$0xff] }
 0x233   : > { %v2246_v16 = vmul.f32 %v2199_v1, %v2199_v1  ;;  %v2247_v52 = vmul.f32 %v2054_v5, %v2054_v5  ;;  %v2103_v61 = vpop.f32.mrf.mxu1 }
 0x234   : > { %v2310_v60 = vmul.f32 %v7421_v26, %v2245_v3  ;;  %v2248_v13 = vmul.f32 %v2103_v61, %v2103_v61  ;;  %v5998_v61 = vld [vmem:[%s6644_s30 + $0xd0] sm:$0xff] }
 0x235   : > { %v2311_v8 = vmul.f32 %v7421_v26, %v2246_v16  ;;  %v2312_v51 = vmul.f32 %v7421_v26, %v2247_v52 }
 0x236   : > { %v7500_v0 = vadd.f32 %v2310_v60, %v7089_v19  ;;  %v2313_v48 = vmul.f32 %v7421_v26, %v2248_v13 }
 0x237   : > { %v7504_v46 = vadd.f32 %v2311_v8, %v7092_v20  ;;  %v7507_v32 = vadd.f32 %v2312_v51, %v7094_v14 }
 0x238   : > { %v7510_v1 = vadd.f32 %v2313_v48, %v9461_v34 }
 0x239   : > { %v2152_v3 = vpop.f32.mrf.mxu2 }
 0x23a   : > { %v2249_v5 = vmul.f32 %v2152_v3, %v2152_v3  ;;  %v2201_v16 = vpop.f32.mrf.mxu3  ;;  %v2057_v10 = vpop.f32.mrf.mxu0 }
 0x23b   : > { %v2250_v52 = vmul.f32 %v2201_v16, %v2201_v16  ;;  %v2251_v47 = vmul.f32 %v2057_v10, %v2057_v10  ;;  %v2106_v60 = vpop.f32.mrf.mxu1 }
 0x23c   : > { %v2314_v19 = vmul.f32 %v7421_v26, %v2249_v5  ;;  %v2252_v13 = vmul.f32 %v2106_v60, %v2106_v60 }
 0x23d   : > { %v2315_v20 = vmul.f32 %v7421_v26, %v2250_v52  ;;  %v2316_v8 = vmul.f32 %v7421_v26, %v2251_v47  ;;  %5592 = vmatmul.msk.bf16.gmra.mxu0 %vm1071_vm0, %v5998_v61 }
 0x23e   : > { %v7518_v14 = vadd.f32 %v2314_v19, %v7115_v2  ;;  %v2317_v51 = vmul.f32 %v7421_v26, %v2252_v13  ;;  %5600 = vmatmul.msk.bf16.gmra.mxu1 %vm1071_vm0, %v5998_v61  ;;  %5608 = vmatmul.msk.bf16.gmra.mxu2 %vm1071_vm0, %v5998_v61 }
 0x23f   : > { %v7524_v10 = vadd.f32 %v2315_v20, %v7120_v18  ;;  %v7527_v48 = vadd.f32 %v2316_v8, %v7122_v17  ;;  %5616 = vmatmul.msk.bf16.gmra.mxu3 %vm1071_vm0, %v5998_v61 }
 0x240   : > { %v7531_v47 = vadd.f32 %v2317_v51, %v7127_v29 }
 0x241   : > { %v2155_v34 = vpop.f32.mrf.mxu2 }
 0x242   : > { %v2253_v2 = vmul.f32 %v2155_v34, %v2155_v34  ;;  %v2204_v3 = vpop.f32.mrf.mxu3  ;;  %v2059_v5 = vpop.f32.mrf.mxu0 }
 0x243   : > { %v2254_v16 = vmul.f32 %v2204_v3, %v2204_v3  ;;  %v2255_v52 = vmul.f32 %v2059_v5, %v2059_v5  ;;  %v2108_v60 = vpop.f32.mrf.mxu1 }
 0x244   : > { %v2318_v19 = vmul.f32 %v7421_v26, %v2253_v2  ;;  %v2256_v18 = vmul.f32 %v2108_v60, %v2108_v60  ;;  %v5999_v2 = vld [vmem:[%s6644_s30 + $0xd8] sm:$0xff] }
 0x245   : > { %v2319_v13 = vmul.f32 %v7421_v26, %v2254_v16  ;;  %v2320_v17 = vmul.f32 %v7421_v26, %v2255_v52 }
 0x246   : > { %v7537_v61 = vadd.f32 %v2318_v19, %v7142_v21  ;;  %v2321_v29 = vmul.f32 %v7421_v26, %v2256_v18 }
 0x247   : > { %v7541_v20 = vadd.f32 %v2319_v13, %v7145_v55  ;;  %v7544_v8 = vadd.f32 %v2320_v17, %v7147_v28 }
 0x248   : > { %v7547_v51 = vadd.f32 %v2321_v29, %v7151_v9 }
 0x249   : > { %v2157_v34 = vpop.f32.mrf.mxu2 }
 0x24a   : > { %v2257_v3 = vmul.f32 %v2157_v34, %v2157_v34  ;;  %v2206_v5 = vpop.f32.mrf.mxu3  ;;  %v2062_v16 = vpop.f32.mrf.mxu0 }
 0x24b   : > { %v2258_v52 = vmul.f32 %v2206_v5, %v2206_v5  ;;  %v2259_v60 = vmul.f32 %v2062_v16, %v2062_v16  ;;  %v2111_v21 = vpop.f32.mrf.mxu1 }
 0x24c   : > { %v2322_v19 = vmul.f32 %v7421_v26, %v2257_v3  ;;  %v2260_v18 = vmul.f32 %v2111_v21, %v2111_v21 }
 0x24d   : > { %v2323_v55 = vmul.f32 %v7421_v26, %v2258_v52  ;;  %v2324_v13 = vmul.f32 %v7421_v26, %v2259_v60  ;;  %5593 = vmatmul.msk.bf16.gmra.mxu0 %vm1071_vm0, %v5999_v2 }
 0x24e   : > { %v7555_v28 = vadd.f32 %v2322_v19, %v7168_v22  ;;  %v2325_v9 = vmul.f32 %v7421_v26, %v2260_v18  ;;  %5601 = vmatmul.msk.bf16.gmra.mxu1 %vm1071_vm0, %v5999_v2  ;;  %5609 = vmatmul.msk.bf16.gmra.mxu2 %vm1071_vm0, %v5999_v2 }
 0x24f   : > { %v7561_v17 = vadd.f32 %v2323_v55, %v7173_v25  ;;  %v7564_v29 = vadd.f32 %v2324_v13, %v7175_v12  ;;  %5617 = vmatmul.msk.bf16.gmra.mxu3 %vm1071_vm0, %v5999_v2 }
 0x250   : > { %v7568_v34 = vadd.f32 %v2325_v9, %v7180_v11 }
 0x251   : > { %v2160_v3 = vpop.f32.mrf.mxu2 }
 0x252   : > { %v2261_v22 = vmul.f32 %v2160_v3, %v2160_v3  ;;  %v2209_v5 = vpop.f32.mrf.mxu3  ;;  %v2064_v16 = vpop.f32.mrf.mxu0 }
 0x253   : > { %v2262_v52 = vmul.f32 %v2209_v5, %v2209_v5  ;;  %v2263_v60 = vmul.f32 %v2064_v16, %v2064_v16  ;;  %v2113_v21 = vpop.f32.mrf.mxu1 }
 0x254   : > { %v2326_v19 = vmul.f32 %v7421_v26, %v2261_v22  ;;  %v2264_v25 = vmul.f32 %v2113_v21, %v2113_v21  ;;  %v6000_v22 = vld [vmem:[%s6644_s30 + $0xe0] sm:$0xff] }
 0x255   : > { %v2327_v18 = vmul.f32 %v7421_v26, %v2262_v52  ;;  %v2328_v12 = vmul.f32 %v7421_v26, %v2263_v60 }
 0x256   : > { %v7574_v2 = vadd.f32 %v2326_v19, %v7195_v35  ;;  %v2329_v11 = vmul.f32 %v7421_v26, %v2264_v25 }
 0x257   : > { %v7578_v55 = vadd.f32 %v2327_v18, %v7198_v40  ;;  %v7581_v13 = vadd.f32 %v2328_v12, %v7200_v27  ;;  %v9466_v12 = vld [vmem:[#allocation51_spill] sm:$0xff] }
 0x258   : > { %v7584_v9 = vadd.f32 %v2329_v11, %v7204_v15 }
 0x259   : > { %9462 = vst [vmem:[#allocation15_spill] sm:$0xff] %v7578_v55  ;;  %v2162_v3 = vpop.f32.mrf.mxu2 }
 0x25a   : > { %9463 = vst [vmem:[#allocation14_spill] sm:$0xff] %v7581_v13  ;;  %v2265_v5 = vmul.f32 %v2162_v3, %v2162_v3  ;;  %v2211_v16 = vpop.f32.mrf.mxu3  ;;  %v2067_v52 = vpop.f32.mrf.mxu0  ;;  %v9468_v3 = vld [vmem:[#allocation52_spill] sm:$0xff] }
 0x25b   : > { %9464 = vst [vmem:[#allocation16_spill] sm:$0xff] %v7584_v9  ;;  %v2266_v60 = vmul.f32 %v2211_v16, %v2211_v16  ;;  %v2267_v21 = vmul.f32 %v2067_v52, %v2067_v52  ;;  %v2116_v35 = vpop.f32.mrf.mxu1  ;;  %v9470_v16 = vld [vmem:[#allocation53_spill] sm:$0xff] }
 0x25c   : > { %v2330_v19 = vmul.f32 %v7421_v26, %v2265_v5  ;;  %v2268_v25 = vmul.f32 %v2116_v35, %v2116_v35 }
 0x25d   : > { %v2331_v40 = vmul.f32 %v7421_v26, %v2266_v60  ;;  %v2332_v18 = vmul.f32 %v7421_v26, %v2267_v21  ;;  %5594 = vmatmul.msk.bf16.gmra.mxu0 %vm1071_vm0, %v6000_v22 }
 0x25e   : > { %v7592_v27 = vadd.f32 %v2330_v19, %v7221_v36  ;;  %v2333_v15 = vmul.f32 %v7421_v26, %v2268_v25  ;;  %5602 = vmatmul.msk.bf16.gmra.mxu1 %vm1071_vm0, %v6000_v22  ;;  %5610 = vmatmul.msk.bf16.gmra.mxu2 %vm1071_vm0, %v6000_v22 }
 0x25f   : > { %v7598_v11 = vadd.f32 %v2331_v40, %v9466_v12  ;;  %v7601_v5 = vadd.f32 %v2332_v18, %v9468_v3  ;;  %5618 = vmatmul.msk.bf16.gmra.mxu3 %vm1071_vm0, %v6000_v22  ;;  %v9472_v3 = vld [vmem:[#allocation20_spill] sm:$0xff] }
 0x260   : > { %9465 = vst [vmem:[#allocation48_spill] sm:$0xff] %v7592_v27  ;;  %v7605_v52 = vadd.f32 %v2333_v15, %v9470_v16  ;;  %v9474_v16 = vld [vmem:[#allocation21_spill] sm:$0xff] }
 0x261   : > { %9467 = vst [vmem:[#allocation49_spill] sm:$0xff] %v7598_v11  ;;  %v2165_v60 = vpop.f32.mrf.mxu2 }
 0x262   : > { %9469 = vst [vmem:[#allocation50_spill] sm:$0xff] %v7601_v5  ;;  %v2269_v36 = vmul.f32 %v2165_v60, %v2165_v60  ;;  %v2214_v21 = vpop.f32.mrf.mxu3  ;;  %v2069_v35 = vpop.f32.mrf.mxu0 }
 0x263   : > { %9471 = vst [vmem:[#allocation51_spill] sm:$0xff] %v7605_v52  ;;  %v2270_v19 = vmul.f32 %v2214_v21, %v2214_v21  ;;  %v2271_v25 = vmul.f32 %v2069_v35, %v2069_v35  ;;  %v2118_v27 = vpop.f32.mrf.mxu1  ;;  %v9476_v52 = vld [vmem:[#allocation22_spill] sm:$0xff]  ;;  %v9478_v21 = vld [vmem:[#allocation23_spill] sm:$0xff] }
 0x264   : > { %v2334_v9 = vmul.f32 %v7421_v26, %v2269_v36  ;;  %v2272_v40 = vmul.f32 %v2118_v27, %v2118_v27  ;;  %v6001_v27 = vld [vmem:[%s6644_s30 + $0xe8] sm:$0xff] }
 0x265   : > { %v2335_v12 = vmul.f32 %v7421_v26, %v2270_v19  ;;  %v2336_v18 = vmul.f32 %v7421_v26, %v2271_v25 }
 0x266   : > { %v7611_v22 = vadd.f32 %v2334_v9, %v9472_v3  ;;  %v2337_v15 = vmul.f32 %v7421_v26, %v2272_v40 }
 0x267   : > { %v7615_v60 = vadd.f32 %v2335_v12, %v9474_v16  ;;  %v7618_v5 = vadd.f32 %v2336_v18, %v9476_v52  ;;  %v9480_v52 = vld [vmem:[#allocation24_spill] sm:$0xff] }
 0x268   : > { %9473 = vst [vmem:[#allocation52_spill] sm:$0xff] %v7611_v22  ;;  %v7621_v35 = vadd.f32 %v2337_v15, %v9478_v21 }
 0x269   : > { %9475 = vst [vmem:[#allocation53_spill] sm:$0xff] %v7615_v60  ;;  %v2167_v36 = vpop.f32.mrf.mxu2 }
 0x26a   : > { %9477 = vst [vmem:[#allocation20_spill] sm:$0xff] %v7618_v5  ;;  %v2273_v11 = vmul.f32 %v2167_v36, %v2167_v36  ;;  %v2216_v19 = vpop.f32.mrf.mxu3  ;;  %v2072_v13 = vpop.f32.mrf.mxu0 }
 0x26b   : > { %9479 = vst [vmem:[#allocation21_spill] sm:$0xff] %v7621_v35  ;;  %v2274_v25 = vmul.f32 %v2216_v19, %v2216_v19  ;;  %v2275_v55 = vmul.f32 %v2072_v13, %v2072_v13  ;;  %v2121_v9 = vpop.f32.mrf.mxu1  ;;  %v9482_v13 = vld [vmem:[#allocation25_spill] sm:$0xff] }
 0x26c   : > { %v2338_v3 = vmul.f32 %v7421_v26, %v2273_v11  ;;  %v2276_v40 = vmul.f32 %v2121_v9, %v2121_v9  ;;  %v9484_v11 = vld [vmem:[#allocation26_spill] sm:$0xff] }
 0x26d   : > { %v2339_v12 = vmul.f32 %v7421_v26, %v2274_v25  ;;  %v2340_v16 = vmul.f32 %v7421_v26, %v2275_v55  ;;  %5595 = vmatmul.msk.bf16.gmra.mxu0 %vm1071_vm0, %v6001_v27  ;;  %v9486_v55 = vld [vmem:[#allocation27_spill] sm:$0xff] }
 0x26e   : > { %v7629_v18 = vadd.f32 %v2338_v3, %v9480_v52  ;;  %v2341_v15 = vmul.f32 %v7421_v26, %v2276_v40  ;;  %5603 = vmatmul.msk.bf16.gmra.mxu1 %vm1071_vm0, %v6001_v27  ;;  %5611 = vmatmul.msk.bf16.gmra.mxu2 %vm1071_vm0, %v6001_v27 }
 0x26f   : > { %v7635_v21 = vadd.f32 %v2339_v12, %v9482_v13  ;;  %v7638_v36 = vadd.f32 %v2340_v16, %v9484_v11  ;;  %5619 = vmatmul.msk.bf16.gmra.mxu3 %vm1071_vm0, %v6001_v27  ;;  %v9488_v11 = vld [vmem:[#allocation28_spill] sm:$0xff] }
 0x270   : > { %9481 = vst [vmem:[#allocation22_spill] sm:$0xff] %v7629_v18  ;;  %v7642_v19 = vadd.f32 %v2341_v15, %v9486_v55  ;;  %v9490_v55 = vld [vmem:[#allocation29_spill] sm:$0xff] }
 0x271   : > { %9483 = vst [vmem:[#allocation23_spill] sm:$0xff] %v7635_v21  ;;  %v2170_v25 = vpop.f32.mrf.mxu2 }
 0x272   : > { %9485 = vst [vmem:[#allocation24_spill] sm:$0xff] %v7638_v36  ;;  %v2277_v9 = vmul.f32 %v2170_v25, %v2170_v25  ;;  %v2219_v3 = vpop.f32.mrf.mxu3  ;;  %v2074_v40 = vpop.f32.mrf.mxu0 }
 0x273   : > { %9487 = vst [vmem:[#allocation25_spill] sm:$0xff] %v7642_v19  ;;  %v2278_v52 = vmul.f32 %v2219_v3, %v2219_v3  ;;  %v2279_v18 = vmul.f32 %v2074_v40, %v2074_v40  ;;  %v2123_v35 = vpop.f32.mrf.mxu1  ;;  %v9492_v19 = vld [vmem:[#allocation30_spill] sm:$0xff]  ;;  %v9494_v3 = vld [vmem:[#allocation31_spill] sm:$0xff] }
 0x274   : > { %v2342_v5 = vmul.f32 %v7421_v26, %v2277_v9  ;;  %v2280_v12 = vmul.f32 %v2123_v35, %v2123_v35  ;;  %v6002_v35 = vld [vmem:[%s6644_s30 + $0xf0] sm:$0xff] }
 0x275   : > { %v2343_v13 = vmul.f32 %v7421_v26, %v2278_v52  ;;  %v2344_v16 = vmul.f32 %v7421_v26, %v2279_v18 }
 0x276   : > { %v7648_v27 = vadd.f32 %v2342_v5, %v9488_v11  ;;  %v2345_v15 = vmul.f32 %v7421_v26, %v2280_v12 }
 0x277   : > { %v7652_v25 = vadd.f32 %v2343_v13, %v9490_v55  ;;  %v7655_v36 = vadd.f32 %v2344_v16, %v9492_v19  ;;  %v9496_v19 = vld [vmem:[#allocation32_spill] sm:$0xff] }
 0x278   : > { %9489 = vst [vmem:[#allocation26_spill] sm:$0xff] %v7648_v27  ;;  %v7658_v40 = vadd.f32 %v2345_v15, %v9494_v3 }
 0x279   : > { %9491 = vst [vmem:[#allocation27_spill] sm:$0xff] %v7652_v25  ;;  %v2172_v9 = vpop.f32.mrf.mxu2 }
 0x27a   : > { %9493 = vst [vmem:[#allocation28_spill] sm:$0xff] %v7655_v36  ;;  %v2281_v21 = vmul.f32 %v2172_v9, %v2172_v9  ;;  %v2221_v52 = vpop.f32.mrf.mxu3  ;;  %v2077_v60 = vpop.f32.mrf.mxu0 }
 0x27b   : > { %9495 = vst [vmem:[#allocation29_spill] sm:$0xff] %v7658_v40  ;;  %v2282_v18 = vmul.f32 %v2221_v52, %v2221_v52  ;;  %v2283_v22 = vmul.f32 %v2077_v60, %v2077_v60  ;;  %v2126_v5 = vpop.f32.mrf.mxu1  ;;  %v9498_v60 = vld [vmem:[#allocation33_spill] sm:$0xff] }
 0x27c   : > { %v2346_v11 = vmul.f32 %v7421_v26, %v2281_v21  ;;  %v2284_v12 = vmul.f32 %v2126_v5, %v2126_v5  ;;  %v9500_v21 = vld [vmem:[#allocation34_spill] sm:$0xff] }
 0x27d   : > { %v2347_v13 = vmul.f32 %v7421_v26, %v2282_v18  ;;  %v2348_v55 = vmul.f32 %v7421_v26, %v2283_v22  ;;  %5596 = vmatmul.msk.bf16.gmra.mxu0 %vm1071_vm0, %v6002_v35  ;;  %v9502_v22 = vld [vmem:[#allocation35_spill] sm:$0xff] }
 0x27e   : > { %v7666_v16 = vadd.f32 %v2346_v11, %v9496_v19  ;;  %v2349_v15 = vmul.f32 %v7421_v26, %v2284_v12  ;;  %5604 = vmatmul.msk.bf16.gmra.mxu1 %vm1071_vm0, %v6002_v35  ;;  %5612 = vmatmul.msk.bf16.gmra.mxu2 %vm1071_vm0, %v6002_v35 }
 0x27f   : > { %v7672_v3 = vadd.f32 %v2347_v13, %v9498_v60  ;;  %v7675_v9 = vadd.f32 %v2348_v55, %v9500_v21  ;;  %5620 = vmatmul.msk.bf16.gmra.mxu3 %vm1071_vm0, %v6002_v35  ;;  %v9504_v21 = vld [vmem:[#allocation36_spill] sm:$0xff] }
 0x280   : > { %9497 = vst [vmem:[#allocation30_spill] sm:$0xff] %v7666_v16  ;;  %v7679_v52 = vadd.f32 %v2349_v15, %v9502_v22  ;;  %v9505_v22 = vld [vmem:[#allocation37_spill] sm:$0xff] }
 0x281   : > { %9499 = vst [vmem:[#allocation31_spill] sm:$0xff] %v7672_v3  ;;  %v2175_v18 = vpop.f32.mrf.mxu2 }
 0x282   : > { %9501 = vst [vmem:[#allocation32_spill] sm:$0xff] %v7675_v9  ;;  %v2285_v5 = vmul.f32 %v2175_v18, %v2175_v18  ;;  %v2224_v11 = vpop.f32.mrf.mxu3  ;;  %v2079_v12 = vpop.f32.mrf.mxu0 }
 0x283   : > { %9503 = vst [vmem:[#allocation33_spill] sm:$0xff] %v7679_v52  ;;  %v2286_v19 = vmul.f32 %v2224_v11, %v2224_v11  ;;  %v2287_v16 = vmul.f32 %v2079_v12, %v2079_v12  ;;  %v2128_v40 = vpop.f32.mrf.mxu1  ;;  %v9506_v52 = vld [vmem:[#allocation38_spill] sm:$0xff]  ;;  %v9507_v11 = vld [vmem:[#allocation39_spill] sm:$0xff] }
 0x284   : > { %v2350_v36 = vmul.f32 %v7421_v26, %v2285_v5  ;;  %v2288_v13 = vmul.f32 %v2128_v40, %v2128_v40  ;;  %v6003_v40 = vld [vmem:[%s6644_s30 + $0xf8] sm:$0xff] }
 0x285   : > { %v2351_v60 = vmul.f32 %v7421_v26, %v2286_v19  ;;  %v2352_v55 = vmul.f32 %v7421_v26, %v2287_v16 }
 0x286   : > { %v7685_v35 = vadd.f32 %v2350_v36, %v9504_v21  ;;  %v2353_v15 = vmul.f32 %v7421_v26, %v2288_v13 }
 0x287   : > { %v7689_v18 = vadd.f32 %v2351_v60, %v9505_v22  ;;  %v7692_v9 = vadd.f32 %v2352_v55, %v9506_v52  ;;  %v9509_v52 = vld [vmem:[#allocation40_spill] sm:$0xff] }
 0x288   : > { %v7695_v12 = vadd.f32 %v2353_v15, %v9507_v11 }
 0x289   : > { %v2177_v5 = vpop.f32.mrf.mxu2 }
 0x28a   : > { %9508 = vst [vmem:[#allocation34_spill] sm:$0xff] %v7695_v12  ;;  %v2289_v3 = vmul.f32 %v2177_v5, %v2177_v5  ;;  %v2226_v19 = vpop.f32.mrf.mxu3  ;;  %v2082_v25 = vpop.f32.mrf.mxu0 }
 0x28b   : > { %v2290_v16 = vmul.f32 %v2226_v19, %v2226_v19  ;;  %v2291_v27 = vmul.f32 %v2082_v25, %v2082_v25  ;;  %v2131_v36 = vpop.f32.mrf.mxu1  ;;  %v9511_v25 = vld [vmem:[#allocation41_spill] sm:$0xff] }
 0x28c   : > { %v2354_v21 = vmul.f32 %v7421_v26, %v2289_v3  ;;  %v2292_v13 = vmul.f32 %v2131_v36, %v2131_v36  ;;  %v9512_v3 = vld [vmem:[#allocation42_spill] sm:$0xff] }
 0x28d   : > { %v2355_v60 = vmul.f32 %v7421_v26, %v2290_v16  ;;  %v2356_v22 = vmul.f32 %v7421_v26, %v2291_v27  ;;  %5597 = vmatmul.msk.bf16.gmra.mxu0 %vm1071_vm0, %v6003_v40  ;;  %v9514_v27 = vld [vmem:[#allocation43_spill] sm:$0xff] }
 0x28e   : > { %v7703_v55 = vadd.f32 %v2354_v21, %v9509_v52  ;;  %v2357_v15 = vmul.f32 %v7421_v26, %v2292_v13  ;;  %5605 = vmatmul.msk.bf16.gmra.mxu1 %vm1071_vm0, %v6003_v40  ;;  %5613 = vmatmul.msk.bf16.gmra.mxu2 %vm1071_vm0, %v6003_v40 }
 0x28f   : > { %v7709_v11 = vadd.f32 %v2355_v60, %v9511_v25  ;;  %v7712_v5 = vadd.f32 %v2356_v22, %v9512_v3  ;;  %5621 = vmatmul.msk.bf16.gmra.mxu3 %vm1071_vm0, %v6003_v40 }
 0x290   : > { %9510 = vst [vmem:[#allocation35_spill] sm:$0xff] %v7703_v55  ;;  %v7716_v19 = vadd.f32 %v2357_v15, %v9514_v27 }
 0x291   : > { %9513 = vst [vmem:[#allocation36_spill] sm:$0xff] %v7712_v5  ;;  %v2180_v16 = vpop.f32.mrf.mxu2 }
 0x292   : > { %9515 = vst [vmem:[#allocation37_spill] sm:$0xff] %v7716_v19  ;;  %v2293_v36 = vmul.f32 %v2180_v16, %v2180_v16  ;;  %v2229_v21 = vpop.f32.mrf.mxu3  ;;  %v2084_v13 = vpop.f32.mrf.mxu0 }
 0x293   : > { %v2294_v52 = vmul.f32 %v2229_v21, %v2229_v21  ;;  %v2295_v55 = vmul.f32 %v2084_v13, %v2084_v13  ;;  %v2133_v12 = vpop.f32.mrf.mxu1  ;;  %v9517_v21 = vld [vmem:[#allocation44_spill] sm:$0xff] }
 0x294   : > { %v2358_v60 = vmul.f32 %v7421_v26, %v2293_v36  ;;  %v2296_v25 = vmul.f32 %v2133_v12, %v2133_v12  ;;  %v6004_v12 = vld [vmem:[%s6644_s30 + $0x100] sm:$0xff] }
 0x295   : > { %v2359_v22 = vmul.f32 %v7421_v26, %v2294_v52  ;;  %v2360_v3 = vmul.f32 %v7421_v26, %v2295_v55  ;;  %v7735_v55 = vstv %s5622_s5  ;;  %s900_s5 = sand.u32 1, %s6263_s19  }
 0x296   : > { %v7722_v40 = vadd.f32 %v2358_v60, %v7407_v53  ;;  %v2361_v15 = vmul.f32 %v7421_v26, %v2296_v25 }
 0x297   : > { %v7726_v27 = vadd.f32 %v2359_v22, %v7410_v56  ;;  %v7729_v16 = vadd.f32 %v2360_v3, %v7412_v7 }
 0x298   : > { %9516 = vst [vmem:[#allocation38_spill] sm:$0xff] %v7722_v40  ;;  %v7732_v13 = vadd.f32 %v2361_v15, %v9517_v21 }
 0x299   : > { %v2182_v36 = vpop.f32.mrf.mxu2 }
 0x29a   : > { %v2297_v19 = vmul.f32 %v2182_v36, %v2182_v36  ;;  %v2231_v52 = vpop.f32.mrf.mxu3  ;;  %v2518_v5 = vpop.f32.mrf.mxu0 }
 0x29b   : > { %v2298_v53 = vmul.f32 %v2231_v52, %v2231_v52  ;;  %v2706_v60 = vmul.f32 %v2518_v5, %v2518_v5  ;;  %v2567_v40 = vpop.f32.mrf.mxu1 }
 0x29c   : > { %v2362_v25 = vmul.f32 %v7421_v26, %v2297_v19  ;;  %v2707_v56 = vmul.f32 %v2567_v40, %v2567_v40 }
 0x29d   : > { %v2363_v22 = vmul.f32 %v7421_v26, %v2298_v53  ;;  %v2771_v7 = vmul.f32 %v7735_v55, %v2706_v60  ;;  %5671 = vmatmul.msk.bf16.vlgmr.msra.gmra.mxu0 %vm1071_vm0, %v6004_v12 }
 0x29e   : > { %v7742_v3 = vadd.f32 %v2362_v25, %v7429_v38  ;;  %v2772_v15 = vmul.f32 %v7735_v55, %v2707_v56  ;;  %5679 = vmatmul.msk.bf16.vlgmr.msra.gmra.mxu1 %vm1071_vm0, %v6004_v12  ;;  %5687 = vmatmul.msk.bf16.vlgmr.msra.gmra.mxu2 %vm1071_vm0, %v6004_v12 }
 0x29f   : > { %v7748_v5 = vadd.f32 %v2363_v22, %v7434_v31  ;;  %v7751_v19 = vadd.f32 %v2771_v7, %v7437_v44  ;;  %5695 = vmatmul.msk.bf16.vlgmr.msra.gmra.mxu3 %vm1071_vm0, %v6004_v12  ;;  %4024 = vmatpush.bf16.msra.mxu2 %v6658_v24 }
 0x2a0   : > { %v7756_v26 = vadd.f32 %v2772_v15, %v7442_v6  ;;  %4073 = vmatpush.bf16.msra.mxu3 %v9453_v42  ;;  %3926 = vmatpush.bf16.msra.mxu0 %v9454_v30 }
 0x2a1   : > { %v2616_v38 = vpop.f32.mrf.mxu2  ;;  %3975 = vmatpush.bf16.msra.mxu1 %v6656_v23 }
 0x2a2   : > { %v2708_v40 = vmul.f32 %v2616_v38, %v2616_v38  ;;  %v2665_v31 = vpop.f32.mrf.mxu3  ;;  %v2520_v21 = vpop.f32.mrf.mxu0 }
 0x2a3   : > { %v2709_v36 = vmul.f32 %v2665_v31, %v2665_v31  ;;  %v2710_v44 = vmul.f32 %v2520_v21, %v2520_v21  ;;  %v2569_v52 = vpop.f32.mrf.mxu1  ;;  %4025 = vmatpush.bf16.msra.mxu2 %v6679_v37 }
 0x2a4   : > { %v2773_v12 = vmul.f32 %v7735_v55, %v2708_v40  ;;  %v2711_v6 = vmul.f32 %v2569_v52, %v2569_v52  ;;  %4074 = vmatpush.bf16.msra.mxu3 %v6684_v41  ;;  %3927 = vmatpush.bf16.msra.mxu0 %v9455_v59  ;;  %v9518_v52 = vld [vmem:[#allocation17_spill] sm:$0xff] }
 0x2a5   : > { %v2774_v53 = vmul.f32 %v7735_v55, %v2709_v36  ;;  %v2775_v60 = vmul.f32 %v7735_v55, %v2710_v44  ;;  %3976 = vmatpush.bf16.msra.mxu1 %v6673_v33 }
 0x2a6   : > { %v7769_v25 = vadd.f32 %v2773_v12, %v7455_v57  ;;  %v2776_v56 = vmul.f32 %v7735_v55, %v2711_v6  ;;  %v6005_v57 = vld [vmem:[%s6644_s30 + $0x108] sm:$0xff] }
 0x2a7   : > { %v7773_v22 = vadd.f32 %v2774_v53, %v7459_v4  ;;  %v7776_v7 = vadd.f32 %v2775_v60, %v7462_v39  ;;  %4026 = vmatpush.bf16.msra.mxu2 %v6699_v50  ;;  %v9519_v53 = vld [vmem:[#allocation18_spill] sm:$0xff]  ;;  %v9520_v60 = vld [vmem:[#allocation45_spill] sm:$0xff] }
 0x2a8   : > { %v7780_v15 = vadd.f32 %v2776_v56, %v7466_v43  ;;  %4075 = vmatpush.bf16.msra.mxu3 %v6705_v54  ;;  %3928 = vmatpush.bf16.msra.mxu0 %v6690_v45 }
 0x2a9   : > { %v2618_v38 = vpop.f32.mrf.mxu2  ;;  %3977 = vmatpush.bf16.msra.mxu1 %v6697_v49 }
 0x2aa   : > { %v2712_v40 = vmul.f32 %v2618_v38, %v2618_v38  ;;  %v2667_v31 = vpop.f32.mrf.mxu3  ;;  %v2523_v4 = vpop.f32.mrf.mxu0 }
 0x2ab   : > { %v2713_v21 = vmul.f32 %v2667_v31, %v2667_v31  ;;  %v2714_v36 = vmul.f32 %v2523_v4, %v2523_v4  ;;  %v2572_v39 = vpop.f32.mrf.mxu1  ;;  %4027 = vmatpush.bf16.msra.mxu2 %v6719_v62  ;;  %v9522_v31 = vld [vmem:[#allocation46_spill] sm:$0xff] }
 0x2ac   : > { %v2777_v44 = vmul.f32 %v7735_v55, %v2712_v40  ;;  %v2715_v43 = vmul.f32 %v2572_v39, %v2572_v39  ;;  %4076 = vmatpush.bf16.msra.mxu3 %v6722_v63  ;;  %3929 = vmatpush.bf16.msra.mxu0 %v9518_v52 }
 0x2ad   : > { %v2778_v12 = vmul.f32 %v7735_v55, %v2713_v21  ;;  %v2779_v6 = vmul.f32 %v7735_v55, %v2714_v36  ;;  %5672 = vmatmul.msk.bf16.gmra.mxu0 %vm1071_vm0, %v6005_v57  ;;  %3978 = vmatpush.bf16.msra.mxu1 %v9519_v53  ;;  %v9523_v21 = vld [vmem:[#allocation47_spill] sm:$0xff] }
 0x2ae   : > { %v7795_v56 = vadd.f32 %v2777_v44, %v9520_v60  ;;  %v2780_v38 = vmul.f32 %v7735_v55, %v2715_v43  ;;  %5680 = vmatmul.msk.bf16.gmra.mxu1 %vm1071_vm0, %v6005_v57  ;;  %5688 = vmatmul.msk.bf16.gmra.mxu2 %vm1071_vm0, %v6005_v57 }
 0x2af   : > { %v7801_v40 = vadd.f32 %v2778_v12, %v7487_v58  ;;  %v7804_v4 = vadd.f32 %v2779_v6, %v9522_v31  ;;  %5696 = vmatmul.msk.bf16.gmra.mxu3 %vm1071_vm0, %v6005_v57 }
 0x2b0   : > { %9521 = vst [vmem:[#allocation39_spill] sm:$0xff] %v7795_v56  ;;  %v7808_v36 = vadd.f32 %v2780_v38, %v9523_v21 }
 0x2b1   : > { %v2621_v39 = vpop.f32.mrf.mxu2 }
 0x2b2   : > { %9524 = vst [vmem:[#allocation40_spill] sm:$0xff] %v7808_v36  ;;  %v2716_v44 = vmul.f32 %v2621_v39, %v2621_v39  ;;  %v2670_v60 = vpop.f32.mrf.mxu3  ;;  %v2525_v43 = vpop.f32.mrf.mxu0 }
 0x2b3   : > { %v2717_v56 = vmul.f32 %v2670_v60, %v2670_v60  ;;  %v2718_v53 = vmul.f32 %v2525_v43, %v2525_v43  ;;  %v2574_v52 = vpop.f32.mrf.mxu1 }
 0x2b4   : > { %v2781_v63 = vmul.f32 %v7735_v55, %v2716_v44  ;;  %v2719_v58 = vmul.f32 %v2574_v52, %v2574_v52  ;;  %v6006_v52 = vld [vmem:[%s6644_s30 + $0x110] sm:$0xff] }
 0x2b5   : > { %v2782_v12 = vmul.f32 %v7735_v55, %v2717_v56  ;;  %v2783_v6 = vmul.f32 %v7735_v55, %v2718_v53 }
 0x2b6   : > { %v7814_v57 = vadd.f32 %v2781_v63, %v7500_v0  ;;  %v2784_v38 = vmul.f32 %v7735_v55, %v2719_v58 }
 0x2b7   : > { %v7818_v31 = vadd.f32 %v2782_v12, %v7504_v46  ;;  %v7821_v21 = vadd.f32 %v2783_v6, %v7507_v32 }
 0x2b8   : > { %v7824_v39 = vadd.f32 %v2784_v38, %v7510_v1 }
 0x2b9   : > { %v2623_v44 = vpop.f32.mrf.mxu2 }
 0x2ba   : > { %v2720_v60 = vmul.f32 %v2623_v44, %v2623_v44  ;;  %v2672_v56 = vpop.f32.mrf.mxu3  ;;  %v2528_v43 = vpop.f32.mrf.mxu0 }
 0x2bb   : > { %v2721_v53 = vmul.f32 %v2672_v56, %v2672_v56  ;;  %v2722_v36 = vmul.f32 %v2528_v43, %v2528_v43  ;;  %v2577_v63 = vpop.f32.mrf.mxu1 }
 0x2bc   : > { %v2785_v0 = vmul.f32 %v7735_v55, %v2720_v60  ;;  %v2723_v58 = vmul.f32 %v2577_v63, %v2577_v63 }
 0x2bd   : > { %v2786_v46 = vmul.f32 %v7735_v55, %v2721_v53  ;;  %v2787_v12 = vmul.f32 %v7735_v55, %v2722_v36  ;;  %5673 = vmatmul.msk.bf16.gmra.mxu0 %vm1071_vm0, %v6006_v52 }
 0x2be   : > { %v7832_v32 = vadd.f32 %v2785_v0, %v7518_v14  ;;  %v2788_v1 = vmul.f32 %v7735_v55, %v2723_v58  ;;  %5681 = vmatmul.msk.bf16.gmra.mxu1 %vm1071_vm0, %v6006_v52  ;;  %5689 = vmatmul.msk.bf16.gmra.mxu2 %vm1071_vm0, %v6006_v52 }
 0x2bf   : > { %v7838_v6 = vadd.f32 %v2786_v46, %v7524_v10  ;;  %v7841_v38 = vadd.f32 %v2787_v12, %v7527_v48  ;;  %5697 = vmatmul.msk.bf16.gmra.mxu3 %vm1071_vm0, %v6006_v52 }
 0x2c0   : > { %v7845_v36 = vadd.f32 %v2788_v1, %v7531_v47 }
 0x2c1   : > { %v2626_v44 = vpop.f32.mrf.mxu2 }
 0x2c2   : > { %v2724_v14 = vmul.f32 %v2626_v44, %v2626_v44  ;;  %v2675_v60 = vpop.f32.mrf.mxu3  ;;  %v2530_v56 = vpop.f32.mrf.mxu0 }
 0x2c3   : > { %v2725_v43 = vmul.f32 %v2675_v60, %v2675_v60  ;;  %v2726_v53 = vmul.f32 %v2530_v56, %v2530_v56  ;;  %v2579_v63 = vpop.f32.mrf.mxu1 }
 0x2c4   : > { %v2789_v0 = vmul.f32 %v7735_v55, %v2724_v14  ;;  %v2727_v10 = vmul.f32 %v2579_v63, %v2579_v63  ;;  %v6007_v14 = vld [vmem:[%s6644_s30 + $0x118] sm:$0xff] }
 0x2c5   : > { %v2790_v58 = vmul.f32 %v7735_v55, %v2725_v43  ;;  %v2791_v48 = vmul.f32 %v7735_v55, %v2726_v53 }
 0x2c6   : > { %v7851_v52 = vadd.f32 %v2789_v0, %v7537_v61  ;;  %v2792_v47 = vmul.f32 %v7735_v55, %v2727_v10 }
 0x2c7   : > { %v7855_v46 = vadd.f32 %v2790_v58, %v7541_v20  ;;  %v7858_v12 = vadd.f32 %v2791_v48, %v7544_v8 }
 0x2c8   : > { %v7861_v1 = vadd.f32 %v2792_v47, %v7547_v51 }
 0x2c9   : > { %v2628_v44 = vpop.f32.mrf.mxu2 }
 0x2ca   : > { %v2728_v60 = vmul.f32 %v2628_v44, %v2628_v44  ;;  %v2677_v56 = vpop.f32.mrf.mxu3  ;;  %v2533_v43 = vpop.f32.mrf.mxu0 }
 0x2cb   : > { %v2729_v53 = vmul.f32 %v2677_v56, %v2677_v56  ;;  %v2730_v63 = vmul.f32 %v2533_v43, %v2533_v43  ;;  %v2582_v61 = vpop.f32.mrf.mxu1 }
 0x2cc   : > { %v2793_v0 = vmul.f32 %v7735_v55, %v2728_v60  ;;  %v2731_v10 = vmul.f32 %v2582_v61, %v2582_v61 }
 0x2cd   : > { %v2794_v20 = vmul.f32 %v7735_v55, %v2729_v53  ;;  %v2795_v58 = vmul.f32 %v7735_v55, %v2730_v63  ;;  %5674 = vmatmul.msk.bf16.gmra.mxu0 %vm1071_vm0, %v6007_v14 }
 0x2ce   : > { %v7869_v8 = vadd.f32 %v2793_v0, %v7555_v28  ;;  %v2796_v51 = vmul.f32 %v7735_v55, %v2731_v10  ;;  %5682 = vmatmul.msk.bf16.gmra.mxu1 %vm1071_vm0, %v6007_v14  ;;  %5690 = vmatmul.msk.bf16.gmra.mxu2 %vm1071_vm0, %v6007_v14 }
 0x2cf   : > { %v7875_v48 = vadd.f32 %v2794_v20, %v7561_v17  ;;  %v7878_v47 = vadd.f32 %v2795_v58, %v7564_v29  ;;  %5698 = vmatmul.msk.bf16.gmra.mxu3 %vm1071_vm0, %v6007_v14  ;;  %v9529_v20 = vld [vmem:[#allocation15_spill] sm:$0xff] }
 0x2d0   : > { %v7882_v44 = vadd.f32 %v2796_v51, %v7568_v34  ;;  %v9531_v51 = vld [vmem:[#allocation14_spill] sm:$0xff] }
 0x2d1   : > { %9525 = vst [vmem:[#allocation41_spill] sm:$0xff] %v7875_v48  ;;  %v2631_v60 = vpop.f32.mrf.mxu2 }
 0x2d2   : > { %9526 = vst [vmem:[#allocation42_spill] sm:$0xff] %v7878_v47  ;;  %v2732_v28 = vmul.f32 %v2631_v60, %v2631_v60  ;;  %v2680_v56 = vpop.f32.mrf.mxu3  ;;  %v2535_v43 = vpop.f32.mrf.mxu0 }
 0x2d3   : > { %9527 = vst [vmem:[#allocation43_spill] sm:$0xff] %v7882_v44  ;;  %v2733_v53 = vmul.f32 %v2680_v56, %v2680_v56  ;;  %v2734_v63 = vmul.f32 %v2535_v43, %v2535_v43  ;;  %v2584_v61 = vpop.f32.mrf.mxu1  ;;  %v9533_v56 = vld [vmem:[#allocation16_spill] sm:$0xff] }
 0x2d4   : > { %v2797_v0 = vmul.f32 %v7735_v55, %v2732_v28  ;;  %v2735_v17 = vmul.f32 %v2584_v61, %v2584_v61  ;;  %v6008_v61 = vld [vmem:[%s6644_s30 + $0x120] sm:$0xff] }
 0x2d5   : > { %v2798_v10 = vmul.f32 %v7735_v55, %v2733_v53  ;;  %v2799_v29 = vmul.f32 %v7735_v55, %v2734_v63 }
 0x2d6   : > { %v7888_v14 = vadd.f32 %v2797_v0, %v7574_v2  ;;  %v2800_v34 = vmul.f32 %v7735_v55, %v2735_v17 }
 0x2d7   : > { %v7892_v58 = vadd.f32 %v2798_v10, %v9529_v20  ;;  %v7895_v60 = vadd.f32 %v2799_v29, %v9531_v51  ;;  %v9535_v29 = vld [vmem:[#allocation48_spill] sm:$0xff] }
 0x2d8   : > { %9528 = vst [vmem:[#allocation44_spill] sm:$0xff] %v7888_v14  ;;  %v7898_v43 = vadd.f32 %v2800_v34, %v9533_v56 }
 0x2d9   : > { %9530 = vst [vmem:[#allocation45_spill] sm:$0xff] %v7892_v58  ;;  %v2633_v28 = vpop.f32.mrf.mxu2 }
 0x2da   : > { %9532 = vst [vmem:[#allocation46_spill] sm:$0xff] %v7895_v60  ;;  %v2736_v44 = vmul.f32 %v2633_v28, %v2633_v28  ;;  %v2682_v53 = vpop.f32.mrf.mxu3  ;;  %v2538_v47 = vpop.f32.mrf.mxu0 }
 0x2db   : > { %9534 = vst [vmem:[#allocation47_spill] sm:$0xff] %v7898_v43  ;;  %v2737_v63 = vmul.f32 %v2682_v53, %v2682_v53  ;;  %v2738_v48 = vmul.f32 %v2538_v47, %v2538_v47  ;;  %v2587_v2 = vpop.f32.mrf.mxu1  ;;  %v9537_v47 = vld [vmem:[#allocation49_spill] sm:$0xff] }
 0x2dc   : > { %v2801_v0 = vmul.f32 %v7735_v55, %v2736_v44  ;;  %v2739_v17 = vmul.f32 %v2587_v2, %v2587_v2  ;;  %v9539_v44 = vld [vmem:[#allocation50_spill] sm:$0xff] }
 0x2dd   : > { %v2802_v10 = vmul.f32 %v7735_v55, %v2737_v63  ;;  %v2803_v20 = vmul.f32 %v7735_v55, %v2738_v48  ;;  %5675 = vmatmul.msk.bf16.gmra.mxu0 %vm1071_vm0, %v6008_v61  ;;  %v9541_v48 = vld [vmem:[#allocation51_spill] sm:$0xff] }
 0x2de   : > { %v7906_v34 = vadd.f32 %v2801_v0, %v9535_v29  ;;  %v2804_v51 = vmul.f32 %v7735_v55, %v2739_v17  ;;  %5683 = vmatmul.msk.bf16.gmra.mxu1 %vm1071_vm0, %v6008_v61  ;;  %5691 = vmatmul.msk.bf16.gmra.mxu2 %vm1071_vm0, %v6008_v61 }
 0x2df   : > { %v7912_v56 = vadd.f32 %v2802_v10, %v9537_v47  ;;  %v7915_v28 = vadd.f32 %v2803_v20, %v9539_v44  ;;  %5699 = vmatmul.msk.bf16.gmra.mxu3 %vm1071_vm0, %v6008_v61  ;;  %v9543_v44 = vld [vmem:[#allocation52_spill] sm:$0xff] }
 0x2e0   : > { %9536 = vst [vmem:[#allocation15_spill] sm:$0xff] %v7906_v34  ;;  %v7919_v53 = vadd.f32 %v2804_v51, %v9541_v48  ;;  %v9545_v48 = vld [vmem:[#allocation53_spill] sm:$0xff] }
 0x2e1   : > { %9538 = vst [vmem:[#allocation14_spill] sm:$0xff] %v7912_v56  ;;  %v2636_v63 = vpop.f32.mrf.mxu2 }
 0x2e2   : > { %9540 = vst [vmem:[#allocation16_spill] sm:$0xff] %v7915_v28  ;;  %v2740_v2 = vmul.f32 %v2636_v63, %v2636_v63  ;;  %v2685_v0 = vpop.f32.mrf.mxu3  ;;  %v2540_v17 = vpop.f32.mrf.mxu0 }
 0x2e3   : > { %9542 = vst [vmem:[#allocation48_spill] sm:$0xff] %v7919_v53  ;;  %v2741_v29 = vmul.f32 %v2685_v0, %v2685_v0  ;;  %v2742_v34 = vmul.f32 %v2540_v17, %v2540_v17  ;;  %v2589_v43 = vpop.f32.mrf.mxu1  ;;  %v9547_v53 = vld [vmem:[#allocation20_spill] sm:$0xff]  ;;  %v9549_v0 = vld [vmem:[#allocation21_spill] sm:$0xff] }
 0x2e4   : > { %v2805_v60 = vmul.f32 %v7735_v55, %v2740_v2  ;;  %v2743_v10 = vmul.f32 %v2589_v43, %v2589_v43  ;;  %v6009_v43 = vld [vmem:[%s6644_s30 + $0x128] sm:$0xff] }
 0x2e5   : > { %v2806_v47 = vmul.f32 %v7735_v55, %v2741_v29  ;;  %v2807_v20 = vmul.f32 %v7735_v55, %v2742_v34 }
 0x2e6   : > { %v7925_v61 = vadd.f32 %v2805_v60, %v9543_v44  ;;  %v2808_v51 = vmul.f32 %v7735_v55, %v2743_v10 }
 0x2e7   : > { %v7929_v63 = vadd.f32 %v2806_v47, %v9545_v48  ;;  %v7932_v28 = vadd.f32 %v2807_v20, %v9547_v53  ;;  %v9551_v53 = vld [vmem:[#allocation22_spill] sm:$0xff] }
 0x2e8   : > { %9544 = vst [vmem:[#allocation49_spill] sm:$0xff] %v7925_v61  ;;  %v7935_v17 = vadd.f32 %v2808_v51, %v9549_v0 }
 0x2e9   : > { %9546 = vst [vmem:[#allocation50_spill] sm:$0xff] %v7929_v63  ;;  %v2638_v2 = vpop.f32.mrf.mxu2 }
 0x2ea   : > { %9548 = vst [vmem:[#allocation51_spill] sm:$0xff] %v7932_v28  ;;  %v2744_v56 = vmul.f32 %v2638_v2, %v2638_v2  ;;  %v2687_v29 = vpop.f32.mrf.mxu3  ;;  %v2543_v58 = vpop.f32.mrf.mxu0 }
 0x2eb   : > { %9550 = vst [vmem:[#allocation52_spill] sm:$0xff] %v7935_v17  ;;  %v2745_v34 = vmul.f32 %v2687_v29, %v2687_v29  ;;  %v2746_v14 = vmul.f32 %v2543_v58, %v2543_v58  ;;  %v2592_v60 = vpop.f32.mrf.mxu1  ;;  %v9553_v58 = vld [vmem:[#allocation23_spill] sm:$0xff] }
 0x2ec   : > { %v2809_v44 = vmul.f32 %v7735_v55, %v2744_v56  ;;  %v2747_v10 = vmul.f32 %v2592_v60, %v2592_v60  ;;  %v9555_v56 = vld [vmem:[#allocation24_spill] sm:$0xff] }
 0x2ed   : > { %v2810_v47 = vmul.f32 %v7735_v55, %v2745_v34  ;;  %v2811_v48 = vmul.f32 %v7735_v55, %v2746_v14  ;;  %5676 = vmatmul.msk.bf16.gmra.mxu0 %vm1071_vm0, %v6009_v43  ;;  %v9557_v14 = vld [vmem:[#allocation25_spill] sm:$0xff] }
 0x2ee   : > { %v7943_v20 = vadd.f32 %v2809_v44, %v9551_v53  ;;  %v2812_v51 = vmul.f32 %v7735_v55, %v2747_v10  ;;  %5684 = vmatmul.msk.bf16.gmra.mxu1 %vm1071_vm0, %v6009_v43  ;;  %5692 = vmatmul.msk.bf16.gmra.mxu2 %vm1071_vm0, %v6009_v43 }
 0x2ef   : > { %v7949_v0 = vadd.f32 %v2810_v47, %v9553_v58  ;;  %v7952_v2 = vadd.f32 %v2811_v48, %v9555_v56  ;;  %5700 = vmatmul.msk.bf16.gmra.mxu3 %vm1071_vm0, %v6009_v43  ;;  %v9559_v56 = vld [vmem:[#allocation26_spill] sm:$0xff] }
 0x2f0   : > { %9552 = vst [vmem:[#allocation53_spill] sm:$0xff] %v7943_v20  ;;  %v7956_v29 = vadd.f32 %v2812_v51, %v9557_v14  ;;  %v9560_v14 = vld [vmem:[#allocation27_spill] sm:$0xff] }
 0x2f1   : > { %9554 = vst [vmem:[#allocation20_spill] sm:$0xff] %v7949_v0  ;;  %v2641_v34 = vpop.f32.mrf.mxu2 }
 0x2f2   : > { %9556 = vst [vmem:[#allocation21_spill] sm:$0xff] %v7952_v2  ;;  %v2748_v60 = vmul.f32 %v2641_v34, %v2641_v34  ;;  %v2690_v44 = vpop.f32.mrf.mxu3  ;;  %v2545_v10 = vpop.f32.mrf.mxu0 }
 0x2f3   : > { %9558 = vst [vmem:[#allocation22_spill] sm:$0xff] %v7956_v29  ;;  %v2749_v53 = vmul.f32 %v2690_v44, %v2690_v44  ;;  %v2750_v20 = vmul.f32 %v2545_v10, %v2545_v10  ;;  %v2594_v17 = vpop.f32.mrf.mxu1  ;;  %v9561_v29 = vld [vmem:[#allocation28_spill] sm:$0xff]  ;;  %v9563_v44 = vld [vmem:[#allocation29_spill] sm:$0xff] }
 0x2f4   : > { %v2813_v28 = vmul.f32 %v7735_v55, %v2748_v60  ;;  %v2751_v47 = vmul.f32 %v2594_v17, %v2594_v17  ;;  %v6010_v17 = vld [vmem:[%s6644_s30 + $0x130] sm:$0xff] }
 0x2f5   : > { %v2814_v58 = vmul.f32 %v7735_v55, %v2749_v53  ;;  %v2815_v48 = vmul.f32 %v7735_v55, %v2750_v20 }
 0x2f6   : > { %v7962_v43 = vadd.f32 %v2813_v28, %v9559_v56  ;;  %v2816_v51 = vmul.f32 %v7735_v55, %v2751_v47 }
 0x2f7   : > { %v7966_v34 = vadd.f32 %v2814_v58, %v9560_v14  ;;  %v7969_v2 = vadd.f32 %v2815_v48, %v9561_v29  ;;  %v9565_v29 = vld [vmem:[#allocation30_spill] sm:$0xff] }
 0x2f8   : > { %v7972_v10 = vadd.f32 %v2816_v51, %v9563_v44 }
 0x2f9   : > { %9562 = vst [vmem:[#allocation23_spill] sm:$0xff] %v7969_v2  ;;  %v2643_v60 = vpop.f32.mrf.mxu2 }
 0x2fa   : > { %9564 = vst [vmem:[#allocation24_spill] sm:$0xff] %v7972_v10  ;;  %v2752_v0 = vmul.f32 %v2643_v60, %v2643_v60  ;;  %v2692_v53 = vpop.f32.mrf.mxu3  ;;  %v2548_v63 = vpop.f32.mrf.mxu0 }
 0x2fb   : > { %v2753_v20 = vmul.f32 %v2692_v53, %v2692_v53  ;;  %v2754_v61 = vmul.f32 %v2548_v63, %v2548_v63  ;;  %v2597_v28 = vpop.f32.mrf.mxu1  ;;  %v9567_v63 = vld [vmem:[#allocation31_spill] sm:$0xff] }
 0x2fc   : > { %v2817_v56 = vmul.f32 %v7735_v55, %v2752_v0  ;;  %v2755_v47 = vmul.f32 %v2597_v28, %v2597_v28  ;;  %v9568_v0 = vld [vmem:[#allocation32_spill] sm:$0xff] }
 0x2fd   : > { %v2818_v58 = vmul.f32 %v7735_v55, %v2753_v20  ;;  %v2819_v14 = vmul.f32 %v7735_v55, %v2754_v61  ;;  %5677 = vmatmul.msk.bf16.gmra.mxu0 %vm1071_vm0, %v6010_v17  ;;  %v9570_v61 = vld [vmem:[#allocation33_spill] sm:$0xff] }
 0x2fe   : > { %v7980_v48 = vadd.f32 %v2817_v56, %v9565_v29  ;;  %v2820_v51 = vmul.f32 %v7735_v55, %v2755_v47  ;;  %5685 = vmatmul.msk.bf16.gmra.mxu1 %vm1071_vm0, %v6010_v17  ;;  %5693 = vmatmul.msk.bf16.gmra.mxu2 %vm1071_vm0, %v6010_v17 }
 0x2ff   : > { %v7986_v44 = vadd.f32 %v2818_v58, %v9567_v63  ;;  %v7989_v60 = vadd.f32 %v2819_v14, %v9568_v0  ;;  %5701 = vmatmul.msk.bf16.gmra.mxu3 %vm1071_vm0, %v6010_v17 }
 0x300   : > { %9566 = vst [vmem:[#allocation25_spill] sm:$0xff] %v7980_v48  ;;  %v7993_v53 = vadd.f32 %v2820_v51, %v9570_v61 }
 0x301   : > { %9569 = vst [vmem:[#allocation26_spill] sm:$0xff] %v7989_v60  ;;  %v2646_v20 = vpop.f32.mrf.mxu2 }
 0x302   : > { %9571 = vst [vmem:[#allocation27_spill] sm:$0xff] %v7993_v53  ;;  %v2756_v28 = vmul.f32 %v2646_v20, %v2646_v20  ;;  %v2695_v56 = vpop.f32.mrf.mxu3  ;;  %v2550_v47 = vpop.f32.mrf.mxu0  ;;  %v9572_v20 = vld [vmem:[#allocation34_spill] sm:$0xff] }
 0x303   : > { %v2757_v29 = vmul.f32 %v2695_v56, %v2695_v56  ;;  %v2758_v48 = vmul.f32 %v2550_v47, %v2550_v47  ;;  %v2599_v10 = vpop.f32.mrf.mxu1 }
 0x304   : > { %v2821_v2 = vmul.f32 %v7735_v55, %v2756_v28  ;;  %v2759_v58 = vmul.f32 %v2599_v10, %v2599_v10  ;;  %v6011_v10 = vld [vmem:[%s6644_s30 + $0x138] sm:$0xff] }
 0x305   : > { %v2822_v63 = vmul.f32 %v7735_v55, %v2757_v29  ;;  %v2823_v14 = vmul.f32 %v7735_v55, %v2758_v48 }
 0x306   : > { %v7999_v17 = vadd.f32 %v2821_v2, %v7685_v35  ;;  %v2824_v51 = vmul.f32 %v7735_v55, %v2759_v58 }
 0x307   : > { %v8003_v0 = vadd.f32 %v2822_v63, %v7689_v18  ;;  %v8006_v61 = vadd.f32 %v2823_v14, %v7692_v9  ;;  %v9573_v9 = vld [vmem:[#allocation35_spill] sm:$0xff] }
 0x308   : > { %v8009_v56 = vadd.f32 %v2824_v51, %v9572_v20  ;;  %v9575_v20 = vld [vmem:[#allocation36_spill] sm:$0xff] }
 0x309   : > { %v2648_v28 = vpop.f32.mrf.mxu2 }
 0x30a   : > { %v2760_v47 = vmul.f32 %v2648_v28, %v2648_v28  ;;  %v2697_v29 = vpop.f32.mrf.mxu3  ;;  %v2553_v53 = vpop.f32.mrf.mxu0 }
 0x30b   : > { %v2761_v48 = vmul.f32 %v2697_v29, %v2697_v29  ;;  %v2762_v60 = vmul.f32 %v2553_v53, %v2553_v53  ;;  %v2602_v35 = vpop.f32.mrf.mxu1 }
 0x30c   : > { %v2825_v2 = vmul.f32 %v7735_v55, %v2760_v47  ;;  %v2763_v58 = vmul.f32 %v2602_v35, %v2602_v35 }
 0x30d   : > { %v2826_v18 = vmul.f32 %v7735_v55, %v2761_v48  ;;  %v2827_v63 = vmul.f32 %v7735_v55, %v2762_v60  ;;  %5678 = vmatmul.msk.bf16.gmra.mxu0 %vm1071_vm0, %v6011_v10  ;;  %v9577_v60 = vld [vmem:[#allocation37_spill] sm:$0xff] }
 0x30e   : > { %v8017_v14 = vadd.f32 %v2825_v2, %v9573_v9  ;;  %v2828_v51 = vmul.f32 %v7735_v55, %v2763_v58  ;;  %5686 = vmatmul.msk.bf16.gmra.mxu1 %vm1071_vm0, %v6011_v10  ;;  %5694 = vmatmul.msk.bf16.gmra.mxu2 %vm1071_vm0, %v6011_v10 }
 0x30f   : > { %v8023_v53 = vadd.f32 %v2826_v18, %v7709_v11  ;;  %v8026_v28 = vadd.f32 %v2827_v63, %v9575_v20  ;;  %5702 = vmatmul.msk.bf16.gmra.mxu3 %vm1071_vm0, %v6011_v10  ;;  %v9579_v10 = vld [vmem:[#allocation38_spill] sm:$0xff] }
 0x310   : > { %9574 = vst [vmem:[#allocation28_spill] sm:$0xff] %v8017_v14  ;;  %v8030_v47 = vadd.f32 %v2828_v51, %v9577_v60 }
 0x311   : > { %9576 = vst [vmem:[#allocation29_spill] sm:$0xff] %v8026_v28  ;;  %v2651_v29 = vpop.f32.mrf.mxu2 }
 0x312   : > { %9578 = vst [vmem:[#allocation30_spill] sm:$0xff] %v8030_v47  ;;  %v2764_v48 = vmul.f32 %v2651_v29, %v2651_v29  ;;  %v2700_v35 = vpop.f32.mrf.mxu3  ;;  %v2555_v2 = vpop.f32.mrf.mxu0 }
 0x313   : > { %v2765_v58 = vmul.f32 %v2700_v35, %v2700_v35  ;;  %v2766_v9 = vmul.f32 %v2555_v2, %v2555_v2  ;;  %v2604_v14 = vpop.f32.mrf.mxu1 }
 0x314   : > { %v2829_v11 = vmul.f32 %v7735_v55, %v2764_v48  ;;  %v2767_v18 = vmul.f32 %v2604_v14, %v2604_v14  ;;  %v6012_v14 = vld [vmem:[%s6644_s30 + $0x140] sm:$0xff] }
 0x315   : > { %v2830_v63 = vmul.f32 %v7735_v55, %v2765_v58  ;;  %v2831_v20 = vmul.f32 %v7735_v55, %v2766_v9  ;;  %v8049_v9 = vstv %s5703_s17  ;;  %s5248_s17 = sshll.u32 %s900_s5, 9 }
 0x316   : > { %v8036_v28 = vadd.f32 %v2829_v11, %v9579_v10  ;;  %v2832_v51 = vmul.f32 %v7735_v55, %v2767_v18 }
 0x317   : > { %v8040_v60 = vadd.f32 %v2830_v63, %v7726_v27  ;;  %v8043_v29 = vadd.f32 %v2831_v20, %v7729_v16 }
 0x318   : > { %9580 = vst [vmem:[#allocation31_spill] sm:$0xff] %v8036_v28  ;;  %v8046_v35 = vadd.f32 %v2832_v51, %v7732_v13 }
 0x319   : > { %v2653_v48 = vpop.f32.mrf.mxu2 }
 0x31a   : > { %v2768_v2 = vmul.f32 %v2653_v48, %v2653_v48  ;;  %v2702_v58 = vpop.f32.mrf.mxu3  ;;  %v2989_v47 = vpop.f32.mrf.mxu0 }
 0x31b   : > { %v2769_v11 = vmul.f32 %v2702_v58, %v2702_v58  ;;  %v3177_v10 = vmul.f32 %v2989_v47, %v2989_v47  ;;  %v3038_v28 = vpop.f32.mrf.mxu1 }
 0x31c   : > { %v2833_v18 = vmul.f32 %v7735_v55, %v2768_v2  ;;  %v3178_v27 = vmul.f32 %v3038_v28, %v3038_v28 }
 0x31d   : > { %v2834_v63 = vmul.f32 %v7735_v55, %v2769_v11  ;;  %v3242_v16 = vmul.f32 %v8049_v9, %v3177_v10  ;;  %5752 = vmatmul.msk.bf16.vlgmr.msrb.gmra.mxu0 %vm1071_vm0, %v6012_v14 }
 0x31e   : > { %v8056_v13 = vadd.f32 %v2833_v18, %v7742_v3  ;;  %v3243_v20 = vmul.f32 %v8049_v9, %v3178_v27  ;;  %5760 = vmatmul.msk.bf16.vlgmr.msrb.gmra.mxu1 %vm1071_vm0, %v6012_v14  ;;  %5768 = vmatmul.msk.bf16.vlgmr.msrb.gmra.mxu2 %vm1071_vm0, %v6012_v14 }
 0x31f   : > { %v8062_v47 = vadd.f32 %v2834_v63, %v7748_v5  ;;  %v8065_v28 = vadd.f32 %v3242_v16, %v7751_v19  ;;  %5776 = vmatmul.msk.bf16.vlgmr.msrb.gmra.mxu3 %vm1071_vm0, %v6012_v14  ;;  %4495 = vmatpush.bf16.msrb.mxu2 %v6658_v24  ;;  %v9581_v63 = vld [vmem:[#allocation19_spill] sm:$0xff] }
 0x320   : > { %v8070_v55 = vadd.f32 %v3243_v20, %v7756_v26  ;;  %4544 = vmatpush.bf16.msrb.mxu3 %v9453_v42  ;;  %4397 = vmatpush.bf16.msrb.mxu0 %v9454_v30  ;;  %v9584_v20 = vld [vmem:[#allocation39_spill] sm:$0xff] }
 0x321   : > { %v3087_v3 = vpop.f32.mrf.mxu2  ;;  %4446 = vmatpush.bf16.msrb.mxu1 %v6656_v23 }
 0x322   : > { %v3179_v51 = vmul.f32 %v3087_v3, %v3087_v3  ;;  %v3136_v5 = vpop.f32.mrf.mxu3  ;;  %v2991_v48 = vpop.f32.mrf.mxu0 }
 0x323   : > { %v3180_v2 = vmul.f32 %v3136_v5, %v3136_v5  ;;  %v3181_v19 = vmul.f32 %v2991_v48, %v2991_v48  ;;  %v3040_v58 = vpop.f32.mrf.mxu1  ;;  %4496 = vmatpush.bf16.msrb.mxu2 %v6679_v37  ;;  %v9585_v48 = vld [vmem:[#allocation40_spill] sm:$0xff] }
 0x324   : > { %v3244_v24 = vmul.f32 %v8049_v9, %v3179_v51  ;;  %v3182_v26 = vmul.f32 %v3040_v58, %v3040_v58  ;;  %4545 = vmatpush.bf16.msrb.mxu3 %v6684_v41  ;;  %4398 = vmatpush.bf16.msrb.mxu0 %v9455_v59  ;;  %v6013_v59 = vld [vmem:[%s6644_s30 + $0x148] sm:$0xff] }
 0x325   : > { %v3245_v42 = vmul.f32 %v8049_v9, %v3180_v2  ;;  %v3246_v23 = vmul.f32 %v8049_v9, %v3181_v19  ;;  %4447 = vmatpush.bf16.msrb.mxu1 %v6673_v33 }
 0x326   : > { %v8083_v30 = vadd.f32 %v3244_v24, %v7769_v25  ;;  %v3247_v14 = vmul.f32 %v8049_v9, %v3182_v26 }
 0x327   : > { %v8087_v37 = vadd.f32 %v3245_v42, %v7773_v22  ;;  %v8090_v11 = vadd.f32 %v3246_v23, %v7776_v7  ;;  %4497 = vmatpush.bf16.msrb.mxu2 %v6699_v50 }
 0x328   : > { %v8094_v41 = vadd.f32 %v3247_v14, %v7780_v15  ;;  %4546 = vmatpush.bf16.msrb.mxu3 %v6705_v54  ;;  %4399 = vmatpush.bf16.msrb.mxu0 %v6690_v45  ;;  %v9582_v54 = vld [vmem:[#allocation17_spill] sm:$0xff] }
 0x329   : > { %v3089_v33 = vpop.f32.mrf.mxu2  ;;  %4448 = vmatpush.bf16.msrb.mxu1 %v6697_v49  ;;  %v9583_v49 = vld [vmem:[#allocation18_spill] sm:$0xff] }
 0x32a   : > { %v3183_v25 = vmul.f32 %v3089_v33, %v3089_v33  ;;  %v3138_v10 = vpop.f32.mrf.mxu3  ;;  %v2994_v22 = vpop.f32.mrf.mxu0 }
 0x32b   : > { %v3184_v18 = vmul.f32 %v3138_v10, %v3138_v10  ;;  %v3185_v27 = vmul.f32 %v2994_v22, %v2994_v22  ;;  %v3043_v7 = vpop.f32.mrf.mxu1  ;;  %4498 = vmatpush.bf16.msrb.mxu2 %v6719_v62 }
 0x32c   : > { %v3248_v50 = vmul.f32 %v8049_v9, %v3183_v25  ;;  %v3186_v15 = vmul.f32 %v3043_v7, %v3043_v7  ;;  %4547 = vmatpush.bf16.msrb.mxu3 %v9581_v63  ;;  %4400 = vmatpush.bf16.msrb.mxu0 %v9582_v54 }
 0x32d   : > { %v3249_v45 = vmul.f32 %v8049_v9, %v3184_v18  ;;  %v3250_v16 = vmul.f32 %v8049_v9, %v3185_v27  ;;  %5753 = vmatmul.msk.bf16.gmra.mxu0 %vm1071_vm0, %v6013_v59  ;;  %4449 = vmatpush.bf16.msrb.mxu1 %v9583_v49 }
 0x32e   : > { %v8109_v3 = vadd.f32 %v3248_v50, %v9584_v20  ;;  %v3251_v62 = vmul.f32 %v8049_v9, %v3186_v15  ;;  %5761 = vmatmul.msk.bf16.gmra.mxu1 %vm1071_vm0, %v6013_v59  ;;  %5769 = vmatmul.msk.bf16.gmra.mxu2 %vm1071_vm0, %v6013_v59  ;;  %v6014_v50 = vld [vmem:[%s6644_s30 + $0x150] sm:$0xff] }
 0x32f   : > { %v8115_v51 = vadd.f32 %v3249_v45, %v7801_v40  ;;  %v8118_v5 = vadd.f32 %v3250_v16, %v7804_v4  ;;  %5777 = vmatmul.msk.bf16.gmra.mxu3 %vm1071_vm0, %v6013_v59 }
 0x330   : > { %v8122_v2 = vadd.f32 %v3251_v62, %v9585_v48 }
 0x331   : > { %v3092_v19 = vpop.f32.mrf.mxu2 }
 0x332   : > { %v3187_v58 = vmul.f32 %v3092_v19, %v3092_v19  ;;  %v3141_v24 = vpop.f32.mrf.mxu3  ;;  %v2996_v26 = vpop.f32.mrf.mxu0 }
 0x333   : > { %v3188_v42 = vmul.f32 %v3141_v24, %v3141_v24  ;;  %v3189_v23 = vmul.f32 %v2996_v26, %v2996_v26  ;;  %v3045_v14 = vpop.f32.mrf.mxu1 }
 0x334   : > { %v3252_v33 = vmul.f32 %v8049_v9, %v3187_v58  ;;  %v3190_v40 = vmul.f32 %v3045_v14, %v3045_v14 }
 0x335   : > { %v3253_v25 = vmul.f32 %v8049_v9, %v3188_v42  ;;  %v3254_v4 = vmul.f32 %v8049_v9, %v3189_v23 }
 0x336   : > { %v8128_v59 = vadd.f32 %v3252_v33, %v7814_v57  ;;  %v3255_v10 = vmul.f32 %v8049_v9, %v3190_v40 }
 0x337   : > { %v8132_v22 = vadd.f32 %v3253_v25, %v7818_v31  ;;  %v8135_v18 = vadd.f32 %v3254_v4, %v7821_v21 }
 0x338   : > { %v8138_v27 = vadd.f32 %v3255_v10, %v7824_v39 }
 0x339   : > { %v3094_v7 = vpop.f32.mrf.mxu2 }
 0x33a   : > { %v3191_v15 = vmul.f32 %v3094_v7, %v3094_v7  ;;  %v3143_v63 = vpop.f32.mrf.mxu3  ;;  %v2999_v54 = vpop.f32.mrf.mxu0 }
 0x33b   : > { %v3192_v45 = vmul.f32 %v3143_v63, %v3143_v63  ;;  %v3193_v16 = vmul.f32 %v2999_v54, %v2999_v54  ;;  %v3048_v57 = vpop.f32.mrf.mxu1  ;;  %v6015_v63 = vld [vmem:[%s6644_s30 + $0x158] sm:$0xff] }
 0x33c   : > { %v3256_v49 = vmul.f32 %v8049_v9, %v3191_v15  ;;  %v3194_v20 = vmul.f32 %v3048_v57, %v3048_v57 }
 0x33d   : > { %v3257_v31 = vmul.f32 %v8049_v9, %v3192_v45  ;;  %v3258_v62 = vmul.f32 %v8049_v9, %v3193_v16  ;;  %5754 = vmatmul.msk.bf16.gmra.mxu0 %vm1071_vm0, %v6014_v50 }
 0x33e   : > { %v8146_v21 = vadd.f32 %v3256_v49, %v7832_v32  ;;  %v3259_v39 = vmul.f32 %v8049_v9, %v3194_v20  ;;  %5762 = vmatmul.msk.bf16.gmra.mxu1 %vm1071_vm0, %v6014_v50  ;;  %5770 = vmatmul.msk.bf16.gmra.mxu2 %vm1071_vm0, %v6014_v50 }
 0x33f   : > { %v8152_v48 = vadd.f32 %v3257_v31, %v7838_v6  ;;  %v8155_v19 = vadd.f32 %v3258_v62, %v7841_v38  ;;  %5778 = vmatmul.msk.bf16.gmra.mxu3 %vm1071_vm0, %v6014_v50 }
 0x340   : > { %v8159_v58 = vadd.f32 %v3259_v39, %v7845_v36  ;;  %v9586_v39 = vld [vmem:[#allocation41_spill] sm:$0xff] }
 0x341   : > { %v3097_v24 = vpop.f32.mrf.mxu2 }
 0x342   : > { %v3195_v32 = vmul.f32 %v3097_v24, %v3097_v24  ;;  %v3146_v26 = vpop.f32.mrf.mxu3  ;;  %v3001_v42 = vpop.f32.mrf.mxu0 }
 0x343   : > { %v3196_v23 = vmul.f32 %v3146_v26, %v3146_v26  ;;  %v3197_v14 = vmul.f32 %v3001_v42, %v3001_v42  ;;  %v3050_v33 = vpop.f32.mrf.mxu1  ;;  %v9588_v42 = vld [vmem:[#allocation43_spill] sm:$0xff] }
 0x344   : > { %v3260_v40 = vmul.f32 %v8049_v9, %v3195_v32  ;;  %v3198_v6 = vmul.f32 %v3050_v33, %v3050_v33  ;;  %v9587_v32 = vld [vmem:[#allocation42_spill] sm:$0xff] }
 0x345   : > { %v3261_v25 = vmul.f32 %v8049_v9, %v3196_v23  ;;  %v3262_v38 = vmul.f32 %v8049_v9, %v3197_v14 }
 0x346   : > { %v8165_v4 = vadd.f32 %v3260_v40, %v7851_v52  ;;  %v3263_v36 = vmul.f32 %v8049_v9, %v3198_v6 }
 0x347   : > { %v8169_v10 = vadd.f32 %v3261_v25, %v7855_v46  ;;  %v8172_v7 = vadd.f32 %v3262_v38, %v7858_v12 }
 0x348   : > { %v8175_v50 = vadd.f32 %v3263_v36, %v7861_v1 }
 0x349   : > { %v3099_v15 = vpop.f32.mrf.mxu2 }
 0x34a   : > { %v3199_v54 = vmul.f32 %v3099_v15, %v3099_v15  ;;  %v3148_v45 = vpop.f32.mrf.mxu3  ;;  %v3004_v16 = vpop.f32.mrf.mxu0 }
 0x34b   : > { %v3200_v57 = vmul.f32 %v3148_v45, %v3148_v45  ;;  %v3201_v49 = vmul.f32 %v3004_v16, %v3004_v16  ;;  %v3053_v52 = vpop.f32.mrf.mxu1  ;;  %v9589_v16 = vld [vmem:[#allocation44_spill] sm:$0xff] }
 0x34c   : > { %v3264_v20 = vmul.f32 %v8049_v9, %v3199_v54  ;;  %v3202_v31 = vmul.f32 %v3053_v52, %v3053_v52 }
 0x34d   : > { %v3265_v46 = vmul.f32 %v8049_v9, %v3200_v57  ;;  %v3266_v62 = vmul.f32 %v8049_v9, %v3201_v49  ;;  %5755 = vmatmul.msk.bf16.gmra.mxu0 %vm1071_vm0, %v6015_v63  ;;  %v9590_v49 = vld [vmem:[#allocation45_spill] sm:$0xff] }
 0x34e   : > { %v8183_v12 = vadd.f32 %v3264_v20, %v7869_v8  ;;  %v3267_v1 = vmul.f32 %v8049_v9, %v3202_v31  ;;  %5763 = vmatmul.msk.bf16.gmra.mxu1 %vm1071_vm0, %v6015_v63  ;;  %5771 = vmatmul.msk.bf16.gmra.mxu2 %vm1071_vm0, %v6015_v63  ;;  %v9591_v20 = vld [vmem:[#allocation46_spill] sm:$0xff] }
 0x34f   : > { %v8189_v24 = vadd.f32 %v3265_v46, %v9586_v39  ;;  %v8192_v26 = vadd.f32 %v3266_v62, %v9587_v32  ;;  %5779 = vmatmul.msk.bf16.gmra.mxu3 %vm1071_vm0, %v6015_v63  ;;  %v9592_v46 = vld [vmem:[#allocation47_spill] sm:$0xff]  ;;  %v6016_v39 = vld [vmem:[%s6644_s30 + $0x160] sm:$0xff] }
 0x350   : > { %v8196_v23 = vadd.f32 %v3267_v1, %v9588_v42 }
 0x351   : > { %v3102_v14 = vpop.f32.mrf.mxu2 }
 0x352   : > { %v3203_v8 = vmul.f32 %v3102_v14, %v3102_v14  ;;  %v3151_v33 = vpop.f32.mrf.mxu3  ;;  %v3006_v40 = vpop.f32.mrf.mxu0 }
 0x353   : > { %v3204_v6 = vmul.f32 %v3151_v33, %v3151_v33  ;;  %v3205_v25 = vmul.f32 %v3006_v40, %v3006_v40  ;;  %v3055_v38 = vpop.f32.mrf.mxu1 }
 0x354   : > { %v3268_v36 = vmul.f32 %v8049_v9, %v3203_v8  ;;  %v3206_v15 = vmul.f32 %v3055_v38, %v3055_v38 }
 0x355   : > { %v3269_v54 = vmul.f32 %v8049_v9, %v3204_v6  ;;  %v3270_v45 = vmul.f32 %v8049_v9, %v3205_v25 }
 0x356   : > { %v8202_v63 = vadd.f32 %v3268_v36, %v9589_v16  ;;  %v3271_v57 = vmul.f32 %v8049_v9, %v3206_v15  ;;  %v9593_v15 = vld [vmem:[#allocation15_spill] sm:$0xff]  ;;  %v9595_v16 = vld [vmem:[#allocation14_spill] sm:$0xff] }
 0x357   : > { %v8206_v52 = vadd.f32 %v3269_v54, %v9590_v49  ;;  %v8209_v31 = vadd.f32 %v3270_v45, %v9591_v20  ;;  %v9597_v49 = vld [vmem:[#allocation16_spill] sm:$0xff] }
 0x358   : > { %v8212_v62 = vadd.f32 %v3271_v57, %v9592_v46  ;;  %v9599_v46 = vld [vmem:[#allocation48_spill] sm:$0xff] }
 0x359   : > { %v3104_v1 = vpop.f32.mrf.mxu2 }
 0x35a   : > { %v3207_v32 = vmul.f32 %v3104_v1, %v3104_v1  ;;  %v3153_v42 = vpop.f32.mrf.mxu3  ;;  %v3009_v14 = vpop.f32.mrf.mxu0 }
 0x35b   : > { %v3208_v8 = vmul.f32 %v3153_v42, %v3153_v42  ;;  %v3209_v33 = vmul.f32 %v3009_v14, %v3009_v14  ;;  %v3058_v40 = vpop.f32.mrf.mxu1 }
 0x35c   : > { %v3272_v6 = vmul.f32 %v8049_v9, %v3207_v32  ;;  %v3210_v25 = vmul.f32 %v3058_v40, %v3058_v40 }
 0x35d   : > { %v3273_v38 = vmul.f32 %v8049_v9, %v3208_v8  ;;  %v3274_v36 = vmul.f32 %v8049_v9, %v3209_v33  ;;  %5756 = vmatmul.msk.bf16.gmra.mxu0 %vm1071_vm0, %v6016_v39 }
 0x35e   : > { %v8220_v54 = vadd.f32 %v3272_v6, %v9593_v15  ;;  %v3275_v45 = vmul.f32 %v8049_v9, %v3210_v25  ;;  %5764 = vmatmul.msk.bf16.gmra.mxu1 %vm1071_vm0, %v6016_v39  ;;  %5772 = vmatmul.msk.bf16.gmra.mxu2 %vm1071_vm0, %v6016_v39 }
 0x35f   : > { %v8226_v57 = vadd.f32 %v3273_v38, %v9595_v16  ;;  %v8229_v20 = vadd.f32 %v3274_v36, %v9597_v49  ;;  %5780 = vmatmul.msk.bf16.gmra.mxu3 %vm1071_vm0, %v6016_v39  ;;  %v9601_v16 = vld [vmem:[#allocation49_spill] sm:$0xff]  ;;  %v9602_v49 = vld [vmem:[#allocation50_spill] sm:$0xff] }
 0x360   : > { %9594 = vst [vmem:[#allocation32_spill] sm:$0xff] %v8220_v54  ;;  %v8233_v1 = vadd.f32 %v3275_v45, %v9599_v46 }
 0x361   : > { %9596 = vst [vmem:[#allocation33_spill] sm:$0xff] %v8226_v57  ;;  %v3107_v32 = vpop.f32.mrf.mxu2 }
 0x362   : > { %9598 = vst [vmem:[#allocation34_spill] sm:$0xff] %v8229_v20  ;;  %v3211_v42 = vmul.f32 %v3107_v32, %v3107_v32  ;;  %v3156_v14 = vpop.f32.mrf.mxu3  ;;  %v3011_v8 = vpop.f32.mrf.mxu0  ;;  %v9603_v32 = vld [vmem:[#allocation51_spill] sm:$0xff] }
 0x363   : > { %9600 = vst [vmem:[#allocation35_spill] sm:$0xff] %v8233_v1  ;;  %v3212_v33 = vmul.f32 %v3156_v14, %v3156_v14  ;;  %v3213_v40 = vmul.f32 %v3011_v8, %v3011_v8  ;;  %v3060_v6 = vpop.f32.mrf.mxu1  ;;  %v9605_v14 = vld [vmem:[#allocation52_spill] sm:$0xff] }
 0x364   : > { %v3276_v25 = vmul.f32 %v8049_v9, %v3211_v42  ;;  %v3214_v38 = vmul.f32 %v3060_v6, %v3060_v6  ;;  %v6017_v6 = vld [vmem:[%s6644_s30 + $0x168] sm:$0xff] }
 0x365   : > { %v3277_v15 = vmul.f32 %v8049_v9, %v3212_v33  ;;  %v3278_v36 = vmul.f32 %v8049_v9, %v3213_v40 }
 0x366   : > { %v8239_v39 = vadd.f32 %v3276_v25, %v9601_v16  ;;  %v3279_v45 = vmul.f32 %v8049_v9, %v3214_v38 }
 0x367   : > { %v8243_v46 = vadd.f32 %v3277_v15, %v9602_v49  ;;  %v8246_v1 = vadd.f32 %v3278_v36, %v9603_v32  ;;  %v9607_v36 = vld [vmem:[#allocation53_spill] sm:$0xff] }
 0x368   : > { %v8249_v8 = vadd.f32 %v3279_v45, %v9605_v14 }
 0x369   : > { %9604 = vst [vmem:[#allocation36_spill] sm:$0xff] %v8246_v1  ;;  %v3109_v42 = vpop.f32.mrf.mxu2 }
 0x36a   : > { %9606 = vst [vmem:[#allocation37_spill] sm:$0xff] %v8249_v8  ;;  %v3215_v20 = vmul.f32 %v3109_v42, %v3109_v42  ;;  %v3158_v33 = vpop.f32.mrf.mxu3  ;;  %v3014_v57 = vpop.f32.mrf.mxu0 }
 0x36b   : > { %v3216_v40 = vmul.f32 %v3158_v33, %v3158_v33  ;;  %v3217_v54 = vmul.f32 %v3014_v57, %v3014_v57  ;;  %v3063_v25 = vpop.f32.mrf.mxu1  ;;  %v9609_v57 = vld [vmem:[#allocation20_spill] sm:$0xff] }
 0x36c   : > { %v3280_v16 = vmul.f32 %v8049_v9, %v3215_v20  ;;  %v3218_v38 = vmul.f32 %v3063_v25, %v3063_v25  ;;  %v9611_v20 = vld [vmem:[#allocation21_spill] sm:$0xff] }
 0x36d   : > { %v3281_v15 = vmul.f32 %v8049_v9, %v3216_v40  ;;  %v3282_v49 = vmul.f32 %v8049_v9, %v3217_v54  ;;  %5757 = vmatmul.msk.bf16.gmra.mxu0 %vm1071_vm0, %v6017_v6  ;;  %v9613_v54 = vld [vmem:[#allocation22_spill] sm:$0xff] }
 0x36e   : > { %v8257_v45 = vadd.f32 %v3280_v16, %v9607_v36  ;;  %v3283_v32 = vmul.f32 %v8049_v9, %v3218_v38  ;;  %5765 = vmatmul.msk.bf16.gmra.mxu1 %vm1071_vm0, %v6017_v6  ;;  %5773 = vmatmul.msk.bf16.gmra.mxu2 %vm1071_vm0, %v6017_v6 }
 0x36f   : > { %v8263_v14 = vadd.f32 %v3281_v15, %v9609_v57  ;;  %v8266_v42 = vadd.f32 %v3282_v49, %v9611_v20  ;;  %5781 = vmatmul.msk.bf16.gmra.mxu3 %vm1071_vm0, %v6017_v6 }
 0x370   : > { %9608 = vst [vmem:[#allocation38_spill] sm:$0xff] %v8257_v45  ;;  %v8270_v33 = vadd.f32 %v3283_v32, %v9613_v54  ;;  %v9615_v54 = vld [vmem:[#allocation23_spill] sm:$0xff] }
 0x371   : > { %9610 = vst [vmem:[#allocation19_spill] sm:$0xff] %v8263_v14  ;;  %v3112_v40 = vpop.f32.mrf.mxu2 }
 0x372   : > { %9612 = vst [vmem:[#allocation17_spill] sm:$0xff] %v8266_v42  ;;  %v3219_v25 = vmul.f32 %v3112_v40, %v3112_v40  ;;  %v3161_v16 = vpop.f32.mrf.mxu3  ;;  %v3016_v38 = vpop.f32.mrf.mxu0 }
 0x373   : > { %9614 = vst [vmem:[#allocation18_spill] sm:$0xff] %v8270_v33  ;;  %v3220_v36 = vmul.f32 %v3161_v16, %v3161_v16  ;;  %v3221_v45 = vmul.f32 %v3016_v38, %v3016_v38  ;;  %v3065_v8 = vpop.f32.mrf.mxu1  ;;  %v9616_v16 = vld [vmem:[#allocation24_spill] sm:$0xff] }
 0x374   : > { %v3284_v1 = vmul.f32 %v8049_v9, %v3219_v25  ;;  %v3222_v15 = vmul.f32 %v3065_v8, %v3065_v8  ;;  %v6018_v8 = vld [vmem:[%s6644_s30 + $0x170] sm:$0xff] }
 0x375   : > { %v3285_v57 = vmul.f32 %v8049_v9, %v3220_v36  ;;  %v3286_v49 = vmul.f32 %v8049_v9, %v3221_v45 }
 0x376   : > { %v8276_v6 = vadd.f32 %v3284_v1, %v7962_v43  ;;  %v3287_v32 = vmul.f32 %v8049_v9, %v3222_v15 }
 0x377   : > { %v8280_v20 = vadd.f32 %v3285_v57, %v7966_v34  ;;  %v8283_v40 = vadd.f32 %v3286_v49, %v9615_v54  ;;  %v9618_v49 = vld [vmem:[#allocation25_spill] sm:$0xff] }
 0x378   : > { %v8286_v38 = vadd.f32 %v3287_v32, %v9616_v16 }
 0x379   : > { %v3114_v25 = vpop.f32.mrf.mxu2 }
 0x37a   : > { %9617 = vst [vmem:[#allocation39_spill] sm:$0xff] %v8286_v38  ;;  %v3223_v33 = vmul.f32 %v3114_v25, %v3114_v25  ;;  %v3163_v36 = vpop.f32.mrf.mxu3  ;;  %v3019_v42 = vpop.f32.mrf.mxu0 }
 0x37b   : > { %v3224_v45 = vmul.f32 %v3163_v36, %v3163_v36  ;;  %v3225_v14 = vmul.f32 %v3019_v42, %v3019_v42  ;;  %v3068_v43 = vpop.f32.mrf.mxu1 }
 0x37c   : > { %v3288_v1 = vmul.f32 %v8049_v9, %v3223_v33  ;;  %v3226_v15 = vmul.f32 %v3068_v43, %v3068_v43  ;;  %v9620_v33 = vld [vmem:[#allocation26_spill] sm:$0xff] }
 0x37d   : > { %v3289_v34 = vmul.f32 %v8049_v9, %v3224_v45  ;;  %v3290_v57 = vmul.f32 %v8049_v9, %v3225_v14  ;;  %5758 = vmatmul.msk.bf16.gmra.mxu0 %vm1071_vm0, %v6018_v8  ;;  %v9621_v14 = vld [vmem:[#allocation27_spill] sm:$0xff] }
 0x37e   : > { %v8294_v32 = vadd.f32 %v3288_v1, %v9618_v49  ;;  %v3291_v54 = vmul.f32 %v8049_v9, %v3226_v15  ;;  %5766 = vmatmul.msk.bf16.gmra.mxu1 %vm1071_vm0, %v6018_v8  ;;  %5774 = vmatmul.msk.bf16.gmra.mxu2 %vm1071_vm0, %v6018_v8 }
 0x37f   : > { %v8300_v42 = vadd.f32 %v3289_v34, %v7986_v44  ;;  %v8303_v16 = vadd.f32 %v3290_v57, %v9620_v33  ;;  %5782 = vmatmul.msk.bf16.gmra.mxu3 %vm1071_vm0, %v6018_v8 }
 0x380   : > { %9619 = vst [vmem:[#allocation40_spill] sm:$0xff] %v8294_v32  ;;  %v8307_v25 = vadd.f32 %v3291_v54, %v9621_v14 }
 0x381   : > { %v3117_v36 = vpop.f32.mrf.mxu2 }
 0x382   : > { %9622 = vst [vmem:[#allocation41_spill] sm:$0xff] %v8307_v25  ;;  %v3227_v45 = vmul.f32 %v3117_v36, %v3117_v36  ;;  %v3166_v43 = vpop.f32.mrf.mxu3  ;;  %v3021_v1 = vpop.f32.mrf.mxu0 }
 0x383   : > { %v3228_v15 = vmul.f32 %v3166_v43, %v3166_v43  ;;  %v3229_v49 = vmul.f32 %v3021_v1, %v3021_v1  ;;  %v3070_v32 = vpop.f32.mrf.mxu1 }
 0x384   : > { %v3292_v38 = vmul.f32 %v8049_v9, %v3227_v45  ;;  %v3230_v44 = vmul.f32 %v3070_v32, %v3070_v32  ;;  %v6019_v32 = vld [vmem:[%s6644_s30 + $0x178] sm:$0xff] }
 0x385   : > { %v3293_v34 = vmul.f32 %v8049_v9, %v3228_v15  ;;  %v3294_v57 = vmul.f32 %v8049_v9, %v3229_v49 }
 0x386   : > { %v8313_v8 = vadd.f32 %v3292_v38, %v7999_v17  ;;  %v3295_v54 = vmul.f32 %v8049_v9, %v3230_v44 }
 0x387   : > { %v8317_v33 = vadd.f32 %v3293_v34, %v8003_v0  ;;  %v8320_v14 = vadd.f32 %v3294_v57, %v8006_v61  ;;  %v9623_v61 = vld [vmem:[#allocation28_spill] sm:$0xff] }
 0x388   : > { %v8323_v36 = vadd.f32 %v3295_v54, %v8009_v56 }
 0x389   : > { %v3119_v45 = vpop.f32.mrf.mxu2 }
 0x38a   : > { %v3231_v43 = vmul.f32 %v3119_v45, %v3119_v45  ;;  %v3168_v1 = vpop.f32.mrf.mxu3  ;;  %v3024_v15 = vpop.f32.mrf.mxu0  ;;  %v9625_v45 = vld [vmem:[#allocation29_spill] sm:$0xff] }
 0x38b   : > { %v3232_v49 = vmul.f32 %v3168_v1, %v3168_v1  ;;  %v3233_v25 = vmul.f32 %v3024_v15, %v3024_v15  ;;  %v3073_v17 = vpop.f32.mrf.mxu1 }
 0x38c   : > { %v3296_v38 = vmul.f32 %v8049_v9, %v3231_v43  ;;  %v3234_v44 = vmul.f32 %v3073_v17, %v3073_v17 }
 0x38d   : > { %v3297_v0 = vmul.f32 %v8049_v9, %v3232_v49  ;;  %v3298_v34 = vmul.f32 %v8049_v9, %v3233_v25  ;;  %5759 = vmatmul.msk.bf16.gmra.mxu0 %vm1071_vm0, %v6019_v32  ;;  %v9627_v25 = vld [vmem:[#allocation30_spill] sm:$0xff] }
 0x38e   : > { %v8331_v56 = vadd.f32 %v3296_v38, %v9623_v61  ;;  %v3299_v57 = vmul.f32 %v8049_v9, %v3234_v44  ;;  %5767 = vmatmul.msk.bf16.gmra.mxu1 %vm1071_vm0, %v6019_v32  ;;  %5775 = vmatmul.msk.bf16.gmra.mxu2 %vm1071_vm0, %v6019_v32 }
 0x38f   : > { %v8337_v54 = vadd.f32 %v3297_v0, %v8023_v53  ;;  %v8340_v43 = vadd.f32 %v3298_v34, %v9625_v45  ;;  %5783 = vmatmul.msk.bf16.gmra.mxu3 %vm1071_vm0, %v6019_v32  ;;  %v9629_v32 = vld [vmem:[#allocation31_spill] sm:$0xff] }
 0x390   : > { %9624 = vst [vmem:[#allocation42_spill] sm:$0xff] %v8331_v56  ;;  %v8344_v1 = vadd.f32 %v3299_v57, %v9627_v25 }
 0x391   : > { %9626 = vst [vmem:[#allocation43_spill] sm:$0xff] %v8340_v43  ;;  %v3122_v15 = vpop.f32.mrf.mxu2 }
 0x392   : > { %9628 = vst [vmem:[#allocation44_spill] sm:$0xff] %v8344_v1  ;;  %v3235_v49 = vmul.f32 %v3122_v15, %v3122_v15  ;;  %v3171_v17 = vpop.f32.mrf.mxu3  ;;  %v3026_v38 = vpop.f32.mrf.mxu0 }
 0x393   : > { %v3236_v44 = vmul.f32 %v3171_v17, %v3171_v17  ;;  %v3237_v61 = vmul.f32 %v3026_v38, %v3026_v38  ;;  %v3075_v56 = vpop.f32.mrf.mxu1 }
 0x394   : > { %v3300_v53 = vmul.f32 %v8049_v9, %v3235_v49  ;;  %v3238_v0 = vmul.f32 %v3075_v56, %v3075_v56  ;;  %v6020_v56 = vld [vmem:[%s6644_s30 + $0x180] sm:$0xff] }
 0x395   : > { %v3301_v34 = vmul.f32 %v8049_v9, %v3236_v44  ;;  %v3302_v45 = vmul.f32 %v8049_v9, %v3237_v61  ;;  %v8363_v61 = vstv %s5784_s11  ;;  %s9013_s11 = scalar_lea.vmem [#allocation7], %s5248_s17 }
 0x396   : > { %v8350_v43 = vadd.f32 %v3300_v53, %v9629_v32  ;;  %v3303_v57 = vmul.f32 %v8049_v9, %v3238_v0 }
 0x397   : > { %v8354_v25 = vadd.f32 %v3301_v34, %v8040_v60  ;;  %v8357_v15 = vadd.f32 %v3302_v45, %v8043_v29 }
 0x398   : > { %9630 = vst [vmem:[#allocation45_spill] sm:$0xff] %v8350_v43  ;;  %v8360_v17 = vadd.f32 %v3303_v57, %v8046_v35 }
 0x399   : > { %v3124_v49 = vpop.f32.mrf.mxu2 }
 0x39a   : > { %v3239_v38 = vmul.f32 %v3124_v49, %v3124_v49  ;;  %v3173_v44 = vpop.f32.mrf.mxu3  ;;  %v3460_v1 = vpop.f32.mrf.mxu0 }
 0x39b   : > { %v3240_v53 = vmul.f32 %v3173_v44, %v3173_v44  ;;  %v3648_v32 = vmul.f32 %v3460_v1, %v3460_v1  ;;  %v3509_v43 = vpop.f32.mrf.mxu1 }
 0x39c   : > { %v3304_v0 = vmul.f32 %v8049_v9, %v3239_v38  ;;  %v3649_v60 = vmul.f32 %v3509_v43, %v3509_v43 }
 0x39d   : > { %v3305_v34 = vmul.f32 %v8049_v9, %v3240_v53  ;;  %v3713_v29 = vmul.f32 %v8363_v61, %v3648_v32  ;;  %5833 = vmatmul.msk.bf16.vlgmr.msra.gmra.mxu0 %vm1071_vm0, %v6020_v56 }
 0x39e   : > { %v8370_v35 = vadd.f32 %v3304_v0, %v8056_v13  ;;  %v3714_v45 = vmul.f32 %v8363_v61, %v3649_v60  ;;  %5841 = vmatmul.msk.bf16.vlgmr.msra.gmra.mxu1 %vm1071_vm0, %v6020_v56  ;;  %5849 = vmatmul.msk.bf16.vlgmr.msra.gmra.mxu2 %vm1071_vm0, %v6020_v56 }
 0x39f   : > { %v8376_v1 = vadd.f32 %v3305_v34, %v8062_v47  ;;  %v8379_v43 = vadd.f32 %v3713_v29, %v8065_v28  ;;  %5857 = vmatmul.msk.bf16.vlgmr.msra.gmra.mxu3 %vm1071_vm0, %v6020_v56 }
 0x3a0   : > { %v8383_v9 = vadd.f32 %v3714_v45, %v8070_v55 }
 0x3a1   : > { %v3558_v57 = vpop.f32.mrf.mxu2 }
 0x3a2   : > { %v3650_v13 = vmul.f32 %v3558_v57, %v3558_v57  ;;  %v3607_v49 = vpop.f32.mrf.mxu3  ;;  %v3462_v38 = vpop.f32.mrf.mxu0 }
 0x3a3   : > { %v3651_v44 = vmul.f32 %v3607_v49, %v3607_v49  ;;  %v3652_v53 = vmul.f32 %v3462_v38, %v3462_v38  ;;  %v3511_v32 = vpop.f32.mrf.mxu1 }
 0x3a4   : > { %v3715_v0 = vmul.f32 %v8363_v61, %v3650_v13  ;;  %v3653_v47 = vmul.f32 %v3511_v32, %v3511_v32  ;;  %v6021_v13 = vld [vmem:[%s6644_s30 + $0x188] sm:$0xff] }
 0x3a5   : > { %v3716_v60 = vmul.f32 %v8363_v61, %v3651_v44  ;;  %v3717_v28 = vmul.f32 %v8363_v61, %v3652_v53 }
 0x3a6   : > { %v8389_v56 = vadd.f32 %v3715_v0, %v8083_v30  ;;  %v3718_v55 = vmul.f32 %v8363_v61, %v3653_v47 }
 0x3a7   : > { %v8393_v34 = vadd.f32 %v3716_v60, %v8087_v37  ;;  %v8396_v29 = vadd.f32 %v3717_v28, %v8090_v11 }
 0x3a8   : > { %v8399_v45 = vadd.f32 %v3718_v55, %v8094_v41 }
 0x3a9   : > { %v3560_v57 = vpop.f32.mrf.mxu2 }
 0x3aa   : > { %v3654_v49 = vmul.f32 %v3560_v57, %v3560_v57  ;;  %v3609_v38 = vpop.f32.mrf.mxu3  ;;  %v3465_v44 = vpop.f32.mrf.mxu0 }
 0x3ab   : > { %v3655_v53 = vmul.f32 %v3609_v38, %v3609_v38  ;;  %v3656_v32 = vmul.f32 %v3465_v44, %v3465_v44  ;;  %v3514_v30 = vpop.f32.mrf.mxu1 }
 0x3ac   : > { %v3719_v0 = vmul.f32 %v8363_v61, %v3654_v49  ;;  %v3657_v47 = vmul.f32 %v3514_v30, %v3514_v30 }
 0x3ad   : > { %v3720_v37 = vmul.f32 %v8363_v61, %v3655_v53  ;;  %v3721_v60 = vmul.f32 %v8363_v61, %v3656_v32  ;;  %5834 = vmatmul.msk.bf16.gmra.mxu0 %vm1071_vm0, %v6021_v13 }
 0x3ae   : > { %v8407_v11 = vadd.f32 %v3719_v0, %v8109_v3  ;;  %v3722_v41 = vmul.f32 %v8363_v61, %v3657_v47  ;;  %5842 = vmatmul.msk.bf16.gmra.mxu1 %vm1071_vm0, %v6021_v13  ;;  %5850 = vmatmul.msk.bf16.gmra.mxu2 %vm1071_vm0, %v6021_v13 }
 0x3af   : > { %v8413_v28 = vadd.f32 %v3720_v37, %v8115_v51  ;;  %v8416_v55 = vadd.f32 %v3721_v60, %v8118_v5  ;;  %5858 = vmatmul.msk.bf16.gmra.mxu3 %vm1071_vm0, %v6021_v13 }
 0x3b0   : > { %v8420_v57 = vadd.f32 %v3722_v41, %v8122_v2 }
 0x3b1   : > { %v3563_v49 = vpop.f32.mrf.mxu2 }
 0x3b2   : > { %v3658_v3 = vmul.f32 %v3563_v49, %v3563_v49  ;;  %v3612_v38 = vpop.f32.mrf.mxu3  ;;  %v3467_v44 = vpop.f32.mrf.mxu0 }
 0x3b3   : > { %v3659_v53 = vmul.f32 %v3612_v38, %v3612_v38  ;;  %v3660_v32 = vmul.f32 %v3467_v44, %v3467_v44  ;;  %v3516_v30 = vpop.f32.mrf.mxu1 }
 0x3b4   : > { %v3723_v0 = vmul.f32 %v8363_v61, %v3658_v3  ;;  %v3661_v51 = vmul.f32 %v3516_v30, %v3516_v30  ;;  %v6022_v3 = vld [vmem:[%s6644_s30 + $0x190] sm:$0xff] }
 0x3b5   : > { %v3724_v47 = vmul.f32 %v8363_v61, %v3659_v53  ;;  %v3725_v5 = vmul.f32 %v8363_v61, %v3660_v32 }
 0x3b6   : > { %v8426_v13 = vadd.f32 %v3723_v0, %v8128_v59  ;;  %v3726_v2 = vmul.f32 %v8363_v61, %v3661_v51 }
 0x3b7   : > { %v8430_v37 = vadd.f32 %v3724_v47, %v8132_v22  ;;  %v8433_v60 = vadd.f32 %v3725_v5, %v8135_v18 }
 0x3b8   : > { %v8436_v41 = vadd.f32 %v3726_v2, %v8138_v27 }
 0x3b9   : > { %v3565_v49 = vpop.f32.mrf.mxu2 }
 0x3ba   : > { %v3662_v38 = vmul.f32 %v3565_v49, %v3565_v49  ;;  %v3614_v44 = vpop.f32.mrf.mxu3  ;;  %v3470_v53 = vpop.f32.mrf.mxu0 }
 0x3bb   : > { %v3663_v32 = vmul.f32 %v3614_v44, %v3614_v44  ;;  %v3664_v30 = vmul.f32 %v3470_v53, %v3470_v53  ;;  %v3519_v59 = vpop.f32.mrf.mxu1 }
 0x3bc   : > { %v3727_v0 = vmul.f32 %v8363_v61, %v3662_v38  ;;  %v3665_v51 = vmul.f32 %v3519_v59, %v3519_v59 }
 0x3bd   : > { %v3728_v22 = vmul.f32 %v8363_v61, %v3663_v32  ;;  %v3729_v47 = vmul.f32 %v8363_v61, %v3664_v30  ;;  %5835 = vmatmul.msk.bf16.gmra.mxu0 %vm1071_vm0, %v6022_v3 }
 0x3be   : > { %v8444_v18 = vadd.f32 %v3727_v0, %v8146_v21  ;;  %v3730_v27 = vmul.f32 %v8363_v61, %v3665_v51  ;;  %5843 = vmatmul.msk.bf16.gmra.mxu1 %vm1071_vm0, %v6022_v3  ;;  %5851 = vmatmul.msk.bf16.gmra.mxu2 %vm1071_vm0, %v6022_v3 }
 0x3bf   : > { %v8450_v5 = vadd.f32 %v3728_v22, %v8152_v48  ;;  %v8453_v2 = vadd.f32 %v3729_v47, %v8155_v19  ;;  %5859 = vmatmul.msk.bf16.gmra.mxu3 %vm1071_vm0, %v6022_v3 }
 0x3c0   : > { %v8457_v49 = vadd.f32 %v3730_v27, %v8159_v58 }
 0x3c1   : > { %v3568_v38 = vpop.f32.mrf.mxu2 }
 0x3c2   : > { %v3666_v21 = vmul.f32 %v3568_v38, %v3568_v38  ;;  %v3617_v44 = vpop.f32.mrf.mxu3  ;;  %v3472_v53 = vpop.f32.mrf.mxu0 }
 0x3c3   : > { %v3667_v32 = vmul.f32 %v3617_v44, %v3617_v44  ;;  %v3668_v30 = vmul.f32 %v3472_v53, %v3472_v53  ;;  %v3521_v59 = vpop.f32.mrf.mxu1 }
 0x3c4   : > { %v3731_v0 = vmul.f32 %v8363_v61, %v3666_v21  ;;  %v3669_v48 = vmul.f32 %v3521_v59, %v3521_v59  ;;  %v6023_v21 = vld [vmem:[%s6644_s30 + $0x198] sm:$0xff] }
 0x3c5   : > { %v3732_v51 = vmul.f32 %v8363_v61, %v3667_v32  ;;  %v3733_v19 = vmul.f32 %v8363_v61, %v3668_v30 }
 0x3c6   : > { %v8463_v3 = vadd.f32 %v3731_v0, %v8165_v4  ;;  %v3734_v58 = vmul.f32 %v8363_v61, %v3669_v48 }
 0x3c7   : > { %v8467_v22 = vadd.f32 %v3732_v51, %v8169_v10  ;;  %v8470_v47 = vadd.f32 %v3733_v19, %v8172_v7 }
 0x3c8   : > { %v8473_v27 = vadd.f32 %v3734_v58, %v8175_v50 }
 0x3c9   : > { %v3570_v38 = vpop.f32.mrf.mxu2 }
 0x3ca   : > { %v3670_v44 = vmul.f32 %v3570_v38, %v3570_v38  ;;  %v3619_v53 = vpop.f32.mrf.mxu3  ;;  %v3475_v32 = vpop.f32.mrf.mxu0 }
 0x3cb   : > { %v3671_v30 = vmul.f32 %v3619_v53, %v3619_v53  ;;  %v3672_v59 = vmul.f32 %v3475_v32, %v3475_v32  ;;  %v3524_v4 = vpop.f32.mrf.mxu1 }
 0x3cc   : > { %v3735_v0 = vmul.f32 %v8363_v61, %v3670_v44  ;;  %v3673_v48 = vmul.f32 %v3524_v4, %v3524_v4 }
 0x3cd   : > { %v3736_v10 = vmul.f32 %v8363_v61, %v3671_v30  ;;  %v3737_v51 = vmul.f32 %v8363_v61, %v3672_v59  ;;  %5836 = vmatmul.msk.bf16.gmra.mxu0 %vm1071_vm0, %v6023_v21 }
 0x3ce   : > { %v8481_v7 = vadd.f32 %v3735_v0, %v8183_v12  ;;  %v3738_v50 = vmul.f32 %v8363_v61, %v3673_v48  ;;  %5844 = vmatmul.msk.bf16.gmra.mxu1 %vm1071_vm0, %v6023_v21  ;;  %5852 = vmatmul.msk.bf16.gmra.mxu2 %vm1071_vm0, %v6023_v21 }
 0x3cf   : > { %v8487_v19 = vadd.f32 %v3736_v10, %v8189_v24  ;;  %v8490_v58 = vadd.f32 %v3737_v51, %v8192_v26  ;;  %5860 = vmatmul.msk.bf16.gmra.mxu3 %vm1071_vm0, %v6023_v21 }
 0x3d0   : > { %v8494_v38 = vadd.f32 %v3738_v50, %v8196_v23 }
 0x3d1   : > { %v3573_v44 = vpop.f32.mrf.mxu2 }
 0x3d2   : > { %v3674_v12 = vmul.f32 %v3573_v44, %v3573_v44  ;;  %v3622_v53 = vpop.f32.mrf.mxu3  ;;  %v3477_v32 = vpop.f32.mrf.mxu0 }
 0x3d3   : > { %v3675_v30 = vmul.f32 %v3622_v53, %v3622_v53  ;;  %v3676_v59 = vmul.f32 %v3477_v32, %v3477_v32  ;;  %v3526_v4 = vpop.f32.mrf.mxu1 }
 0x3d4   : > { %v3739_v0 = vmul.f32 %v8363_v61, %v3674_v12  ;;  %v3677_v24 = vmul.f32 %v3526_v4, %v3526_v4  ;;  %v6024_v12 = vld [vmem:[%s6644_s30 + $0x1a0] sm:$0xff] }
 0x3d5   : > { %v3740_v48 = vmul.f32 %v8363_v61, %v3675_v30  ;;  %v3741_v26 = vmul.f32 %v8363_v61, %v3676_v59 }
 0x3d6   : > { %v8500_v21 = vadd.f32 %v3739_v0, %v8202_v63  ;;  %v3742_v23 = vmul.f32 %v8363_v61, %v3677_v24 }
 0x3d7   : > { %v8504_v10 = vadd.f32 %v3740_v48, %v8206_v52  ;;  %v8507_v51 = vadd.f32 %v3741_v26, %v8209_v31  ;;  %v9633_v31 = vld [vmem:[#allocation32_spill] sm:$0xff] }
 0x3d8   : > { %v8510_v50 = vadd.f32 %v3742_v23, %v8212_v62  ;;  %v9635_v23 = vld [vmem:[#allocation33_spill] sm:$0xff] }
 0x3d9   : > { %9631 = vst [vmem:[#allocation46_spill] sm:$0xff] %v8507_v51  ;;  %v3575_v44 = vpop.f32.mrf.mxu2 }
 0x3da   : > { %9632 = vst [vmem:[#allocation47_spill] sm:$0xff] %v8510_v50  ;;  %v3678_v53 = vmul.f32 %v3575_v44, %v3575_v44  ;;  %v3624_v32 = vpop.f32.mrf.mxu3  ;;  %v3480_v30 = vpop.f32.mrf.mxu0 }
 0x3db   : > { %v3679_v59 = vmul.f32 %v3624_v32, %v3624_v32  ;;  %v3680_v4 = vmul.f32 %v3480_v30, %v3480_v30  ;;  %v3529_v63 = vpop.f32.mrf.mxu1  ;;  %v9639_v30 = vld [vmem:[#allocation35_spill] sm:$0xff] }
 0x3dc   : > { %v3743_v0 = vmul.f32 %v8363_v61, %v3678_v53  ;;  %v3681_v24 = vmul.f32 %v3529_v63, %v3529_v63  ;;  %v9637_v53 = vld [vmem:[#allocation34_spill] sm:$0xff] }
 0x3dd   : > { %v3744_v52 = vmul.f32 %v8363_v61, %v3679_v59  ;;  %v3745_v48 = vmul.f32 %v8363_v61, %v3680_v4  ;;  %5837 = vmatmul.msk.bf16.gmra.mxu0 %vm1071_vm0, %v6024_v12 }
 0x3de   : > { %v8518_v62 = vadd.f32 %v3743_v0, %v9633_v31  ;;  %v3746_v26 = vmul.f32 %v8363_v61, %v3681_v24  ;;  %5845 = vmatmul.msk.bf16.gmra.mxu1 %vm1071_vm0, %v6024_v12  ;;  %5853 = vmatmul.msk.bf16.gmra.mxu2 %vm1071_vm0, %v6024_v12 }
 0x3df   : > { %v8524_v44 = vadd.f32 %v3744_v52, %v9635_v23  ;;  %v8527_v32 = vadd.f32 %v3745_v48, %v9637_v53  ;;  %5861 = vmatmul.msk.bf16.gmra.mxu3 %vm1071_vm0, %v6024_v12 }
 0x3e0   : > { %9634 = vst [vmem:[#allocation15_spill] sm:$0xff] %v8518_v62  ;;  %v8531_v59 = vadd.f32 %v3746_v26, %v9639_v30  ;;  %v9641_v30 = vld [vmem:[#allocation36_spill] sm:$0xff] }
 0x3e1   : > { %9636 = vst [vmem:[#allocation14_spill] sm:$0xff] %v8524_v44  ;;  %v3578_v4 = vpop.f32.mrf.mxu2 }
 0x3e2   : > { %9638 = vst [vmem:[#allocation16_spill] sm:$0xff] %v8527_v32  ;;  %v3682_v63 = vmul.f32 %v3578_v4, %v3578_v4  ;;  %v3627_v0 = vpop.f32.mrf.mxu3  ;;  %v3482_v24 = vpop.f32.mrf.mxu0 }
 0x3e3   : > { %9640 = vst [vmem:[#allocation48_spill] sm:$0xff] %v8531_v59  ;;  %v3683_v31 = vmul.f32 %v3627_v0, %v3627_v0  ;;  %v3684_v62 = vmul.f32 %v3482_v24, %v3482_v24  ;;  %v3531_v50 = vpop.f32.mrf.mxu1  ;;  %v9643_v0 = vld [vmem:[#allocation37_spill] sm:$0xff] }
 0x3e4   : > { %v3747_v51 = vmul.f32 %v8363_v61, %v3682_v63  ;;  %v3685_v52 = vmul.f32 %v3531_v50, %v3531_v50  ;;  %v6025_v50 = vld [vmem:[%s6644_s30 + $0x1a8] sm:$0xff] }
 0x3e5   : > { %v3748_v23 = vmul.f32 %v8363_v61, %v3683_v31  ;;  %v3749_v48 = vmul.f32 %v8363_v61, %v3684_v62 }
 0x3e6   : > { %v8537_v12 = vadd.f32 %v3747_v51, %v8239_v39  ;;  %v3750_v26 = vmul.f32 %v8363_v61, %v3685_v52 }
 0x3e7   : > { %v8541_v53 = vadd.f32 %v3748_v23, %v8243_v46  ;;  %v8544_v4 = vadd.f32 %v3749_v48, %v9641_v30  ;;  %v9645_v48 = vld [vmem:[#allocation38_spill] sm:$0xff] }
 0x3e8   : > { %v8547_v24 = vadd.f32 %v3750_v26, %v9643_v0 }
 0x3e9   : > { %9642 = vst [vmem:[#allocation49_spill] sm:$0xff] %v8544_v4  ;;  %v3580_v63 = vpop.f32.mrf.mxu2 }
 0x3ea   : > { %9644 = vst [vmem:[#allocation50_spill] sm:$0xff] %v8547_v24  ;;  %v3686_v59 = vmul.f32 %v3580_v63, %v3580_v63  ;;  %v3629_v31 = vpop.f32.mrf.mxu3  ;;  %v3485_v32 = vpop.f32.mrf.mxu0 }
 0x3eb   : > { %v3687_v62 = vmul.f32 %v3629_v31, %v3629_v31  ;;  %v3688_v44 = vmul.f32 %v3485_v32, %v3485_v32  ;;  %v3534_v39 = vpop.f32.mrf.mxu1  ;;  %v9647_v32 = vld [vmem:[#allocation19_spill] sm:$0xff] }
 0x3ec   : > { %v3751_v51 = vmul.f32 %v8363_v61, %v3686_v59  ;;  %v3689_v52 = vmul.f32 %v3534_v39, %v3534_v39  ;;  %v9648_v59 = vld [vmem:[#allocation17_spill] sm:$0xff] }
 0x3ed   : > { %v3752_v46 = vmul.f32 %v8363_v61, %v3687_v62  ;;  %v3753_v23 = vmul.f32 %v8363_v61, %v3688_v44  ;;  %5838 = vmatmul.msk.bf16.gmra.mxu0 %vm1071_vm0, %v6025_v50  ;;  %v9649_v44 = vld [vmem:[#allocation18_spill] sm:$0xff] }
 0x3ee   : > { %v8555_v26 = vadd.f32 %v3751_v51, %v9645_v48  ;;  %v3754_v30 = vmul.f32 %v8363_v61, %v3689_v52  ;;  %5846 = vmatmul.msk.bf16.gmra.mxu1 %vm1071_vm0, %v6025_v50  ;;  %5854 = vmatmul.msk.bf16.gmra.mxu2 %vm1071_vm0, %v6025_v50 }
 0x3ef   : > { %v8561_v0 = vadd.f32 %v3752_v46, %v9647_v32  ;;  %v8564_v63 = vadd.f32 %v3753_v23, %v9648_v59  ;;  %5862 = vmatmul.msk.bf16.gmra.mxu3 %vm1071_vm0, %v6025_v50 }
 0x3f0   : > { %9646 = vst [vmem:[#allocation51_spill] sm:$0xff] %v8555_v26  ;;  %v8568_v31 = vadd.f32 %v3754_v30, %v9649_v44 }
 0x3f1   : > { %v3583_v62 = vpop.f32.mrf.mxu2 }
 0x3f2   : > { %9650 = vst [vmem:[#allocation52_spill] sm:$0xff] %v8568_v31  ;;  %v3690_v39 = vmul.f32 %v3583_v62, %v3583_v62  ;;  %v3632_v51 = vpop.f32.mrf.mxu3  ;;  %v3487_v52 = vpop.f32.mrf.mxu0  ;;  %v9652_v62 = vld [vmem:[#allocation39_spill] sm:$0xff] }
 0x3f3   : > { %v3691_v48 = vmul.f32 %v3632_v51, %v3632_v51  ;;  %v3692_v26 = vmul.f32 %v3487_v52, %v3487_v52  ;;  %v3536_v24 = vpop.f32.mrf.mxu1 }
 0x3f4   : > { %v3755_v4 = vmul.f32 %v8363_v61, %v3690_v39  ;;  %v3693_v46 = vmul.f32 %v3536_v24, %v3536_v24  ;;  %v6026_v24 = vld [vmem:[%s6644_s30 + $0x1b0] sm:$0xff] }
 0x3f5   : > { %v3756_v32 = vmul.f32 %v8363_v61, %v3691_v48  ;;  %v3757_v23 = vmul.f32 %v8363_v61, %v3692_v26 }
 0x3f6   : > { %v8574_v50 = vadd.f32 %v3755_v4, %v8276_v6  ;;  %v3758_v30 = vmul.f32 %v8363_v61, %v3693_v46 }
 0x3f7   : > { %v8578_v59 = vadd.f32 %v3756_v32, %v8280_v20  ;;  %v8581_v44 = vadd.f32 %v3757_v23, %v8283_v40  ;;  %v9653_v32 = vld [vmem:[#allocation40_spill] sm:$0xff] }
 0x3f8   : > { %9651 = vst [vmem:[#allocation53_spill] sm:$0xff] %v8574_v50  ;;  %v8584_v51 = vadd.f32 %v3758_v30, %v9652_v62 }
 0x3f9   : > { %v3585_v39 = vpop.f32.mrf.mxu2 }
 0x3fa   : > { %v3694_v52 = vmul.f32 %v3585_v39, %v3585_v39  ;;  %v3634_v48 = vpop.f32.mrf.mxu3  ;;  %v3490_v26 = vpop.f32.mrf.mxu0 }
 0x3fb   : > { %v3695_v31 = vmul.f32 %v3634_v48, %v3634_v48  ;;  %v3696_v6 = vmul.f32 %v3490_v26, %v3490_v26  ;;  %v3539_v4 = vpop.f32.mrf.mxu1 }
 0x3fc   : > { %v3759_v46 = vmul.f32 %v8363_v61, %v3694_v52  ;;  %v3697_v50 = vmul.f32 %v3539_v4, %v3539_v4 }
 0x3fd   : > { %v3760_v20 = vmul.f32 %v8363_v61, %v3695_v31  ;;  %v3761_v40 = vmul.f32 %v8363_v61, %v3696_v6  ;;  %5839 = vmatmul.msk.bf16.gmra.mxu0 %vm1071_vm0, %v6026_v24  ;;  %v9654_v31 = vld [vmem:[#allocation41_spill] sm:$0xff] }
 0x3fe   : > { %v8592_v23 = vadd.f32 %v3759_v46, %v9653_v32  ;;  %v3762_v30 = vmul.f32 %v8363_v61, %v3697_v50  ;;  %5847 = vmatmul.msk.bf16.gmra.mxu1 %vm1071_vm0, %v6026_v24  ;;  %5855 = vmatmul.msk.bf16.gmra.mxu2 %vm1071_vm0, %v6026_v24 }
 0x3ff   : > { %v8599_v62 = vadd.f32 %v3760_v20, %v8300_v42  ;;  %v8602_v39 = vadd.f32 %v3761_v40, %v8303_v16  ;;  %5863 = vmatmul.msk.bf16.gmra.mxu3 %vm1071_vm0, %v6026_v24 }
 0x400   : > { %v8606_v52 = vadd.f32 %v3762_v30, %v9654_v31 }
 0x401   : > { %v3588_v48 = vpop.f32.mrf.mxu2 }
 0x402   : > { %9655 = vst [vmem:[#allocation20_spill] sm:$0xff] %v8606_v52  ;;  %v3698_v26 = vmul.f32 %v3588_v48, %v3588_v48  ;;  %v3637_v50 = vpop.f32.mrf.mxu3  ;;  %v3492_v6 = vpop.f32.mrf.mxu0 }
 0x403   : > { %v3699_v4 = vmul.f32 %v3637_v50, %v3637_v50  ;;  %v3700_v46 = vmul.f32 %v3492_v6, %v3492_v6  ;;  %v3541_v32 = vpop.f32.mrf.mxu1  ;;  %v6027_v6 = vld [vmem:[%s6644_s30 + $0x1b8] sm:$0xff] }
 0x404   : > { %v3763_v42 = vmul.f32 %v8363_v61, %v3698_v26  ;;  %v3701_v20 = vmul.f32 %v3541_v32, %v3541_v32 }
 0x405   : > { %v3764_v16 = vmul.f32 %v8363_v61, %v3699_v4  ;;  %v3765_v40 = vmul.f32 %v8363_v61, %v3700_v46 }
 0x406   : > { %v8612_v24 = vadd.f32 %v3763_v42, %v8313_v8  ;;  %v3766_v30 = vmul.f32 %v8363_v61, %v3701_v20 }
 0x407   : > { %v8616_v31 = vadd.f32 %v3764_v16, %v8317_v33  ;;  %v8619_v48 = vadd.f32 %v3765_v40, %v8320_v14 }
 0x408   : > { %9656 = vst [vmem:[#allocation21_spill] sm:$0xff] %v8612_v24  ;;  %v8622_v50 = vadd.f32 %v3766_v30, %v8323_v36  ;;  %v9657_v36 = vld [vmem:[#allocation42_spill] sm:$0xff] }
 0x409   : > { %v3590_v26 = vpop.f32.mrf.mxu2 }
 0x40a   : > { %v3702_v4 = vmul.f32 %v3590_v26, %v3590_v26  ;;  %v3639_v46 = vpop.f32.mrf.mxu3  ;;  %v3495_v32 = vpop.f32.mrf.mxu0  ;;  %v9659_v26 = vld [vmem:[#allocation43_spill] sm:$0xff] }
 0x40b   : > { %v3703_v52 = vmul.f32 %v3639_v46, %v3639_v46  ;;  %v3704_v8 = vmul.f32 %v3495_v32, %v3495_v32  ;;  %v3544_v42 = vpop.f32.mrf.mxu1  ;;  %v4783_v46 = vld [vmem:[%s8629_s10] sm:$0xff]  ;;  %v9661_v32 = vld [vmem:[#allocation44_spill] sm:$0xff] }
 0x40c   : > { %v3767_v20 = vmul.f32 %v8363_v61, %v3702_v4  ;;  %v3705_v24 = vmul.f32 %v3544_v42, %v3544_v42 }
 0x40d   : > { %v3768_v33 = vmul.f32 %v8363_v61, %v3703_v52  ;;  %v3769_v14 = vmul.f32 %v8363_v61, %v3704_v8  ;;  %5840 = vmatmul.msk.bf16.gmra.mxu0 %vm1071_vm0, %v6027_v6  ;;  %v6306_v52 = vmov 0  }
 0x40e   : > { %v8635_v16 = vadd.f32 %v3767_v20, %v9657_v36  ;;  %v3770_v40 = vmul.f32 %v8363_v61, %v3705_v24  ;;  %5848 = vmatmul.msk.bf16.gmra.mxu1 %vm1071_vm0, %v6027_v6  ;;  %5856 = vmatmul.msk.bf16.gmra.mxu2 %vm1071_vm0, %v6027_v6 }
 0x40f   : > { %v8641_v30 = vadd.f32 %v3768_v33, %v8337_v54  ;;  %v8644_v4 = vadd.f32 %v3769_v14, %v9659_v26  ;;  %5864 = vmatmul.msk.bf16.gmra.mxu3 %vm1071_vm0, %v6027_v6  ;;  %6155 = vset.pattern.permute.xlu0 %v6306_v52 }
 0x410   : > { %v8649_v8 = vadd.f32 %v3770_v40, %v9661_v32  ;;  %4801 = vperm.xlu0 %6155, %v4783_v46   ;;  %6156 = vset.pattern.permute.xlu1 %v6306_v52  ;;  %v9663_v46 = vld [vmem:[#allocation45_spill] sm:$0xff] }
 0x411   : > { %9658 = vst [vmem:[#allocation22_spill] sm:$0xff] %v8641_v30  ;;  %v3593_v24 = vpop.f32.mrf.mxu2  ;;  %6157 = vset.pattern.permute.xlu2 %v6306_v52 }
 0x412   : > { %9660 = vst [vmem:[#allocation23_spill] sm:$0xff] %v8644_v4  ;;  %v3706_v42 = vmul.f32 %v3593_v24, %v3593_v24  ;;  %v3642_v20 = vpop.f32.mrf.mxu3  ;;  %v3497_v54 = vpop.f32.mrf.mxu0 }
 0x413   : > { %9662 = vst [vmem:[#allocation24_spill] sm:$0xff] %v8649_v8  ;;  %v3707_v33 = vmul.f32 %v3642_v20, %v3642_v20  ;;  %v3708_v14 = vmul.f32 %v3497_v54, %v3497_v54  ;;  %v3546_v36 = vpop.f32.mrf.mxu1  ;;  %v4784_v20 = vld [vmem:[%s8629_s10 + $0x8] sm:$0xff] }
 0x414   : > { %v3771_v6 = vmul.f32 %v8363_v61, %v3706_v42  ;;  %v3709_v26 = vmul.f32 %v3546_v36, %v3546_v36 }
 0x415   : > { %v3772_v4 = vmul.f32 %v8363_v61, %v3707_v33  ;;  %v3773_v40 = vmul.f32 %v8363_v61, %v3708_v14  ;;  %v6028_v33 = vld [vmem:[%s6644_s30 + $0x1c0] sm:$0xff] }
 0x416   : > { %v8655_v32 = vadd.f32 %v3771_v6, %v9663_v46  ;;  %v3774_v52 = vmul.f32 %v8363_v61, %v3709_v26  ;;  %v8669_v6 = vstv %s5865_s0 }
 0x417   : > { %v8659_v24 = vadd.f32 %v3772_v4, %v8354_v25  ;;  %v8662_v8 = vadd.f32 %v3773_v40, %v8357_v15 }
 0x418   : > { %v8666_v54 = vadd.f32 %v3774_v52, %v8360_v17  ;;  %4806 = vperm.xlu0 %6155, %v4784_v20  }
 0x419   : > { %v3595_v42 = vpop.f32.mrf.mxu2 }
 0x41a   : > { %v3710_v36 = vmul.f32 %v3595_v42, %v3595_v42  ;;  %v3644_v14 = vpop.f32.mrf.mxu3  ;;  %v3931_v30 = vpop.f32.mrf.mxu0 }
 0x41b   : > { %v3711_v26 = vmul.f32 %v3644_v14, %v3644_v14  ;;  %v4119_v46 = vmul.f32 %v3931_v30, %v3931_v30  ;;  %v3980_v25 = vpop.f32.mrf.mxu1 }
 0x41c   : > { %v3775_v4 = vmul.f32 %v8363_v61, %v3710_v36  ;;  %v4120_v15 = vmul.f32 %v3980_v25, %v3980_v25 }
 0x41d   : > { %v3776_v40 = vmul.f32 %v8363_v61, %v3711_v26  ;;  %v4184_v17 = vmul.f32 %v8669_v6, %v4119_v46  ;;  %5914 = vmatmul.msk.bf16.vlgmr.msrb.gmra.mxu0 %vm1071_vm0, %v6028_v33  ;;  %v4785_v61 = vld [vmem:[%s8629_s10 + $0x10] sm:$0xff] }
 0x41e   : > { %v8676_v52 = vadd.f32 %v3775_v4, %v8370_v35  ;;  %v4185_v20 = vmul.f32 %v8669_v6, %v4120_v15  ;;  %5922 = vmatmul.msk.bf16.vlgmr.msrb.gmra.mxu1 %vm1071_vm0, %v6028_v33  ;;  %5930 = vmatmul.msk.bf16.vlgmr.msrb.gmra.mxu2 %vm1071_vm0, %v6028_v33 }
 0x41f   : > { %v8682_v30 = vadd.f32 %v3776_v40, %v8376_v1  ;;  %v8685_v42 = vadd.f32 %v4184_v17, %v8379_v43  ;;  %5938 = vmatmul.msk.bf16.vlgmr.msrb.gmra.mxu3 %vm1071_vm0, %v6028_v33  ;;  %4811 = vperm.xlu1 %6156, %v4785_v61  }
 0x420   : > { %v8690_v36 = vadd.f32 %v4185_v20, %v8383_v9 }
 0x421   : > { %v4029_v35 = vpop.f32.mrf.mxu2 }
 0x422   : > { %v4121_v14 = vmul.f32 %v4029_v35, %v4029_v35  ;;  %v4078_v26 = vpop.f32.mrf.mxu3  ;;  %v3933_v46 = vpop.f32.mrf.mxu0  ;;  %v4786_v35 = vld [vmem:[%s8629_s10 + $0x18] sm:$0xff] }
 0x423   : > { %v4122_v25 = vmul.f32 %v4078_v26, %v4078_v26  ;;  %v4123_v4 = vmul.f32 %v3933_v46, %v3933_v46  ;;  %v3982_v1 = vpop.f32.mrf.mxu1  ;;  %v6029_v46 = vld [vmem:[%s6644_s30 + $0x1c8] sm:$0xff] }
 0x424   : > { %v4186_v15 = vmul.f32 %v8669_v6, %v4121_v14  ;;  %v4124_v43 = vmul.f32 %v3982_v1, %v3982_v1 }
 0x425   : > { %v4187_v40 = vmul.f32 %v8669_v6, %v4122_v25  ;;  %v4188_v33 = vmul.f32 %v8669_v6, %v4123_v4 }
 0x426   : > { %v8696_v9 = vadd.f32 %v4186_v15, %v8389_v56  ;;  %v4189_v17 = vmul.f32 %v8669_v6, %v4124_v43 }
 0x427   : > { %v8700_v20 = vadd.f32 %v4187_v40, %v8393_v34  ;;  %v8703_v61 = vadd.f32 %v4188_v33, %v8396_v29  ;;  %4816 = vperm.xlu1 %6156, %v4786_v35  }
 0x428   : > { %9664 = vst [vmem:[#allocation25_spill] sm:$0xff] %v8696_v9  ;;  %v8707_v26 = vadd.f32 %v4189_v17, %v8399_v45 }
 0x429   : > { %v4031_v14 = vpop.f32.mrf.mxu2 }
 0x42a   : > { %v4125_v25 = vmul.f32 %v4031_v14, %v4031_v14  ;;  %v4080_v4 = vpop.f32.mrf.mxu3  ;;  %v3936_v1 = vpop.f32.mrf.mxu0 }
 0x42b   : > { %v4126_v56 = vmul.f32 %v4080_v4, %v4080_v4  ;;  %v4127_v15 = vmul.f32 %v3936_v1, %v3936_v1  ;;  %v3985_v9 = vpop.f32.mrf.mxu1 }
 0x42c   : > { %v4190_v43 = vmul.f32 %v8669_v6, %v4125_v25  ;;  %v4128_v34 = vmul.f32 %v3985_v9, %v3985_v9 }
 0x42d   : > { %v4191_v40 = vmul.f32 %v8669_v6, %v4126_v56  ;;  %v4192_v29 = vmul.f32 %v8669_v6, %v4127_v15  ;;  %5915 = vmatmul.msk.bf16.gmra.mxu0 %vm1071_vm0, %v6029_v46 }
 0x42e   : > { %v8715_v45 = vadd.f32 %v4190_v43, %v8407_v11  ;;  %v4193_v33 = vmul.f32 %v8669_v6, %v4128_v34  ;;  %5923 = vmatmul.msk.bf16.gmra.mxu1 %vm1071_vm0, %v6029_v46  ;;  %5931 = vmatmul.msk.bf16.gmra.mxu2 %vm1071_vm0, %v6029_v46 }
 0x42f   : > { %v8721_v17 = vadd.f32 %v4191_v40, %v8413_v28  ;;  %v8724_v9 = vadd.f32 %v4192_v29, %v8416_v55  ;;  %5939 = vmatmul.msk.bf16.gmra.mxu3 %vm1071_vm0, %v6029_v46 }
 0x430   : > { %v8728_v35 = vadd.f32 %v4193_v33, %v8420_v57 }
 0x431   : > { %v4034_v14 = vpop.f32.mrf.mxu2 }
 0x432   : > { %v4129_v11 = vmul.f32 %v4034_v14, %v4034_v14  ;;  %v4083_v25 = vpop.f32.mrf.mxu3  ;;  %v3938_v4 = vpop.f32.mrf.mxu0 }
 0x433   : > { %v4130_v1 = vmul.f32 %v4083_v25, %v4083_v25  ;;  %v4131_v56 = vmul.f32 %v3938_v4, %v3938_v4  ;;  %v3987_v15 = vpop.f32.mrf.mxu1 }
 0x434   : > { %v4194_v43 = vmul.f32 %v8669_v6, %v4129_v11  ;;  %v4132_v28 = vmul.f32 %v3987_v15, %v3987_v15  ;;  %v6030_v11 = vld [vmem:[%s6644_s30 + $0x1d0] sm:$0xff] }
 0x435   : > { %v4195_v34 = vmul.f32 %v8669_v6, %v4130_v1  ;;  %v4196_v55 = vmul.f32 %v8669_v6, %v4131_v56 }
 0x436   : > { %v8734_v46 = vadd.f32 %v4194_v43, %v8426_v13  ;;  %v4197_v57 = vmul.f32 %v8669_v6, %v4132_v28 }
 0x437   : > { %v8738_v40 = vadd.f32 %v4195_v34, %v8430_v37  ;;  %v8741_v29 = vadd.f32 %v4196_v55, %v8433_v60 }
 0x438   : > { %v8744_v33 = vadd.f32 %v4197_v57, %v8436_v41 }
 0x439   : > { %v4036_v14 = vpop.f32.mrf.mxu2 }
 0x43a   : > { %v4133_v25 = vmul.f32 %v4036_v14, %v4036_v14  ;;  %v4085_v4 = vpop.f32.mrf.mxu3  ;;  %v3941_v1 = vpop.f32.mrf.mxu0  ;;  %v4789_v14 = vld [vmem:[%s8629_s10 + $0x30] sm:$0xff] }
 0x43b   : > { %v4134_v56 = vmul.f32 %v4085_v4, %v4085_v4  ;;  %v4135_v13 = vmul.f32 %v3941_v1, %v3941_v1  ;;  %v3990_v15 = vpop.f32.mrf.mxu1  ;;  %4831 = vperm.xlu0 %6155, %v4789_v14   ;;  %v4787_v14 = vld [vmem:[%s8629_s10 + $0x20] sm:$0xff] }
 0x43c   : > { %v4198_v43 = vmul.f32 %v8669_v6, %v4133_v25  ;;  %v4136_v28 = vmul.f32 %v3990_v15, %v3990_v15  ;;  %4821 = vperm.xlu2 %6157, %v4787_v14  }
 0x43d   : > { %v4199_v37 = vmul.f32 %v8669_v6, %v4134_v56  ;;  %v4200_v60 = vmul.f32 %v8669_v6, %v4135_v13  ;;  %5916 = vmatmul.msk.bf16.gmra.mxu0 %vm1071_vm0, %v6030_v11 }
 0x43e   : > { %v8752_v41 = vadd.f32 %v4198_v43, %v8444_v18  ;;  %v4201_v34 = vmul.f32 %v8669_v6, %v4136_v28  ;;  %5924 = vmatmul.msk.bf16.gmra.mxu1 %vm1071_vm0, %v6030_v11  ;;  %5932 = vmatmul.msk.bf16.gmra.mxu2 %vm1071_vm0, %v6030_v11 }
 0x43f   : > { %v8758_v55 = vadd.f32 %v4199_v37, %v8450_v5  ;;  %v8761_v57 = vadd.f32 %v4200_v60, %v8453_v2  ;;  %5940 = vmatmul.msk.bf16.gmra.mxu3 %vm1071_vm0, %v6030_v11 }
 0x440   : > { %v8766_v25 = vadd.f32 %v4201_v34, %v8457_v49 }
 0x441   : > { %v4039_v18 = vpop.f32.mrf.mxu2 }
 0x442   : > { %v4137_v4 = vmul.f32 %v4039_v18, %v4039_v18  ;;  %v4088_v1 = vpop.f32.mrf.mxu3  ;;  %v3943_v56 = vpop.f32.mrf.mxu0  ;;  %v4790_v18 = vld [vmem:[%s8629_s10 + $0x38] sm:$0xff] }
 0x443   : > { %v4138_v13 = vmul.f32 %v4088_v1, %v4088_v1  ;;  %v4139_v15 = vmul.f32 %v3943_v56, %v3943_v56  ;;  %v3992_v5 = vpop.f32.mrf.mxu1  ;;  %4836 = vperm.xlu1 %6156, %v4790_v18   ;;  %v6031_v56 = vld [vmem:[%s6644_s30 + $0x1d8] sm:$0xff] }
 0x444   : > { %v4202_v2 = vmul.f32 %v8669_v6, %v4137_v4  ;;  %v4140_v43 = vmul.f32 %v3992_v5, %v3992_v5 }
 0x445   : > { %v4203_v11 = vmul.f32 %v8669_v6, %v4138_v13  ;;  %v4204_v28 = vmul.f32 %v8669_v6, %v4139_v15 }
 0x446   : > { %v8772_v49 = vadd.f32 %v4202_v2, %v8463_v3  ;;  %v4205_v37 = vmul.f32 %v8669_v6, %v4140_v43 }
 0x447   : > { %v8776_v60 = vadd.f32 %v4203_v11, %v8467_v22  ;;  %v8779_v34 = vadd.f32 %v4204_v28, %v8470_v47 }
 0x448   : > { %v8784_v4 = vadd.f32 %v4205_v37, %v8473_v27 }
 0x449   : > { %v4041_v1 = vpop.f32.mrf.mxu2 }
 0x44a   : > { %v4141_v13 = vmul.f32 %v4041_v1, %v4041_v1  ;;  %v4090_v3 = vpop.f32.mrf.mxu3  ;;  %v3946_v15 = vpop.f32.mrf.mxu0  ;;  %v4788_v1 = vld [vmem:[%s8629_s10 + $0x28] sm:$0xff] }
 0x44b   : > { %v4142_v5 = vmul.f32 %v4090_v3, %v4090_v3  ;;  %v4143_v2 = vmul.f32 %v3946_v15, %v3946_v15  ;;  %v3995_v22 = vpop.f32.mrf.mxu1  ;;  %4826 = vperm.xlu2 %6157, %v4788_v1   ;;  %v9666_v1 = vld [vmem:[#allocation46_spill] sm:$0xff] }
 0x44c   : > { %v4206_v43 = vmul.f32 %v8669_v6, %v4141_v13  ;;  %v4144_v47 = vmul.f32 %v3995_v22, %v3995_v22 }
 0x44d   : > { %v4207_v11 = vmul.f32 %v8669_v6, %v4142_v5  ;;  %v4208_v28 = vmul.f32 %v8669_v6, %v4143_v2  ;;  %5917 = vmatmul.msk.bf16.gmra.mxu0 %vm1071_vm0, %v6031_v56 }
 0x44e   : > { %v8792_v27 = vadd.f32 %v4206_v43, %v8481_v7  ;;  %v4209_v37 = vmul.f32 %v8669_v6, %v4144_v47  ;;  %5925 = vmatmul.msk.bf16.gmra.mxu1 %vm1071_vm0, %v6031_v56  ;;  %5933 = vmatmul.msk.bf16.gmra.mxu2 %vm1071_vm0, %v6031_v56 }
 0x44f   : > { %v8798_v14 = vadd.f32 %v4207_v11, %v8487_v19  ;;  %v8801_v18 = vadd.f32 %v4208_v28, %v8490_v58  ;;  %5941 = vmatmul.msk.bf16.gmra.mxu3 %vm1071_vm0, %v6031_v56  ;;  %v4792_v11 = vld [vmem:[%s8629_s10 + $0x48] sm:$0xff] }
 0x450   : > { %v8806_v13 = vadd.f32 %v4209_v37, %v8494_v38  ;;  %4846 = vperm.xlu0 %6155, %v4792_v11  }
 0x451   : > { %v4044_v7 = vpop.f32.mrf.mxu2 }
 0x452   : > { %9665 = vst [vmem:[#allocation26_spill] sm:$0xff] %v8806_v13  ;;  %v4145_v3 = vmul.f32 %v4044_v7, %v4044_v7  ;;  %v4093_v15 = vpop.f32.mrf.mxu3  ;;  %v3948_v5 = vpop.f32.mrf.mxu0 }
 0x453   : > { %v4146_v2 = vmul.f32 %v4093_v15, %v4093_v15  ;;  %v4147_v22 = vmul.f32 %v3948_v5, %v3948_v5  ;;  %v3997_v19 = vpop.f32.mrf.mxu1 }
 0x454   : > { %v4210_v43 = vmul.f32 %v8669_v6, %v4145_v3  ;;  %v4148_v58 = vmul.f32 %v3997_v19, %v3997_v19  ;;  %v9668_v3 = vld [vmem:[#allocation47_spill] sm:$0xff] }
 0x455   : > { %v4211_v47 = vmul.f32 %v8669_v6, %v4146_v2  ;;  %v4212_v56 = vmul.f32 %v8669_v6, %v4147_v22  ;;  %v6032_v2 = vld [vmem:[%s6644_s30 + $0x1e0] sm:$0xff] }
 0x456   : > { %v8813_v38 = vadd.f32 %v4210_v43, %v8500_v21  ;;  %v4213_v28 = vmul.f32 %v8669_v6, %v4148_v58 }
 0x457   : > { %v8817_v37 = vadd.f32 %v4211_v47, %v8504_v10  ;;  %v8820_v7 = vadd.f32 %v4212_v56, %v9666_v1  ;;  %v9670_v1 = vld [vmem:[#allocation15_spill] sm:$0xff] }
 0x458   : > { %v8823_v15 = vadd.f32 %v4213_v28, %v9668_v3  ;;  %v4795_v28 = vld [vmem:[%s8629_s10 + $0x60] sm:$0xff] }
 0x459   : > { %9667 = vst [vmem:[#allocation27_spill] sm:$0xff] %v8820_v7  ;;  %v4046_v5 = vpop.f32.mrf.mxu2  ;;  %4861 = vperm.xlu0 %6155, %v4795_v28  }
 0x45a   : > { %9669 = vst [vmem:[#allocation28_spill] sm:$0xff] %v8823_v15  ;;  %v4149_v22 = vmul.f32 %v4046_v5, %v4046_v5  ;;  %v4095_v19 = vpop.f32.mrf.mxu3  ;;  %v3951_v13 = vpop.f32.mrf.mxu0 }
 0x45b   : > { %v4150_v21 = vmul.f32 %v4095_v19, %v4095_v19  ;;  %v4151_v43 = vmul.f32 %v3951_v13, %v3951_v13  ;;  %v4000_v58 = vpop.f32.mrf.mxu1  ;;  %v9672_v13 = vld [vmem:[#allocation14_spill] sm:$0xff] }
 0x45c   : > { %v4214_v11 = vmul.f32 %v8669_v6, %v4149_v22  ;;  %v4152_v10 = vmul.f32 %v4000_v58, %v4000_v58  ;;  %v9674_v22 = vld [vmem:[#allocation16_spill] sm:$0xff] }
 0x45d   : > { %v4215_v47 = vmul.f32 %v8669_v6, %v4150_v21  ;;  %v4216_v56 = vmul.f32 %v8669_v6, %v4151_v43  ;;  %5918 = vmatmul.msk.bf16.gmra.mxu0 %vm1071_vm0, %v6032_v2  ;;  %v4793_v21 = vld [vmem:[%s8629_s10 + $0x50] sm:$0xff] }
 0x45e   : > { %v8832_v3 = vadd.f32 %v4214_v11, %v9670_v1  ;;  %v4217_v5 = vmul.f32 %v8669_v6, %v4152_v10  ;;  %5926 = vmatmul.msk.bf16.gmra.mxu1 %vm1071_vm0, %v6032_v2  ;;  %5934 = vmatmul.msk.bf16.gmra.mxu2 %vm1071_vm0, %v6032_v2  ;;  %v9676_v43 = vld [vmem:[#allocation48_spill] sm:$0xff] }
 0x45f   : > { %v8838_v19 = vadd.f32 %v4215_v47, %v9672_v13  ;;  %v8841_v58 = vadd.f32 %v4216_v56, %v9674_v22  ;;  %5942 = vmatmul.msk.bf16.gmra.mxu3 %vm1071_vm0, %v6032_v2  ;;  %4851 = vperm.xlu1 %6156, %v4793_v21  }
 0x460   : > { %9671 = vst [vmem:[#allocation29_spill] sm:$0xff] %v8832_v3  ;;  %v8846_v11 = vadd.f32 %v4217_v5, %v9676_v43 }
 0x461   : > { %9673 = vst [vmem:[#allocation30_spill] sm:$0xff] %v8838_v19  ;;  %v4049_v10 = vpop.f32.mrf.mxu2 }
 0x462   : > { %9675 = vst [vmem:[#allocation31_spill] sm:$0xff] %v8841_v58  ;;  %v4153_v1 = vmul.f32 %v4049_v10, %v4049_v10  ;;  %v4098_v3 = vpop.f32.mrf.mxu3  ;;  %v3953_v15 = vpop.f32.mrf.mxu0  ;;  %v4798_v58 = vld [vmem:[%s8629_s10 + $0x78] sm:$0xff]  ;;  %v4791_v10 = vld [vmem:[%s8629_s10 + $0x40] sm:$0xff] }
 0x463   : > { %9677 = vst [vmem:[#allocation32_spill] sm:$0xff] %v8846_v11  ;;  %v4154_v7 = vmul.f32 %v4098_v3, %v4098_v3  ;;  %v4155_v47 = vmul.f32 %v3953_v15, %v3953_v15  ;;  %v4002_v13 = vpop.f32.mrf.mxu1  ;;  %v9679_v3 = vld [vmem:[#allocation49_spill] sm:$0xff]  ;;  %4876 = vperm.xlu0 %6155, %v4798_v58   ;;  %4841 = vperm.xlu2 %6157, %v4791_v10  }
 0x464   : > { %v4218_v56 = vmul.f32 %v8669_v6, %v4153_v1  ;;  %v4156_v22 = vmul.f32 %v4002_v13, %v4002_v13  ;;  %v9680_v1 = vld [vmem:[#allocation50_spill] sm:$0xff] }
 0x465   : > { %v4219_v2 = vmul.f32 %v8669_v6, %v4154_v7  ;;  %v4220_v28 = vmul.f32 %v8669_v6, %v4155_v47  ;;  %v6033_v47 = vld [vmem:[%s6644_s30 + $0x1e8] sm:$0xff] }
 0x466   : > { %v8853_v5 = vadd.f32 %v4218_v56, %v8537_v12  ;;  %v4221_v21 = vmul.f32 %v8669_v6, %v4156_v22 }
 0x467   : > { %v8857_v43 = vadd.f32 %v4219_v2, %v8541_v53  ;;  %v8860_v15 = vadd.f32 %v4220_v28, %v9679_v3  ;;  %v9681_v3 = vld [vmem:[#allocation51_spill] sm:$0xff] }
 0x468   : > { %9678 = vst [vmem:[#allocation33_spill] sm:$0xff] %v8853_v5  ;;  %v8864_v13 = vadd.f32 %v4221_v21, %v9680_v1  ;;  %v4796_v21 = vld [vmem:[%s8629_s10 + $0x68] sm:$0xff] }
 0x469   : > { %v4051_v7 = vpop.f32.mrf.mxu2  ;;  %4866 = vperm.xlu1 %6156, %v4796_v21  }
 0x46a   : > { %v4157_v11 = vmul.f32 %v4051_v7, %v4051_v7  ;;  %v4100_v12 = vpop.f32.mrf.mxu3  ;;  %v3956_v56 = vpop.f32.mrf.mxu0 }
 0x46b   : > { %v4158_v5 = vmul.f32 %v4100_v12, %v4100_v12  ;;  %v4159_v22 = vmul.f32 %v3956_v56, %v3956_v56  ;;  %v4005_v19 = vpop.f32.mrf.mxu1 }
 0x46c   : > { %v4222_v53 = vmul.f32 %v8669_v6, %v4157_v11  ;;  %v4160_v2 = vmul.f32 %v4005_v19, %v4005_v19  ;;  %v9683_v11 = vld [vmem:[#allocation52_spill] sm:$0xff] }
 0x46d   : > { %v4223_v28 = vmul.f32 %v8669_v6, %v4158_v5  ;;  %v4224_v58 = vmul.f32 %v8669_v6, %v4159_v22  ;;  %5919 = vmatmul.msk.bf16.gmra.mxu0 %vm1071_vm0, %v6033_v47 }
 0x46e   : > { %v8873_v10 = vadd.f32 %v4222_v53, %v9681_v3  ;;  %v4225_v1 = vmul.f32 %v8669_v6, %v4160_v2  ;;  %5927 = vmatmul.msk.bf16.gmra.mxu1 %vm1071_vm0, %v6033_v47  ;;  %5935 = vmatmul.msk.bf16.gmra.mxu2 %vm1071_vm0, %v6033_v47 }
 0x46f   : > { %v8879_v7 = vadd.f32 %v4223_v28, %v8561_v0  ;;  %v8882_v19 = vadd.f32 %v4224_v58, %v8564_v63  ;;  %5943 = vmatmul.msk.bf16.gmra.mxu3 %vm1071_vm0, %v6033_v47  ;;  %v9685_v47 = vld [vmem:[#allocation53_spill] sm:$0xff] }
 0x470   : > { %9682 = vst [vmem:[#allocation34_spill] sm:$0xff] %v8873_v10  ;;  %v8886_v5 = vadd.f32 %v4225_v1, %v9683_v11 }
 0x471   : > { %v4054_v12 = vpop.f32.mrf.mxu2 }
 0x472   : > { %9684 = vst [vmem:[#allocation35_spill] sm:$0xff] %v8886_v5  ;;  %v4161_v56 = vmul.f32 %v4054_v12, %v4054_v12  ;;  %v4103_v22 = vpop.f32.mrf.mxu3  ;;  %v3958_v53 = vpop.f32.mrf.mxu0 }
 0x473   : > { %v4162_v2 = vmul.f32 %v4103_v22, %v4103_v22  ;;  %v4163_v3 = vmul.f32 %v3958_v53, %v3958_v53  ;;  %v4007_v10 = vpop.f32.mrf.mxu1 }
 0x474   : > { %v4226_v0 = vmul.f32 %v8669_v6, %v4161_v56  ;;  %v4164_v28 = vmul.f32 %v4007_v10, %v4007_v10  ;;  %v6034_v56 = vld [vmem:[%s6644_s30 + $0x1f0] sm:$0xff] }
 0x475   : > { %v4227_v63 = vmul.f32 %v8669_v6, %v4162_v2  ;;  %v4228_v58 = vmul.f32 %v8669_v6, %v4163_v3 }
 0x476   : > { %v8892_v21 = vadd.f32 %v4226_v0, %v9685_v47  ;;  %v4229_v1 = vmul.f32 %v8669_v6, %v4164_v28 }
 0x477   : > { %v8896_v11 = vadd.f32 %v4227_v63, %v8578_v59  ;;  %v8899_v12 = vadd.f32 %v4228_v58, %v8581_v44  ;;  %v4794_v44 = vld [vmem:[%s8629_s10 + $0x58] sm:$0xff] }
 0x478   : > { %9686 = vst [vmem:[#allocation36_spill] sm:$0xff] %v8892_v21  ;;  %v8902_v22 = vadd.f32 %v4229_v1, %v8584_v51  ;;  %4856 = vperm.xlu2 %6157, %v4794_v44   ;;  %v9689_v44 = vld [vmem:[#allocation21_spill] sm:$0xff] }
 0x479   : > { %v4056_v10 = vpop.f32.mrf.mxu2 }
 0x47a   : > { %v4165_v53 = vmul.f32 %v4056_v10, %v4056_v10  ;;  %v4105_v2 = vpop.f32.mrf.mxu3  ;;  %v3961_v3 = vpop.f32.mrf.mxu0  ;;  %v9688_v10 = vld [vmem:[#allocation20_spill] sm:$0xff] }
 0x47b   : > { %v4166_v5 = vmul.f32 %v4105_v2, %v4105_v2  ;;  %v4167_v0 = vmul.f32 %v3961_v3, %v3961_v3  ;;  %v4010_v47 = vpop.f32.mrf.mxu1 }
 0x47c   : > { %v4230_v28 = vmul.f32 %v8669_v6, %v4165_v53  ;;  %v4168_v21 = vmul.f32 %v4010_v47, %v4010_v47 }
 0x47d   : > { %v4231_v59 = vmul.f32 %v8669_v6, %v4166_v5  ;;  %v4232_v63 = vmul.f32 %v8669_v6, %v4167_v0  ;;  %5920 = vmatmul.msk.bf16.gmra.mxu0 %vm1071_vm0, %v6034_v56 }
 0x47e   : > { %v8911_v51 = vadd.f32 %v4230_v28, %v8592_v23  ;;  %v4233_v58 = vmul.f32 %v8669_v6, %v4168_v21  ;;  %5928 = vmatmul.msk.bf16.gmra.mxu1 %vm1071_vm0, %v6034_v56  ;;  %5936 = vmatmul.msk.bf16.gmra.mxu2 %vm1071_vm0, %v6034_v56 }
 0x47f   : > { %v8917_v1 = vadd.f32 %v4231_v59, %v8599_v62  ;;  %v8920_v5 = vadd.f32 %v4232_v63, %v8602_v39  ;;  %5944 = vmatmul.msk.bf16.gmra.mxu3 %vm1071_vm0, %v6034_v56  ;;  %v4797_v56 = vld [vmem:[%s8629_s10 + $0x70] sm:$0xff]  ;;  %s9722_s10 = sld [smem:[#allocation55_spill]] }
 0x480   : > { %v8924_v53 = vadd.f32 %v4233_v58, %v9688_v10  ;;  %4871 = vperm.xlu2 %6157, %v4797_v56   ;;  %v9692_v56 = vld [vmem:[#allocation22_spill] sm:$0xff] }
 0x481   : > { %9687 = vst [vmem:[#allocation37_spill] sm:$0xff] %v8920_v5  ;;  %v4059_v23 = vpop.f32.mrf.mxu2 }
 0x482   : > { %v4169_v2 = vmul.f32 %v4059_v23, %v4059_v23  ;;  %v4108_v21 = vpop.f32.mrf.mxu3  ;;  %v3963_v3 = vpop.f32.mrf.mxu0 }
 0x483   : > { %v4170_v0 = vmul.f32 %v4108_v21, %v4108_v21  ;;  %v4171_v47 = vmul.f32 %v3963_v3, %v3963_v3  ;;  %v4012_v28 = vpop.f32.mrf.mxu1  ;;  %v6035_v3 = vld [vmem:[%s6644_s30 + $0x1f8] sm:$0xff]  ;;  %s8955_s30 = sshll.u32 %s6287_s25, 2  ;;  %s5946_s25 = sld [smem:[#allocation2 + $0x7]] }
 0x484   : > { %v4234_v62 = vmul.f32 %v8669_v6, %v4169_v2  ;;  %v4172_v59 = vmul.f32 %v4012_v28, %v4012_v28  ;;  %p912_p7 = scmp.lt.s32.totalorder %s8955_s30, 7  ;;  %s5094_s26 = sadd.s32 %s6036_s6, %s8955_s30 }
 0x485   : > { %v4235_v39 = vmul.f32 %v8669_v6, %v4170_v0  ;;  %v4236_v63 = vmul.f32 %v8669_v6, %v4171_v47  ;;  %s5951_s13 = sshll.u32 %s5094_s26, 3  ;;  %s6193_s6 = scalar_lea.hbm %s9722_s10, 2048 }
 0x486   : > { %v8931_v5 = vadd.f32 %v4234_v62, %v9689_v44  ;;  %v4237_v58 = vmul.f32 %v8669_v6, %v4172_v59  ;;  %s913_s16 = scalar_select %p912_p7, %s8955_s30, 7 }
 0x487   : > { %v8935_v10 = vadd.f32 %v4235_v39, %v8616_v31  ;;  %v8938_v23 = vadd.f32 %v4236_v63, %v8619_v48  ;;  %s5096_s0 = scalar_lea.hbm %s9722_s10, %s5951_s13 }
 0x488   : > { %9690 = vst [vmem:[#allocation38_spill] sm:$0xff] %v8931_v5  ;;  %v8941_v2 = vadd.f32 %v4237_v58, %v8622_v50  ;;  %v9693_v58 = vld [vmem:[#allocation23_spill] sm:$0xff]  ;;  %s914_s9 = scalar_lea.vmem %s9329_s4, %s913_s16  ;;  %s5099_s30 = sshll.u32 %s5096_s0, 4  ;;  %s5100_s30 = int_to_ptr.hbm [resolvable:$true] %s5099_s30 }
 0x489   : > { %v4061_v21 = vpop.f32.mrf.mxu2  ;;  %s5082_s16 = scalar_lea.sflag [#allocation3], %s900_s5  ;;  %s6187_s21 = sshra.s32 %s5100_s30, 4  ;;  %s6188_s21 = int_to_ptr.hbm [resolvable:$true] %s6187_s21 }
 0x48a   : > { %v4173_v0 = vmul.f32 %v4061_v21, %v4061_v21  ;;  %v4110_v47 = vpop.f32.mrf.mxu3  ;;  %v3966_v28 = vpop.f32.mrf.mxu0  ;;  %s6189_s23 = scalar_lea.hbm %s6188_s21, 512  ;;  %p6194_p1 = scmp.lt.s32.totalorder %s6188_s21, %s9722_s10 }
 0x48b   : > { %v4174_v62 = vmul.f32 %v4110_v47, %v4110_v47  ;;  %v4175_v44 = vmul.f32 %v3966_v28, %v3966_v28  ;;  %v4015_v5 = vpop.f32.mrf.mxu1  ;;  %p6190_p11 = scmp.ne.s32.totalorder %s6188_s21, %s6189_s23  ;;  %p6195_p4 = scmp.lt.s32.totalorder %s6193_s6, %s6189_s23 }
 0x48c   : > { %v4238_v59 = vmul.f32 %v8669_v6, %v4173_v0  ;;  %v4176_v31 = vmul.f32 %v4015_v5, %v4015_v5 }
 0x48d   : > { %v4239_v39 = vmul.f32 %v8669_v6, %v4174_v62  ;;  %v4240_v48 = vmul.f32 %v8669_v6, %v4175_v44  ;;  %5921 = vmatmul.msk.bf16.gmra.mxu0 %vm1071_vm0, %v6035_v3  ;;  %p6191_p12 = pnand %p6190_p11, %p6444_p0  ;;  %p6196_p5 = por %p6195_p4, %p6194_p1 }
 0x48e   : > { %v8949_v50 = vadd.f32 %v4238_v59, %v8635_v16  ;;  %v4241_v63 = vmul.f32 %v8669_v6, %v4176_v31  ;;  %5929 = vmatmul.msk.bf16.gmra.mxu1 %vm1071_vm0, %v6035_v3  ;;  %5937 = vmatmul.msk.bf16.gmra.mxu2 %vm1071_vm0, %v6035_v3  ;;  %v9694_v16 = vld [vmem:[#allocation24_spill] sm:$0xff] }
 0x48f   : > { %v8958_v5 = vadd.f32 %v4239_v39, %v9692_v56  ;;  %v8961_v21 = vadd.f32 %v4240_v48, %v9693_v58  ;;  %5945 = vmatmul.msk.bf16.gmra.mxu3 %vm1071_vm0, %v6035_v3  ;;  %p6192_p13 = pneg %p6191_p12 }
 0x490   : > { %9691 = vst [vmem:[#allocation19_spill] sm:$0xff] %v8949_v50  ;;  %v8965_v0 = vadd.f32 %v4241_v63, %v9694_v16 }
 0x491   : > { %v4064_v47 = vpop.f32.mrf.mxu2  ;;  %p6197_p6 = pnand %p6196_p5, %p6192_p13 }
 0x492   : > { %9695 = vst [vmem:[#allocation17_spill] sm:$0xff] %v8965_v0  ;;  %v4177_v28 = vmul.f32 %v4064_v47, %v4064_v47  ;;  %v4113_v62 = vpop.f32.mrf.mxu3  ;;  %v3968_v44 = vpop.f32.mrf.mxu0 }
 0x493   : > { %v4178_v59 = vmul.f32 %v4113_v62, %v4113_v62  ;;  %v4179_v31 = vmul.f32 %v3968_v44, %v3968_v44  ;;  %v4017_v50 = vpop.f32.mrf.mxu1 }
 0x494   : > { %v4242_v39 = vmul.f32 %v8669_v6, %v4177_v28  ;;  %v4180_v56 = vmul.f32 %v4017_v50, %v4017_v50 }
 0x495   : > { %v4243_v48 = vmul.f32 %v8669_v6, %v4178_v59  ;;  %v4244_v58 = vmul.f32 %v8669_v6, %v4179_v31  ;;  %v8988_v59 = vstv %s5946_s25  ;;  %s5097_s25 = sshll.u32 %s9013_s11, 4  ;;  %s5098_s25 = int_to_ptr.vmem [resolvable:$true] %s5097_s25 }
 0x496   : > { %v8973_v3 = vadd.f32 %v4242_v39, %v8655_v32  ;;  %v4245_v63 = vmul.f32 %v8669_v6, %v4180_v56 }
 0x497   : > { %v8977_v16 = vadd.f32 %v4243_v48, %v8659_v24  ;;  %v8980_v47 = vadd.f32 %v4244_v58, %v8662_v8  ;;  %v4943_v48 = vld [vmem:[%s914_s9] sm:$0xf] }
 0x498   : > { %9696 = vst [vmem:[#allocation18_spill] sm:$0xff] %v8973_v3  ;;  %v8983_v28 = vadd.f32 %v4245_v63, %v8666_v54  ;;  %v4802_v54 = vpop.permute.xlu0 %4801 }
 0x499   : > { %9697 = vst [vmem:[#allocation39_spill] sm:$0xff] %v8977_v16  ;;  %v4066_v50 = vpop.f32.mrf.mxu2 }
 0x49a   : > { %9698 = vst [vmem:[#allocation40_spill] sm:$0xff] %v8980_v47  ;;  %v4181_v62 = vmul.f32 %v4066_v50, %v4066_v50  ;;  %v4115_v32 = vpop.f32.mrf.mxu3  ;;  %v4402_v44 = vpop.f32.mrf.mxu0 }
 0x49b   : > { %9699 = vst [vmem:[#allocation41_spill] sm:$0xff] %v8983_v28  ;;  %v4182_v24 = vmul.f32 %v4115_v32, %v4115_v32  ;;  %v4590_v31 = vmul.f32 %v4402_v44, %v4402_v44  ;;  %v4451_v39 = vpop.f32.mrf.mxu1  ;;  %v9002_v44 = vperm.slane %v4943_v48, 0 }
 0x49c   : > { %v4246_v8 = vmul.f32 %v8669_v6, %v4181_v62  ;;  %v4591_v56 = vmul.f32 %v4451_v39, %v4451_v39  ;;  %v9007_v39 = vperm.slane %v4943_v48, 1 }
 0x49d   : > { %v4247_v58 = vmul.f32 %v8669_v6, %v4182_v24  ;;  %v4655_v63 = vmul.f32 %v8988_v59, %v4590_v31 }
 0x49e   : > { %v8995_v50 = vadd.f32 %v4246_v8, %v8676_v52  ;;  %v4656_v28 = vmul.f32 %v8988_v59, %v4591_v56 }
 0x49f   : > { %v8999_v47 = vadd.f32 %v4247_v58, %v8682_v30  ;;  %v4719_v32 = vadd.f32 %v4655_v63, %v8685_v42 }
 0x4a0   : > { %9700 = vst [vmem:[#allocation42_spill] sm:$0xff] %v8995_v50  ;;  %v4720_v62 = vadd.f32 %v4656_v28, %v8690_v36 }
 0x4a1   : > { %9701 = vst [vmem:[#allocation43_spill] sm:$0xff] %v8999_v47  ;;  %v4500_v6 = vpop.f32.mrf.mxu2  ;;  %v4879_v24 = vmul.f32 %v4802_v54, %v4719_v32  ;;  %v9702_v32 = vld [vmem:[#allocation25_spill] sm:$0xff] }
 0x4a2   : > { %v4592_v31 = vmul.f32 %v4500_v6, %v4500_v6  ;;  %v4549_v52 = vpop.f32.mrf.mxu3  ;;  %v4880_v8 = vmul.f32 %v4802_v54, %v4720_v62  ;;  %v4404_v50 = vpop.f32.mrf.mxu0  ;;  %v9018_v6 = vperm.slane %v4943_v48, 2 }
 0x4a3   : > { %v4593_v56 = vmul.f32 %v4549_v52, %v4549_v52  ;;  %v4953_v30 = vmul.f32 %v9002_v44, %v4879_v24  ;;  %v4594_v58 = vmul.f32 %v4404_v50, %v4404_v50  ;;  %v4453_v47 = vpop.f32.mrf.mxu1  ;;  %v4807_v24 = vpop.permute.xlu0 %4806 }
 0x4a4   : > { %v4657_v42 = vmul.f32 %v8988_v59, %v4592_v31  ;;  %v4954_v63 = vmul.f32 %v9007_v39, %v4880_v8  ;;  %v4595_v16 = vmul.f32 %v4453_v47, %v4453_v47  ;;  %v9023_v47 = vperm.slane %v4943_v48, 3 }
 0x4a5   : > { %v4658_v36 = vmul.f32 %v8988_v59, %v4593_v56  ;;  %5017 = vst [vmem:[%s9013_s11] sm:$0xff] %v4953_v30  ;;  %v4659_v28 = vmul.f32 %v8988_v59, %v4594_v58 }
 0x4a6   : > { %v4721_v62 = vadd.f32 %v4657_v42, %v9702_v32  ;;  %5018 = vst [vmem:[%s9013_s11 + $0x8] sm:$0xff] %v4954_v63  ;;  %v4660_v50 = vmul.f32 %v8988_v59, %v4595_v16 }
 0x4a7   : > { %v4722_v31 = vadd.f32 %v4658_v36, %v8700_v20  ;;  %v4723_v52 = vadd.f32 %v4659_v28, %v8703_v61 }
 0x4a8   : > { %v4881_v8 = vmul.f32 %v4802_v54, %v4721_v62  ;;  %v4724_v56 = vadd.f32 %v4660_v50, %v8707_v26  ;;  %v4812_v50 = vpop.permute.xlu1 %4811 }
 0x4a9   : > { %v4882_v30 = vmul.f32 %v4802_v54, %v4722_v31  ;;  %v4502_v58 = vpop.f32.mrf.mxu2  ;;  %v4883_v3 = vmul.f32 %v4807_v24, %v4723_v52 }
 0x4aa   : > { %v4955_v42 = vmul.f32 %v9018_v6, %v4881_v8  ;;  %v4596_v63 = vmul.f32 %v4502_v58, %v4502_v58  ;;  %v4551_v32 = vpop.f32.mrf.mxu3  ;;  %v4884_v16 = vmul.f32 %v4807_v24, %v4724_v56  ;;  %v4407_v0 = vpop.f32.mrf.mxu0 }
 0x4ab   : > { %v4956_v20 = vmul.f32 %v9023_v47, %v4882_v30  ;;  %v4597_v48 = vmul.f32 %v4551_v32, %v4551_v32  ;;  %v4957_v61 = vmul.f32 %v9002_v44, %v4883_v3  ;;  %v4598_v36 = vmul.f32 %v4407_v0, %v4407_v0  ;;  %v4456_v28 = vpop.f32.mrf.mxu1 }
 0x4ac   : > { %5019 = vst [vmem:[%s9013_s11 + $0x10] sm:$0xff] %v4955_v42  ;;  %v4661_v26 = vmul.f32 %v8988_v59, %v4596_v63  ;;  %v4958_v54 = vmul.f32 %v9007_v39, %v4884_v16  ;;  %v4599_v62 = vmul.f32 %v4456_v28, %v4456_v28 }
 0x4ad   : > { %5020 = vst [vmem:[%s9013_s11 + $0x18] sm:$0xff] %v4956_v20  ;;  %v4662_v31 = vmul.f32 %v8988_v59, %v4597_v48  ;;  %v4663_v52 = vmul.f32 %v8988_v59, %v4598_v36 }
 0x4ae   : > { %v4725_v8 = vadd.f32 %v4661_v26, %v8715_v45  ;;  %5021 = vst [vmem:[%s9013_s11 + $0x20] sm:$0xff] %v4957_v61  ;;  %v4664_v56 = vmul.f32 %v8988_v59, %v4599_v62 }
 0x4af   : > { %v4726_v0 = vadd.f32 %v4662_v31, %v8721_v17  ;;  %5022 = vst [vmem:[%s9013_s11 + $0x28] sm:$0xff] %v4958_v54  ;;  %v4727_v3 = vadd.f32 %v4663_v52, %v8724_v9 }
 0x4b0   : > { %v4885_v30 = vmul.f32 %v4807_v24, %v4725_v8  ;;  %v4728_v58 = vadd.f32 %v4664_v56, %v8728_v35  ;;  %v4817_v56 = vpop.permute.xlu1 %4816 }
 0x4b1   : > { %v4886_v42 = vmul.f32 %v4807_v24, %v4726_v0  ;;  %v4505_v63 = vpop.f32.mrf.mxu2  ;;  %v4887_v32 = vmul.f32 %v4812_v50, %v4727_v3 }
 0x4b2   : > { %v4959_v16 = vmul.f32 %v9018_v6, %v4885_v30  ;;  %v4600_v20 = vmul.f32 %v4505_v63, %v4505_v63  ;;  %v4554_v45 = vpop.f32.mrf.mxu3  ;;  %v4888_v48 = vmul.f32 %v4812_v50, %v4728_v58  ;;  %v4409_v61 = vpop.f32.mrf.mxu0 }
 0x4b3   : > { %v4960_v17 = vmul.f32 %v9023_v47, %v4886_v42  ;;  %v4601_v36 = vmul.f32 %v4554_v45, %v4554_v45  ;;  %v4961_v9 = vmul.f32 %v9002_v44, %v4887_v32  ;;  %v4602_v28 = vmul.f32 %v4409_v61, %v4409_v61  ;;  %v4458_v26 = vpop.f32.mrf.mxu1 }
 0x4b4   : > { %5023 = vst [vmem:[%s9013_s11 + $0x30] sm:$0xff] %v4959_v16  ;;  %v4665_v35 = vmul.f32 %v8988_v59, %v4600_v20  ;;  %v4962_v24 = vmul.f32 %v9007_v39, %v4888_v48  ;;  %v4603_v54 = vmul.f32 %v4458_v26, %v4458_v26 }
 0x4b5   : > { %5024 = vst [vmem:[%s9013_s11 + $0x38] sm:$0xff] %v4960_v17  ;;  %v4666_v62 = vmul.f32 %v8988_v59, %v4601_v36  ;;  %v4667_v31 = vmul.f32 %v8988_v59, %v4602_v28  ;;  %v4822_v28 = vpop.permute.xlu2 %4821 }
 0x4b6   : > { %v4729_v52 = vadd.f32 %v4665_v35, %v8734_v46  ;;  %5025 = vst [vmem:[%s9013_s11 + $0x40] sm:$0xff] %v4961_v9  ;;  %v4668_v8 = vmul.f32 %v8988_v59, %v4603_v54 }
 0x4b7   : > { %v4730_v0 = vadd.f32 %v4666_v62, %v8738_v40  ;;  %5026 = vst [vmem:[%s9013_s11 + $0x48] sm:$0xff] %v4962_v24  ;;  %v4731_v3 = vadd.f32 %v4667_v31, %v8741_v29 }
 0x4b8   : > { %v4889_v30 = vmul.f32 %v4812_v50, %v4729_v52  ;;  %v4732_v58 = vadd.f32 %v4668_v8, %v8744_v33 }
 0x4b9   : > { %v4890_v42 = vmul.f32 %v4812_v50, %v4730_v0  ;;  %v4507_v63 = vpop.f32.mrf.mxu2  ;;  %v4891_v32 = vmul.f32 %v4817_v56, %v4731_v3 }
 0x4ba   : > { %v4963_v16 = vmul.f32 %v9018_v6, %v4889_v30  ;;  %v4604_v46 = vmul.f32 %v4507_v63, %v4507_v63  ;;  %v4556_v20 = vpop.f32.mrf.mxu3  ;;  %v4892_v45 = vmul.f32 %v4817_v56, %v4732_v58  ;;  %v4412_v48 = vpop.f32.mrf.mxu0 }
 0x4bb   : > { %v4964_v40 = vmul.f32 %v9023_v47, %v4890_v42  ;;  %v4605_v61 = vmul.f32 %v4556_v20, %v4556_v20  ;;  %v4965_v29 = vmul.f32 %v9002_v44, %v4891_v32  ;;  %v4606_v17 = vmul.f32 %v4412_v48, %v4412_v48  ;;  %v4461_v36 = vpop.f32.mrf.mxu1 }
 0x4bc   : > { %5027 = vst [vmem:[%s9013_s11 + $0x50] sm:$0xff] %v4963_v16  ;;  %v4669_v33 = vmul.f32 %v8988_v59, %v4604_v46  ;;  %v4966_v50 = vmul.f32 %v9007_v39, %v4892_v45  ;;  %v4607_v9 = vmul.f32 %v4461_v36, %v4461_v36 }
 0x4bd   : > { %5028 = vst [vmem:[%s9013_s11 + $0x58] sm:$0xff] %v4964_v40  ;;  %v4670_v26 = vmul.f32 %v8988_v59, %v4605_v61  ;;  %v4671_v35 = vmul.f32 %v8988_v59, %v4606_v17  ;;  %v4827_v17 = vpop.permute.xlu2 %4826 }
 0x4be   : > { %v4733_v24 = vadd.f32 %v4669_v33, %v8752_v41  ;;  %5029 = vst [vmem:[%s9013_s11 + $0x60] sm:$0xff] %v4965_v29  ;;  %v4672_v54 = vmul.f32 %v8988_v59, %v4607_v9 }
 0x4bf   : > { %v4734_v62 = vadd.f32 %v4670_v26, %v8758_v55  ;;  %5030 = vst [vmem:[%s9013_s11 + $0x68] sm:$0xff] %v4966_v50  ;;  %v4735_v31 = vadd.f32 %v4671_v35, %v8761_v57 }
 0x4c0   : > { %v4893_v52 = vmul.f32 %v4817_v56, %v4733_v24  ;;  %v4736_v8 = vadd.f32 %v4672_v54, %v8766_v25 }
 0x4c1   : > { %v4894_v0 = vmul.f32 %v4817_v56, %v4734_v62  ;;  %v4510_v3 = vpop.f32.mrf.mxu2  ;;  %v4895_v30 = vmul.f32 %v4822_v28, %v4735_v31 }
 0x4c2   : > { %v4967_v58 = vmul.f32 %v9018_v6, %v4893_v52  ;;  %v4608_v42 = vmul.f32 %v4510_v3, %v4510_v3  ;;  %v4559_v41 = vpop.f32.mrf.mxu3  ;;  %v4896_v63 = vmul.f32 %v4822_v28, %v4736_v8  ;;  %v4414_v32 = vpop.f32.mrf.mxu0 }
 0x4c3   : > { %v4968_v55 = vmul.f32 %v9023_v47, %v4894_v0  ;;  %v4609_v16 = vmul.f32 %v4559_v41, %v4559_v41  ;;  %v4969_v57 = vmul.f32 %v9002_v44, %v4895_v30  ;;  %v4610_v46 = vmul.f32 %v4414_v32, %v4414_v32  ;;  %v4463_v20 = vpop.f32.mrf.mxu1  ;;  %v4832_v32 = vpop.permute.xlu0 %4831 }
 0x4c4   : > { %5031 = vst [vmem:[%s9013_s11 + $0x70] sm:$0xff] %v4967_v58  ;;  %v4673_v25 = vmul.f32 %v8988_v59, %v4608_v42  ;;  %v4970_v56 = vmul.f32 %v9007_v39, %v4896_v63  ;;  %v4611_v45 = vmul.f32 %v4463_v20, %v4463_v20 }
 0x4c5   : > { %5032 = vst [vmem:[%s9013_s11 + $0x78] sm:$0xff] %v4968_v55  ;;  %v4674_v48 = vmul.f32 %v8988_v59, %v4609_v16  ;;  %v4675_v40 = vmul.f32 %v8988_v59, %v4610_v46  ;;  %v9703_v46 = vld [vmem:[#allocation26_spill] sm:$0xff] }
 0x4c6   : > { %v4737_v61 = vadd.f32 %v4673_v25, %v8772_v49  ;;  %5033 = vst [vmem:[%s9013_s11 + $0x80] sm:$0xff] %v4969_v57  ;;  %v4676_v29 = vmul.f32 %v8988_v59, %v4611_v45 }
 0x4c7   : > { %v4738_v36 = vadd.f32 %v4674_v48, %v8776_v60  ;;  %5034 = vst [vmem:[%s9013_s11 + $0x88] sm:$0xff] %v4970_v56  ;;  %v4739_v33 = vadd.f32 %v4675_v40, %v8779_v34 }
 0x4c8   : > { %v4897_v50 = vmul.f32 %v4822_v28, %v4737_v61  ;;  %v4740_v9 = vadd.f32 %v4676_v29, %v8784_v4 }
 0x4c9   : > { %v4898_v26 = vmul.f32 %v4822_v28, %v4738_v36  ;;  %v4512_v35 = vpop.f32.mrf.mxu2  ;;  %v4899_v24 = vmul.f32 %v4827_v17, %v4739_v33 }
 0x4ca   : > { %v4971_v54 = vmul.f32 %v9018_v6, %v4897_v50  ;;  %v4612_v49 = vmul.f32 %v4512_v35, %v4512_v35  ;;  %v4561_v62 = vpop.f32.mrf.mxu3  ;;  %v4900_v31 = vmul.f32 %v4827_v17, %v4740_v9  ;;  %v4417_v52 = vpop.f32.mrf.mxu0 }
 0x4cb   : > { %v4972_v60 = vmul.f32 %v9023_v47, %v4898_v26  ;;  %v4613_v8 = vmul.f32 %v4561_v62, %v4561_v62  ;;  %v4973_v34 = vmul.f32 %v9002_v44, %v4899_v24  ;;  %v4614_v0 = vmul.f32 %v4417_v52, %v4417_v52  ;;  %v4466_v3 = vpop.f32.mrf.mxu1  ;;  %v4837_v62 = vpop.permute.xlu1 %4836  ;;  %v9704_v52 = vld [vmem:[#allocation27_spill] sm:$0xff] }
 0x4cc   : > { %5035 = vst [vmem:[%s9013_s11 + $0x90] sm:$0xff] %v4971_v54  ;;  %v4677_v4 = vmul.f32 %v8988_v59, %v4612_v49  ;;  %v4974_v28 = vmul.f32 %v9007_v39, %v4900_v31  ;;  %v4615_v30 = vmul.f32 %v4466_v3, %v4466_v3 }
 0x4cd   : > { %5036 = vst [vmem:[%s9013_s11 + $0x98] sm:$0xff] %v4972_v60  ;;  %v4678_v58 = vmul.f32 %v8988_v59, %v4613_v8  ;;  %v4679_v42 = vmul.f32 %v8988_v59, %v4614_v0 }
 0x4ce   : > { %v4741_v41 = vadd.f32 %v4677_v4, %v8792_v27  ;;  %5037 = vst [vmem:[%s9013_s11 + $0xa0] sm:$0xff] %v4973_v34  ;;  %v4680_v63 = vmul.f32 %v8988_v59, %v4615_v30  ;;  %v9705_v34 = vld [vmem:[#allocation28_spill] sm:$0xff] }
 0x4cf   : > { %v4742_v55 = vadd.f32 %v4678_v58, %v8798_v14  ;;  %5038 = vst [vmem:[%s9013_s11 + $0xa8] sm:$0xff] %v4974_v28  ;;  %v4743_v16 = vadd.f32 %v4679_v42, %v8801_v18 }
 0x4d0   : > { %v4901_v57 = vmul.f32 %v4827_v17, %v4741_v41  ;;  %v4744_v20 = vadd.f32 %v4680_v63, %v9703_v46 }
 0x4d1   : > { %v4902_v25 = vmul.f32 %v4827_v17, %v4742_v55  ;;  %v4515_v56 = vpop.f32.mrf.mxu2  ;;  %v4903_v45 = vmul.f32 %v4832_v32, %v4743_v16 }
 0x4d2   : > { %v4975_v48 = vmul.f32 %v9018_v6, %v4901_v57  ;;  %v4616_v27 = vmul.f32 %v4515_v56, %v4515_v56  ;;  %v4564_v40 = vpop.f32.mrf.mxu3  ;;  %v4904_v61 = vmul.f32 %v4832_v32, %v4744_v20  ;;  %v4419_v29 = vpop.f32.mrf.mxu0 }
 0x4d3   : > { %v4976_v14 = vmul.f32 %v9023_v47, %v4902_v25  ;;  %v4617_v36 = vmul.f32 %v4564_v40, %v4564_v40  ;;  %v4977_v18 = vmul.f32 %v9002_v44, %v4903_v45  ;;  %v4618_v33 = vmul.f32 %v4419_v29, %v4419_v29  ;;  %v4468_v50 = vpop.f32.mrf.mxu1  ;;  %v9706_v45 = vld [vmem:[#allocation29_spill] sm:$0xff]  ;;  %v4842_v40 = vpop.permute.xlu2 %4841 }
 0x4d4   : > { %5039 = vst [vmem:[%s9013_s11 + $0xb0] sm:$0xff] %v4975_v48  ;;  %v4681_v17 = vmul.f32 %v8988_v59, %v4616_v27  ;;  %v4978_v9 = vmul.f32 %v9007_v39, %v4904_v61  ;;  %v4619_v26 = vmul.f32 %v4468_v50, %v4468_v50  ;;  %v9707_v61 = vld [vmem:[#allocation30_spill] sm:$0xff] }
 0x4d5   : > { %5040 = vst [vmem:[%s9013_s11 + $0xb8] sm:$0xff] %v4976_v14  ;;  %v4682_v35 = vmul.f32 %v8988_v59, %v4617_v36  ;;  %v4683_v24 = vmul.f32 %v8988_v59, %v4618_v33  ;;  %v9708_v14 = vld [vmem:[#allocation31_spill] sm:$0xff]  ;;  %v9709_v33 = vld [vmem:[#allocation32_spill] sm:$0xff] }
 0x4d6   : > { %v4745_v54 = vadd.f32 %v4681_v17, %v8813_v38  ;;  %5041 = vst [vmem:[%s9013_s11 + $0xc0] sm:$0xff] %v4977_v18  ;;  %v4684_v49 = vmul.f32 %v8988_v59, %v4619_v26 }
 0x4d7   : > { %v4746_v31 = vadd.f32 %v4682_v35, %v8817_v37  ;;  %5042 = vst [vmem:[%s9013_s11 + $0xc8] sm:$0xff] %v4978_v9  ;;  %v4747_v60 = vadd.f32 %v4683_v24, %v9704_v52 }
 0x4d8   : > { %v4905_v8 = vmul.f32 %v4832_v32, %v4745_v54  ;;  %v4748_v0 = vadd.f32 %v4684_v49, %v9705_v34 }
 0x4d9   : > { %v4906_v3 = vmul.f32 %v4832_v32, %v4746_v31  ;;  %v4517_v4 = vpop.f32.mrf.mxu2  ;;  %v4907_v28 = vmul.f32 %v4837_v62, %v4747_v60 }
 0x4da   : > { %v4979_v30 = vmul.f32 %v9018_v6, %v4905_v8  ;;  %v4620_v38 = vmul.f32 %v4517_v4, %v4517_v4  ;;  %v4566_v58 = vpop.f32.mrf.mxu3  ;;  %v4908_v42 = vmul.f32 %v4837_v62, %v4748_v0  ;;  %v4422_v41 = vpop.f32.mrf.mxu0 }
 0x4db   : > { %v4980_v37 = vmul.f32 %v9023_v47, %v4906_v3  ;;  %v4621_v63 = vmul.f32 %v4566_v58, %v4566_v58  ;;  %v4981_v55 = vmul.f32 %v9002_v44, %v4907_v28  ;;  %v4622_v16 = vmul.f32 %v4422_v41, %v4422_v41  ;;  %v4471_v57 = vpop.f32.mrf.mxu1 }
 0x4dc   : > { %5043 = vst [vmem:[%s9013_s11 + $0xd0] sm:$0xff] %v4979_v30  ;;  %v4685_v32 = vmul.f32 %v8988_v59, %v4620_v38  ;;  %v4982_v46 = vmul.f32 %v9007_v39, %v4908_v42  ;;  %v4623_v20 = vmul.f32 %v4471_v57, %v4471_v57  ;;  %v9710_v38 = vld [vmem:[#allocation33_spill] sm:$0xff] }
 0x4dd   : > { %5044 = vst [vmem:[%s9013_s11 + $0xd8] sm:$0xff] %v4980_v37  ;;  %v4686_v25 = vmul.f32 %v8988_v59, %v4621_v63  ;;  %v4687_v56 = vmul.f32 %v8988_v59, %v4622_v16  ;;  %v4847_v16 = vpop.permute.xlu0 %4846 }
 0x4de   : > { %v4749_v48 = vadd.f32 %v4685_v32, %v9706_v45  ;;  %5045 = vst [vmem:[%s9013_s11 + $0xe0] sm:$0xff] %v4981_v55  ;;  %v4688_v27 = vmul.f32 %v8988_v59, %v4623_v20 }
 0x4df   : > { %v4750_v29 = vadd.f32 %v4686_v25, %v9707_v61  ;;  %5046 = vst [vmem:[%s9013_s11 + $0xe8] sm:$0xff] %v4982_v46  ;;  %v4751_v36 = vadd.f32 %v4687_v56, %v9708_v14 }
 0x4e0   : > { %v4909_v18 = vmul.f32 %v4837_v62, %v4749_v48  ;;  %v4752_v50 = vadd.f32 %v4688_v27, %v9709_v33  ;;  %v9711_v33 = vld [vmem:[#allocation34_spill] sm:$0xff] }
 0x4e1   : > { %v4910_v17 = vmul.f32 %v4837_v62, %v4750_v29  ;;  %v4520_v9 = vpop.f32.mrf.mxu2  ;;  %v4911_v26 = vmul.f32 %v4842_v40, %v4751_v36 }
 0x4e2   : > { %v4983_v35 = vmul.f32 %v9018_v6, %v4909_v18  ;;  %v4624_v24 = vmul.f32 %v4520_v9, %v4520_v9  ;;  %v4569_v54 = vpop.f32.mrf.mxu3  ;;  %v4912_v49 = vmul.f32 %v4842_v40, %v4752_v50  ;;  %v4424_v31 = vpop.f32.mrf.mxu0 }
 0x4e3   : > { %v4984_v52 = vmul.f32 %v9023_v47, %v4910_v17  ;;  %v4625_v60 = vmul.f32 %v4569_v54, %v4569_v54  ;;  %v4985_v8 = vmul.f32 %v9002_v44, %v4911_v26  ;;  %v4626_v34 = vmul.f32 %v4424_v31, %v4424_v31  ;;  %v4473_v0 = vpop.f32.mrf.mxu1  ;;  %v4852_v9 = vpop.permute.xlu1 %4851  ;;  %v9712_v54 = vld [vmem:[#allocation35_spill] sm:$0xff] }
 0x4e4   : > { %5047 = vst [vmem:[%s9013_s11 + $0xf0] sm:$0xff] %v4983_v35  ;;  %v4689_v62 = vmul.f32 %v8988_v59, %v4624_v24  ;;  %v4986_v3 = vmul.f32 %v9007_v39, %v4912_v49  ;;  %v4627_v4 = vmul.f32 %v4473_v0, %v4473_v0 }
 0x4e5   : > { %5048 = vst [vmem:[%s9013_s11 + $0xf8] sm:$0xff] %v4984_v52  ;;  %v4690_v28 = vmul.f32 %v8988_v59, %v4625_v60  ;;  %v4691_v30 = vmul.f32 %v8988_v59, %v4626_v34 }
 0x4e6   : > { %v4753_v58 = vadd.f32 %v4689_v62, %v9710_v38  ;;  %5049 = vst [vmem:[%s9013_s11 + $0x100] sm:$0xff] %v4985_v8  ;;  %v4692_v42 = vmul.f32 %v8988_v59, %v4627_v4 }
 0x4e7   : > { %v4754_v41 = vadd.f32 %v4690_v28, %v8857_v43  ;;  %5050 = vst [vmem:[%s9013_s11 + $0x108] sm:$0xff] %v4986_v3  ;;  %v4755_v37 = vadd.f32 %v4691_v30, %v8860_v15 }
 0x4e8   : > { %v4913_v63 = vmul.f32 %v4842_v40, %v4753_v58  ;;  %v4756_v55 = vadd.f32 %v4692_v42, %v8864_v13 }
 0x4e9   : > { %v4914_v57 = vmul.f32 %v4842_v40, %v4754_v41  ;;  %v4915_v32 = vmul.f32 %v4847_v16, %v4755_v37  ;;  %v4522_v46 = vpop.f32.mrf.mxu2 }
 0x4ea   : > { %v4987_v20 = vmul.f32 %v9018_v6, %v4913_v63  ;;  %v4916_v25 = vmul.f32 %v4847_v16, %v4756_v55  ;;  %v4628_v56 = vmul.f32 %v4522_v46, %v4522_v46  ;;  %v4571_v45 = vpop.f32.mrf.mxu3  ;;  %v4427_v48 = vpop.f32.mrf.mxu0  ;;  %v9713_v63 = vld [vmem:[#allocation36_spill] sm:$0xff] }
 0x4eb   : > { %v4988_v43 = vmul.f32 %v9023_v47, %v4914_v57  ;;  %v4989_v15 = vmul.f32 %v9002_v44, %v4915_v32  ;;  %v4629_v27 = vmul.f32 %v4571_v45, %v4571_v45  ;;  %v4630_v61 = vmul.f32 %v4427_v48, %v4427_v48  ;;  %v4476_v13 = vpop.f32.mrf.mxu1 }
 0x4ec   : > { %5051 = vst [vmem:[%s9013_s11 + $0x110] sm:$0xff] %v4987_v20  ;;  %v4990_v40 = vmul.f32 %v9007_v39, %v4916_v25  ;;  %v4693_v29 = vmul.f32 %v8988_v59, %v4628_v56  ;;  %v4631_v14 = vmul.f32 %v4476_v13, %v4476_v13  ;;  %v4857_v25 = vpop.permute.xlu2 %4856 }
 0x4ed   : > { %5052 = vst [vmem:[%s9013_s11 + $0x118] sm:$0xff] %v4988_v43  ;;  %v4694_v36 = vmul.f32 %v8988_v59, %v4629_v27  ;;  %v4695_v18 = vmul.f32 %v8988_v59, %v4630_v61 }
 0x4ee   : > { %5053 = vst [vmem:[%s9013_s11 + $0x120] sm:$0xff] %v4989_v15  ;;  %v4757_v50 = vadd.f32 %v4693_v29, %v9711_v33  ;;  %v4696_v17 = vmul.f32 %v8988_v59, %v4631_v14 }
 0x4ef   : > { %5054 = vst [vmem:[%s9013_s11 + $0x128] sm:$0xff] %v4990_v40  ;;  %v4758_v26 = vadd.f32 %v4694_v36, %v8879_v7  ;;  %v4759_v35 = vadd.f32 %v4695_v18, %v8882_v19 }
 0x4f0   : > { %v4917_v24 = vmul.f32 %v4847_v16, %v4757_v50  ;;  %v4760_v49 = vadd.f32 %v4696_v17, %v9712_v54  ;;  %v4862_v54 = vpop.permute.xlu0 %4861 }
 0x4f1   : > { %v4918_v31 = vmul.f32 %v4847_v16, %v4758_v26  ;;  %v4525_v52 = vpop.f32.mrf.mxu2  ;;  %v4919_v60 = vmul.f32 %v4852_v9, %v4759_v35  ;;  %v9714_v35 = vld [vmem:[#allocation37_spill] sm:$0xff] }
 0x4f2   : > { %v4991_v8 = vmul.f32 %v9018_v6, %v4917_v24  ;;  %v4632_v34 = vmul.f32 %v4525_v52, %v4525_v52  ;;  %v4574_v0 = vpop.f32.mrf.mxu3  ;;  %v4920_v62 = vmul.f32 %v4852_v9, %v4760_v49  ;;  %v4429_v3 = vpop.f32.mrf.mxu0 }
 0x4f3   : > { %v4992_v4 = vmul.f32 %v9023_v47, %v4918_v31  ;;  %v4633_v7 = vmul.f32 %v4574_v0, %v4574_v0  ;;  %v4993_v19 = vmul.f32 %v9002_v44, %v4919_v60  ;;  %v4634_v28 = vmul.f32 %v4429_v3, %v4429_v3  ;;  %v4478_v30 = vpop.f32.mrf.mxu1 }
 0x4f4   : > { %5055 = vst [vmem:[%s9013_s11 + $0x130] sm:$0xff] %v4991_v8  ;;  %v4697_v38 = vmul.f32 %v8988_v59, %v4632_v34  ;;  %v4994_v58 = vmul.f32 %v9007_v39, %v4920_v62  ;;  %v4635_v42 = vmul.f32 %v4478_v30, %v4478_v30 }
 0x4f5   : > { %5056 = vst [vmem:[%s9013_s11 + $0x138] sm:$0xff] %v4992_v4  ;;  %v4698_v41 = vmul.f32 %v8988_v59, %v4633_v7  ;;  %v4699_v37 = vmul.f32 %v8988_v59, %v4634_v28 }
 0x4f6   : > { %v4761_v55 = vadd.f32 %v4697_v38, %v9713_v63  ;;  %5057 = vst [vmem:[%s9013_s11 + $0x140] sm:$0xff] %v4993_v19  ;;  %v4700_v16 = vmul.f32 %v8988_v59, %v4635_v42 }
 0x4f7   : > { %v4762_v57 = vadd.f32 %v4698_v41, %v8896_v11  ;;  %5058 = vst [vmem:[%s9013_s11 + $0x148] sm:$0xff] %v4994_v58  ;;  %v4763_v32 = vadd.f32 %v4699_v37, %v8899_v12  ;;  %v9715_v41 = vld [vmem:[#allocation38_spill] sm:$0xff] }
 0x4f8   : > { %v4921_v46 = vmul.f32 %v4852_v9, %v4761_v55  ;;  %v4764_v20 = vadd.f32 %v4700_v16, %v8902_v22 }
 0x4f9   : > { %v4922_v56 = vmul.f32 %v4852_v9, %v4762_v57  ;;  %v4923_v45 = vmul.f32 %v4857_v25, %v4763_v32  ;;  %v4527_v48 = vpop.f32.mrf.mxu2  ;;  %v4867_v57 = vpop.permute.xlu1 %4866 }
 0x4fa   : > { %v4995_v43 = vmul.f32 %v9018_v6, %v4921_v46  ;;  %v4924_v15 = vmul.f32 %v4857_v25, %v4764_v20  ;;  %v4636_v27 = vmul.f32 %v4527_v48, %v4527_v48  ;;  %v4576_v61 = vpop.f32.mrf.mxu3  ;;  %v4432_v13 = vpop.f32.mrf.mxu0 }
 0x4fb   : > { %v4996_v11 = vmul.f32 %v9023_v47, %v4922_v56  ;;  %v4997_v12 = vmul.f32 %v9002_v44, %v4923_v45  ;;  %v4637_v40 = vmul.f32 %v4576_v61, %v4576_v61  ;;  %v4638_v29 = vmul.f32 %v4432_v13, %v4432_v13  ;;  %v4481_v22 = vpop.f32.mrf.mxu1 }
 0x4fc   : > { %5059 = vst [vmem:[%s9013_s11 + $0x150] sm:$0xff] %v4995_v43  ;;  %v4998_v14 = vmul.f32 %v9007_v39, %v4924_v15  ;;  %v4701_v36 = vmul.f32 %v8988_v59, %v4636_v27  ;;  %v4639_v18 = vmul.f32 %v4481_v22, %v4481_v22 }
 0x4fd   : > { %5060 = vst [vmem:[%s9013_s11 + $0x158] sm:$0xff] %v4996_v11  ;;  %v4702_v33 = vmul.f32 %v8988_v59, %v4637_v40  ;;  %v4703_v50 = vmul.f32 %v8988_v59, %v4638_v29 }
 0x4fe   : > { %5061 = vst [vmem:[%s9013_s11 + $0x160] sm:$0xff] %v4997_v12  ;;  %v4765_v17 = vadd.f32 %v4701_v36, %v8911_v51  ;;  %v4704_v9 = vmul.f32 %v8988_v59, %v4639_v18 }
 0x4ff   : > { %5062 = vst [vmem:[%s9013_s11 + $0x168] sm:$0xff] %v4998_v14  ;;  %v4766_v26 = vadd.f32 %v4702_v33, %v8917_v1  ;;  %v4767_v24 = vadd.f32 %v4703_v50, %v9714_v35  ;;  %v9716_v14 = vld [vmem:[#allocation19_spill] sm:$0xff] }
 0x500   : > { %v4925_v49 = vmul.f32 %v4857_v25, %v4765_v17  ;;  %v4768_v31 = vadd.f32 %v4704_v9, %v8924_v53  ;;  %v4872_v17 = vpop.permute.xlu2 %4871 }
 0x501   : > { %v4926_v52 = vmul.f32 %v4857_v25, %v4766_v26  ;;  %v4927_v60 = vmul.f32 %v4862_v54, %v4767_v24  ;;  %v4530_v8 = vpop.f32.mrf.mxu2  ;;  %v9717_v26 = vld [vmem:[#allocation17_spill] sm:$0xff] }
 0x502   : > { %v4999_v34 = vmul.f32 %v9018_v6, %v4925_v49  ;;  %v4928_v0 = vmul.f32 %v4862_v54, %v4768_v31  ;;  %v4640_v51 = vmul.f32 %v4530_v8, %v4530_v8  ;;  %v4579_v62 = vpop.f32.mrf.mxu3  ;;  %v4434_v3 = vpop.f32.mrf.mxu0 }
 0x503   : > { %v5000_v1 = vmul.f32 %v9023_v47, %v4926_v52  ;;  %v5001_v4 = vmul.f32 %v9002_v44, %v4927_v60  ;;  %v4641_v7 = vmul.f32 %v4579_v62, %v4579_v62  ;;  %v4642_v19 = vmul.f32 %v4434_v3, %v4434_v3  ;;  %v4483_v28 = vpop.f32.mrf.mxu1 }
 0x504   : > { %5063 = vst [vmem:[%s9013_s11 + $0x170] sm:$0xff] %v4999_v34  ;;  %v5002_v53 = vmul.f32 %v9007_v39, %v4928_v0  ;;  %v4705_v30 = vmul.f32 %v8988_v59, %v4640_v51  ;;  %v4643_v38 = vmul.f32 %v4483_v28, %v4483_v28  ;;  %v9718_v28 = vld [vmem:[#allocation18_spill] sm:$0xff] }
 0x505   : > { %5064 = vst [vmem:[%s9013_s11 + $0x178] sm:$0xff] %v5000_v1  ;;  %v4706_v58 = vmul.f32 %v8988_v59, %v4641_v7  ;;  %v4707_v42 = vmul.f32 %v8988_v59, %v4642_v19 }
 0x506   : > { %5065 = vst [vmem:[%s9013_s11 + $0x180] sm:$0xff] %v5001_v4  ;;  %v4769_v37 = vadd.f32 %v4705_v30, %v9715_v41  ;;  %v4708_v63 = vmul.f32 %v8988_v59, %v4643_v38  ;;  %v9719_v38 = vld [vmem:[#allocation39_spill] sm:$0xff] }
 0x507   : > { %5066 = vst [vmem:[%s9013_s11 + $0x188] sm:$0xff] %v5002_v53  ;;  %v4770_v55 = vadd.f32 %v4706_v58, %v8935_v10  ;;  %v4771_v16 = vadd.f32 %v4707_v42, %v8938_v23  ;;  %v9720_v42 = vld [vmem:[#allocation40_spill] sm:$0xff] }
 0x508   : > { %v4929_v32 = vmul.f32 %v4862_v54, %v4769_v37  ;;  %v4772_v46 = vadd.f32 %v4708_v63, %v8941_v2  ;;  %v4877_v37 = vpop.permute.xlu0 %4876 }
 0x509   : > { %v4930_v20 = vmul.f32 %v4862_v54, %v4770_v55  ;;  %v4931_v25 = vmul.f32 %v4867_v57, %v4771_v16  ;;  %v4532_v56 = vpop.f32.mrf.mxu2  ;;  %v9721_v55 = vld [vmem:[#allocation41_spill] sm:$0xff] }
 0x50a   : > { %v5003_v45 = vmul.f32 %v9018_v6, %v4929_v32  ;;  %v4932_v48 = vmul.f32 %v4867_v57, %v4772_v46  ;;  %v4644_v43 = vmul.f32 %v4532_v56, %v4532_v56  ;;  %v4581_v15 = vpop.f32.mrf.mxu3  ;;  %v4437_v27 = vpop.f32.mrf.mxu0 }
 0x50b   : > { %v5004_v10 = vmul.f32 %v9023_v47, %v4930_v20  ;;  %v5005_v23 = vmul.f32 %v9002_v44, %v4931_v25  ;;  %v4645_v61 = vmul.f32 %v4581_v15, %v4581_v15  ;;  %v4646_v13 = vmul.f32 %v4437_v27, %v4437_v27  ;;  %v4486_v11 = vpop.f32.mrf.mxu1 }
 0x50c   : > { %5067 = vst [vmem:[%s9013_s11 + $0x190] sm:$0xff] %v5003_v45  ;;  %v5006_v2 = vmul.f32 %v9007_v39, %v4932_v48  ;;  %v4709_v12 = vmul.f32 %v8988_v59, %v4644_v43  ;;  %v4647_v40 = vmul.f32 %v4486_v11, %v4486_v11  ;;  %v9724_v11 = vld [vmem:[#allocation43_spill] sm:$0xff] }
 0x50d   : > { %5068 = vst [vmem:[%s9013_s11 + $0x198] sm:$0xff] %v5004_v10  ;;  %v4710_v29 = vmul.f32 %v8988_v59, %v4645_v61  ;;  %v4711_v22 = vmul.f32 %v8988_v59, %v4646_v13  ;;  %v9723_v61 = vld [vmem:[#allocation42_spill] sm:$0xff] }
 0x50e   : > { %5069 = vst [vmem:[%s9013_s11 + $0x1a0] sm:$0xff] %v5005_v23  ;;  %v4773_v36 = vadd.f32 %v4709_v12, %v9716_v14  ;;  %v4712_v18 = vmul.f32 %v8988_v59, %v4647_v40 }
 0x50f   : > { %5070 = vst [vmem:[%s9013_s11 + $0x1a8] sm:$0xff] %v5006_v2  ;;  %v4774_v33 = vadd.f32 %v4710_v29, %v8958_v5  ;;  %v4775_v50 = vadd.f32 %v4711_v22, %v8961_v21 }
 0x510   : > { %v4933_v9 = vmul.f32 %v4867_v57, %v4773_v36  ;;  %v4776_v35 = vadd.f32 %v4712_v18, %v9717_v26 }
 0x511   : > { %v4934_v24 = vmul.f32 %v4867_v57, %v4774_v33  ;;  %v4935_v54 = vmul.f32 %v4872_v17, %v4775_v50  ;;  %v4535_v49 = vpop.f32.mrf.mxu2 }
 0x512   : > { %v5007_v31 = vmul.f32 %v9018_v6, %v4933_v9  ;;  %v4936_v52 = vmul.f32 %v4872_v17, %v4776_v35  ;;  %v4648_v60 = vmul.f32 %v4535_v49, %v4535_v49  ;;  %v4584_v8 = vpop.f32.mrf.mxu3  ;;  %v4439_v5 = vpop.f32.mrf.mxu0 }
 0x513   : > { %v5008_v21 = vmul.f32 %v9023_v47, %v4934_v24  ;;  %v5009_v34 = vmul.f32 %v9002_v44, %v4935_v54  ;;  %v4649_v0 = vmul.f32 %v4584_v8, %v4584_v8  ;;  %v4650_v51 = vmul.f32 %v4439_v5, %v4439_v5  ;;  %v4488_v62 = vpop.f32.mrf.mxu1 }
 0x514   : > { %5071 = vst [vmem:[%s9013_s11 + $0x1b0] sm:$0xff] %v5007_v31  ;;  %v5010_v3 = vmul.f32 %v9007_v39, %v4936_v52  ;;  %v4713_v1 = vmul.f32 %v8988_v59, %v4648_v60  ;;  %v4651_v4 = vmul.f32 %v4488_v62, %v4488_v62 }
 0x515   : > { %5072 = vst [vmem:[%s9013_s11 + $0x1b8] sm:$0xff] %v5008_v21  ;;  %v4714_v7 = vmul.f32 %v8988_v59, %v4649_v0  ;;  %v4715_v19 = vmul.f32 %v8988_v59, %v4650_v51 }
 0x516   : > { %5073 = vst [vmem:[%s9013_s11 + $0x1c0] sm:$0xff] %v5009_v34  ;;  %v4777_v53 = vadd.f32 %v4713_v1, %v9718_v28  ;;  %v4716_v30 = vmul.f32 %v8988_v59, %v4651_v4 }
 0x517   : > { %5074 = vst [vmem:[%s9013_s11 + $0x1c8] sm:$0xff] %v5010_v3  ;;  %v4778_v58 = vadd.f32 %v4714_v7, %v9719_v38  ;;  %v4779_v41 = vadd.f32 %v4715_v19, %v9720_v42 }
 0x518   : > { %v4937_v63 = vmul.f32 %v4872_v17, %v4777_v53  ;;  %v4780_v16 = vadd.f32 %v4716_v30, %v9721_v55 }
 0x519   : > { %v4938_v57 = vmul.f32 %v4872_v17, %v4778_v58  ;;  %v4939_v32 = vmul.f32 %v4877_v37, %v4779_v41  ;;  %v4537_v46 = vpop.f32.mrf.mxu2 }
 0x51a   : > { %v5011_v20 = vmul.f32 %v9018_v6, %v4937_v63  ;;  %v4940_v25 = vmul.f32 %v4877_v37, %v4780_v16  ;;  %v4652_v56 = vmul.f32 %v4537_v46, %v4537_v46  ;;  %v4586_v45 = vpop.f32.mrf.mxu3 }
 0x51b   : > { %v5012_v48 = vmul.f32 %v9023_v47, %v4938_v57  ;;  %v5013_v43 = vmul.f32 %v9002_v44, %v4939_v32  ;;  %v4653_v15 = vmul.f32 %v4586_v45, %v4586_v45 }
 0x51c   : > { %5075 = vst [vmem:[%s9013_s11 + $0x1d0] sm:$0xff] %v5011_v20  ;;  %v5014_v27 = vmul.f32 %v9007_v39, %v4940_v25  ;;  %v4717_v10 = vmul.f32 %v8988_v59, %v4652_v56 }
 0x51d   : > { %5076 = vst [vmem:[%s9013_s11 + $0x1d8] sm:$0xff] %v5012_v48  ;;  %v4718_v23 = vmul.f32 %v8988_v59, %v4653_v15 }
 0x51e   : > { %5077 = vst [vmem:[%s9013_s11 + $0x1e0] sm:$0xff] %v5013_v43  ;;  %v4781_v13 = vadd.f32 %v4717_v10, %v9723_v61 }
 0x51f   : > { %5078 = vst [vmem:[%s9013_s11 + $0x1e8] sm:$0xff] %v5014_v27  ;;  %v4782_v44 = vadd.f32 %v4718_v23, %v9724_v11 }
 0x520   : > { %v4941_v2 = vmul.f32 %v4877_v37, %v4781_v13 }
 0x521   : > { %v4942_v39 = vmul.f32 %v4877_v37, %v4782_v44 }
 0x522   : > { %v5015_v12 = vmul.f32 %v9018_v6, %v4941_v2 }
 0x523   : > { %v5016_v40 = vmul.f32 %v9023_v47, %v4942_v39 }
 0x524   : > { %5079 = vst [vmem:[%s9013_s11 + $0x1f0] sm:$0xff] %v5015_v12 }
 0x525   : > { %5080 = vst [vmem:[%s9013_s11 + $0x1f8] sm:$0xff] %v5016_v40 }
 0x526   : > { %6200 = shalt.err (!%p6197_p6)
}
 0x527   : > { %s6307_s5 = smov 512   ;;  %s6308_s11 = smov 1024  }
 0x528   : > { %s6309_s15 = smov 32  }
 0x529   : > { %6041 = dma.vmem_to_hbm [thread:$0]  (%p6444_p0), %s5098_s25, 8192, %s5100_s30, %s5082_s16, %s6307_s5, %s6308_s11, %s6309_s15  }
 0x52a PF: > { %p6053_p8 = scmp.ge.s32.totalorder %s6303_s29, 2  ;;  %s5114_s14 = sand.u32 1, %s6259_s18  }
 0x52b   : > { %s5115_s0 = scalar_lea.sflag [#allocation3], %s5114_s14 }
 0x52c   : > { %p6048_p9 = pnand %p6053_p8, %p6449_p2 }
 0x52e   : > { %p6049_p10 = pneg %p6048_p9 }
 0x530   : > { %6254 = dma.done.wait (%p6049_p10), %s5115_s0, 8192  }
 0x531   : > { %6256 = vsyncadd (%p6049_p10), %s5115_s0, 4294959104  ;;  %s19_s29 = sadd.s32 1, %s6303_s29   ;;  %s9725_s12 = sld [smem:[#allocation12_spill]] }
 0x532   : > { %p16_p3 = scmp.ge.s32.totalorder %s19_s29, 6   ;;  %s9726_s30 = sld [smem:[#allocation13_spill]] }
 0x533   : > { %s9727_s16 = sld [smem:[#allocation10_spill]]  ;;  %s9729_s18 = smov %s6263_s19 }
 0x534   : > { %s9728_s9 = sld [smem:[#allocation11_spill]]  ;;  %s9730_s19 = smov %s6267_s20 }
 0x535   : > { %s9731_s20 = smov %s6436_s7  ;;  %s9732_s21 = smov %s6275_s22 }
 0x536   : > { %s9734_s23 = smov %s6283_s24  ;;  %s9736_s25 = smov %s6295_s27 }
 0x537   : > { %s9733_s22 = smov %s9725_s12  ;;  %s9737_s26 = smov %s6299_s28 }
 0x538   : > { %s9735_s24 = smov %s9726_s30  ;;  %18 = sbr.rel (!%p16_p3) target bundleno = 11 (0xb), region = 170 }
 0x539   : > { %s9738_s27 = smov %s9727_s16 }
 0x53a   : > { %s9739_s28 = smov %s9728_s9 }
 0x53d   :  { %5121 = vsyncpa [#allocation3], 1 }
 0x53e   :  { %5123 = vsyncpa [#allocation3 + $0x1], 1 }
 0x53f   :  { %5124 = vsyncpa [#allocation4], 1 }
 0x540   :  { %5126 = vsyncpa [#allocation4 + $0x1], 1 }

</bundles_post_ra>
